<compile_context>
chip_gen: v6e
topology: v6e:2x2x1
jax: 0.10.0
libtpu: 0.0.40
codegen_flags: <defaults>
</compile_context>

<pallas_src>
import jax
import jax.numpy as jnp
from jax.experimental import pallas as pl
from jax.experimental.pallas import tpu as pltpu

NDF = 8            # ndf  -> ndf*8 = 64 feature channels
NEF = 32           # nef  (text embedding dim used for conditioning)
BN_EPS = 1e-5
LEAK = 0.2
HW = 16            # 4 * 4 spatial positions
VMEM_LIMIT = 32 * 1024 * 1024


# ----------------------------- Pallas kernels -----------------------------

def _chan_pool_tiled(v, c):
    """v: (1, 16*c), columns ordered (spatial_pos, channel).

    Returns (1, 16*c) where every column holds the sum over the 16 spatial
    positions of its channel.  log2(16) = 4 XLU lane-rolls (keeps MXU/VPU
    slots free) instead of a pooling matmul or an O(B^2) selector.
    """
    s = v
    for sh in (c, 2 * c, 4 * c, 8 * c):
        s = s + pltpu.roll(s, sh, axis=1)
    return s


def _cond_kernel(x_ref, c_ref, wh_ref, wc_ref, g_ref, b_ref, w2_ref,
                 bias_ref, o_ref):
    # jointConv 3x3: one dense (16*Cin_h, 16*C) MXU contraction on the
    # NCHW-flat h rows (read once, no im2col) + a K=nef dot for c_code.
    y = jnp.dot(x_ref[...], wh_ref[...], preferred_element_type=jnp.float32)
    y = y + jnp.dot(c_ref[...], wc_ref[...], preferred_element_type=jnp.float32)

    nb = y.shape[0]
    c8 = y.shape[1] // HW
    inv_n = 1.0 / (nb * HW)

    # BatchNorm2d, training-mode batch statistics over all N*H*W elements.
    # Column sums via MXU ones-dot; channel pooling via lane-rolls; f32 math.
    ones = jnp.ones((1, nb), jnp.float32)
    colsum = jnp.dot(ones, y, preferred_element_type=jnp.float32)   # (1, 16*C)
    mean = _chan_pool_tiled(colsum, c8) * inv_n                     # tiled per-channel mean
    d = y - mean
    colsq = jnp.dot(ones, d * d, preferred_element_type=jnp.float32)
    var = _chan_pool_tiled(colsq, c8) * inv_n                       # biased variance
    scale = g_ref[...] * jax.lax.rsqrt(var + BN_EPS)
    shift = b_ref[...] - mean * scale
    a = y * scale + shift
    act = jnp.where(a >= 0.0, a, LEAK * a)                          # LeakyReLU(0.2)

    # outlogits: Conv2d(C, 1, k=4, s=4) on the 4x4 map == (B,16*C)@(16*C,1).
    logit = jnp.dot(act, w2_ref[...], preferred_element_type=jnp.float32)
    o_ref[...] = jax.nn.sigmoid(logit + bias_ref[0, 0])


def _uncond_kernel(x_ref, w2_ref, bias_ref, o_ref):
    logit = jnp.dot(x_ref[...], w2_ref[...], preferred_element_type=jnp.float32)
    o_ref[...] = jax.nn.sigmoid(logit + bias_ref[0, 0])


# ------------------------- parameter preparation ---------------------------

def _conv3x3_as_dense(w_hwio, hw=4):
    """Fold a 3x3 / stride-1 / pad-1 conv on an hw x hw map into a dense matrix.

    w_hwio: (3, 3, cin, cout) -> (cin*hw*hw, hw*hw*cout), with rows ordered
    (ci, iy, ix) (matching an NCHW-flattened input) and columns ordered
    (oy, ox, co).
    """
    cin, cout = w_hwio.shape[2], w_hwio.shape[3]
    pos = jnp.arange(hw)
    dy = pos[:, None] - pos[None, :] + 1          # [iy, oy]
    dx = pos[:, None] - pos[None, :] + 1          # [ix, ox]
    vy = (dy >= 0) & (dy < 3)
    vx = (dx >= 0) & (dx < 3)
    dyc = jnp.clip(dy, 0, 2)
    dxc = jnp.clip(dx, 0, 2)
    # gather taps -> (iy, oy, ix, ox, cin, cout)
    w_g = w_hwio[dyc[:, :, None, None], dxc[None, None, :, :]]
    mask = (vy[:, :, None, None] & vx[None, None, :, :]).astype(w_hwio.dtype)
    w_g = w_g * mask[..., None, None]
    # -> (cin, iy, ix, oy, ox, cout)
    w_g = jnp.transpose(w_g, (4, 0, 2, 1, 3, 5))
    return w_g.reshape(cin * hw * hw, hw * hw * cout)


def prepare_params(params, ndf=NDF, nef=NEF):
    """One-time layout/precision transformation of the raw module params."""
    c8 = ndf * 8
    out_w = params["out_w"]                                          # (c8, 4, 4)
    prep = {
        # rows ordered (ci, y, x): matches NCHW-flattened h for the uncond path
        "w2_nchw": out_w.reshape(c8 * HW, 1).astype(jnp.bfloat16),
        # rows ordered (pos, co): matches the joint-conv activation columns
        "w2_pc": jnp.transpose(out_w, (1, 2, 0)).reshape(HW * c8, 1)
                 .astype(jnp.float32),
        "bias": params["out_b"].reshape(1, 1).astype(jnp.float32),
    }
    if "joint_w" in params:
        w = params["joint_w"]                                        # (3,3,cin,cout)
        wh = _conv3x3_as_dense(w[:, :, :c8, :])                      # (c8*16, 16*c8)
        wc = _conv3x3_as_dense(w[:, :, c8:, :])                      # (nef*16, 16*c8)
        wc = wc.reshape(nef, HW, HW * c8).sum(axis=1)                # (nef, 16*c8)
        prep["wh"] = wh.astype(jnp.bfloat16)
        prep["wc"] = wc.astype(jnp.bfloat16)
        prep["gamma_full"] = jnp.tile(params["joint_gamma"], HW).reshape(1, HW * c8)
        prep["beta_full"] = jnp.tile(params["joint_beta"], HW).reshape(1, HW * c8)
    return prep


# ------------------------------- wrappers ----------------------------------

def _batch_tile(batch, target=256):
    if batch <= target:
        return batch
    for tb in range(target, 7, -1):
        if batch % tb == 0 and tb % 8 == 0:
            return tb
    return batch           # fallback: single block (always legal)


def d_get_logits_forward(prep, h_code, c_code=None, bcondition=False):
    """h_code: (B, ndf*8, 4, 4) NCHW, c_code: (B, nef). Returns (B,) probs."""
    B, C, H, W = h_code.shape
    assert H == 4 and W == 4, "D_GET_LOGITS expects a 4x4 feature map"
    hwc = C * H * W
    x_flat = h_code.reshape(B, hwc)                    # pure view, columns (ci, y, x)

    if bcondition and c_code is not None:
        out = pl.pallas_call(
            _cond_kernel,
            out_shape=jax.ShapeDtypeStruct((B, 1), jnp.float32),
            in_specs=[
                pl.BlockSpec(memory_space=pltpu.MemorySpace.VMEM),   # x
                pl.BlockSpec(memory_space=pltpu.MemorySpace.VMEM),   # c_code
                pl.BlockSpec(memory_space=pltpu.MemorySpace.VMEM),   # wh (dense conv)
                pl.BlockSpec(memory_space=pltpu.MemorySpace.VMEM),   # wc (c-code conv)
                pl.BlockSpec(memory_space=pltpu.MemorySpace.VMEM),   # gamma (tiled)
                pl.BlockSpec(memory_space=pltpu.MemorySpace.VMEM),   # beta  (tiled)
                pl.BlockSpec(memory_space=pltpu.MemorySpace.VMEM),   # out conv weight
                pl.BlockSpec(memory_space=pltpu.MemorySpace.SMEM),   # scalar bias
            ],
            out_specs=pl.BlockSpec(memory_space=pltpu.MemorySpace.VMEM),
            compiler_params=pltpu.CompilerParams(vmem_limit_bytes=VMEM_LIMIT),
        )(x_flat.astype(jnp.bfloat16), c_code.astype(jnp.bfloat16),
          prep["wh"], prep["wc"], prep["gamma_full"], prep["beta_full"],
          prep["w2_pc"], prep["bias"])
    else:
        tb = _batch_tile(B)
        out = pl.pallas_call(
            _uncond_kernel,
            out_shape=jax.ShapeDtypeStruct((B, 1), jnp.float32),
            grid=(B // tb,),
            in_specs=[
                pl.BlockSpec((tb, hwc), lambda i: (i, 0)),
                pl.BlockSpec((hwc, 1), lambda i: (0, 0)),
                pl.BlockSpec((1, 1), lambda i: (0, 0),
                             memory_space=pltpu.MemorySpace.SMEM),
            ],
            out_specs=pl.BlockSpec((tb, 1), lambda i: (i, 0)),
            compiler_params=pltpu.CompilerParams(
                dimension_semantics=("parallel",),
                vmem_limit_bytes=VMEM_LIMIT),
        )(x_flat.astype(jnp.bfloat16), prep["w2_nchw"], prep["bias"])
    return out.reshape(-1)


# ------------------------------ parameters ---------------------------------

def init_params(key, ndf=NDF, nef=NEF):
    c8 = ndf * 8
    cin = c8 + nef
    ks = jax.random.split(key, 3)

    def nrm(k, shape, std=0.02):
        return (std * jax.random.normal(k, shape)).astype(jnp.float32)

    return {
        "joint_w": nrm(ks[0], (3, 3, cin, c8)),       # conv3x3 weight, HWIO
        "joint_gamma": jnp.ones((c8,), jnp.float32),
        "joint_beta": jnp.zeros((c8,), jnp.float32),
        "out_w": nrm(ks[1], (c8, 4, 4)),              # Conv2d(c8, 1, k=4, s=4)
        "out_b": nrm(ks[2], (1,)),
    }


# ---------------------------- pure-JAX reference ---------------------------

def _reference_forward(params, h_code, c_code, bcondition):
    B, C, H, W = h_code.shape
    x = h_code
    if bcondition and c_code is not None:
        nef = c_code.shape[-1]
        cb = jnp.broadcast_to(c_code[:, :, None, None], (B, nef, H, W))
        x = jnp.concatenate([h_code, cb], axis=1)
        w_oihw = jnp.transpose(params["joint_w"], (3, 2, 0, 1))
        y = jax.lax.conv_general_dilated(
            x, w_oihw, (1, 1), ((1, 1), (1, 1)),
            dimension_numbers=("NCHW", "OIHW", "NCHW"))
        mean = jnp.mean(y, axis=(0, 2, 3), keepdims=True)
        var = jnp.mean(jnp.square(y - mean), axis=(0, 2, 3), keepdims=True)
        y = (y - mean) / jnp.sqrt(var + BN_EPS)
        y = (y * params["joint_gamma"][None, :, None, None]
             + params["joint_beta"][None, :, None, None])
        x = jnp.where(y >= 0.0, y, LEAK * y)
    w2_oihw = params["out_w"][None]                                  # (1,C,4,4)
    logit = jax.lax.conv_general_dilated(
        x, w2_oihw, (4, 4), "VALID",
        dimension_numbers=("NCHW", "OIHW", "NCHW"))
    logit = logit + params["out_b"][0]
    return jax.nn.sigmoid(logit).reshape(-1)


# --------------------------------- main ------------------------------------

if __name__ == "__main__":
    key = jax.random.PRNGKey(0)
    kp, kh, kc = jax.random.split(key, 3)
    params = init_params(kp)
    prep = prepare_params(params)          # one-time weight layout/bf16 prep

    B = 2
    h_code = jax.random.normal(kh, (B, NDF * 8, 4, 4), jnp.float32)
    c_code = jax.random.normal(kc, (B, NEF), jnp.float32)

    fwd_cond = jax.jit(lambda p, h, c: d_get_logits_forward(p, h, c, bcondition=True))
    fwd_uncond = jax.jit(lambda p, h: d_get_logits_forward(p, h, None, bcondition=False))

    out_c = fwd_cond(prep, h_code, c_code)
    out_u = fwd_uncond(prep, h_code)
    jax.block_until_ready((out_c, out_u))

    assert out_c.shape == (B,) and out_u.shape == (B,)
    assert bool(jnp.all((out_c > 0.0) & (out_c < 1.0)))
    assert bool(jnp.all((out_u > 0.0) & (out_u < 1.0)))

    ref_c = _reference_forward(params, h_code, c_code, True)
    ref_u = _reference_forward(params, h_code, None, False)
    # bf16 matmul operands (f32 accumulate / f32 epilogue) vs a pure-f32 ref.
    assert bool(jnp.allclose(out_c, ref_c, rtol=5e-3, atol=5e-3))
    assert bool(jnp.allclose(out_u, ref_u, rtol=5e-3, atol=5e-3))

    print("KERNEL_OK")
</pallas_src>

<mosaic_0001>
module attributes {stable_mosaic.version = 11 : i64} {
  func.func @_cond_kernel(%arg0: memref<2x1024xbf16, #tpu.memory_space<vmem>>, %arg1: memref<2x32xbf16, #tpu.memory_space<vmem>>, %arg2: memref<1024x1024xbf16, #tpu.memory_space<vmem>>, %arg3: memref<32x1024xbf16, #tpu.memory_space<vmem>>, %arg4: memref<1x1024xf32, #tpu.memory_space<vmem>>, %arg5: memref<1x1024xf32, #tpu.memory_space<vmem>>, %arg6: memref<1024x1xf32, #tpu.memory_space<vmem>>, %arg7: memref<1x1xf32, #tpu.memory_space<smem>>, %arg8: memref<2x1xf32, #tpu.memory_space<vmem>>) attributes {dimension_semantics = [], scalar_prefetch = 0 : i64, scratch_operands = 0 : i64, tpu.core_type = #tpu.core_type<tc>} {
    %c0 = arith.constant 0 : index
    %c0_0 = arith.constant 0 : index
    %0 = vector.load %arg0[%c0, %c0_0] : memref<2x1024xbf16, #tpu.memory_space<vmem>>, vector<2x1024xbf16>
    %c0_1 = arith.constant 0 : index
    %c0_2 = arith.constant 0 : index
    %1 = vector.load %arg2[%c0_1, %c0_2] : memref<1024x1024xbf16, #tpu.memory_space<vmem>>, vector<1024x1024xbf16>
    %cst = arith.constant dense<0.000000e+00> : vector<2x1024xf32>
    %2 = tpu.matmul %0, %1, %cst {dimension_numbers = #tpu.dot_dimension_numbers<[1], [0], [0], [1], [0, 0, 1, 1], [], []>} : vector<2x1024xbf16>, vector<1024x1024xbf16>, vector<2x1024xf32> -> vector<2x1024xf32>
    %c0_3 = arith.constant 0 : index
    %c0_4 = arith.constant 0 : index
    %3 = vector.load %arg1[%c0_3, %c0_4] : memref<2x32xbf16, #tpu.memory_space<vmem>>, vector<2x32xbf16>
    %c0_5 = arith.constant 0 : index
    %c0_6 = arith.constant 0 : index
    %4 = vector.load %arg3[%c0_5, %c0_6] : memref<32x1024xbf16, #tpu.memory_space<vmem>>, vector<32x1024xbf16>
    %cst_7 = arith.constant dense<0.000000e+00> : vector<2x1024xf32>
    %5 = tpu.matmul %3, %4, %cst_7 {dimension_numbers = #tpu.dot_dimension_numbers<[1], [0], [0], [1], [0, 0, 1, 1], [], []>} : vector<2x32xbf16>, vector<32x1024xbf16>, vector<2x1024xf32> -> vector<2x1024xf32>
    %6 = arith.addf %2, %5 : vector<2x1024xf32>
    %cst_8 = arith.constant 1.000000e+00 : f32
    %7 = vector.broadcast %cst_8 : f32 to vector<1x2xf32>
    %cst_9 = arith.constant dense<0.000000e+00> : vector<1x1024xf32>
    %8 = tpu.matmul %7, %6, %cst_9 {dimension_numbers = #tpu.dot_dimension_numbers<[1], [0], [0], [1], [0, 0, 1, 1], [], []>} : vector<1x2xf32>, vector<2x1024xf32>, vector<1x1024xf32> -> vector<1x1024xf32>
    %c64_i32 = arith.constant 64 : i32
    %9 = tpu.dynamic_rotate %8 by %c64_i32 dim 1 : vector<1x1024xf32>, i32 -> vector<1x1024xf32>
    %10 = arith.addf %8, %9 : vector<1x1024xf32>
    %c128_i32 = arith.constant 128 : i32
    %11 = tpu.dynamic_rotate %10 by %c128_i32 dim 1 : vector<1x1024xf32>, i32 -> vector<1x1024xf32>
    %12 = arith.addf %10, %11 : vector<1x1024xf32>
    %c256_i32 = arith.constant 256 : i32
    %13 = tpu.dynamic_rotate %12 by %c256_i32 dim 1 : vector<1x1024xf32>, i32 -> vector<1x1024xf32>
    %14 = arith.addf %12, %13 : vector<1x1024xf32>
    %c512_i32 = arith.constant 512 : i32
    %15 = tpu.dynamic_rotate %14 by %c512_i32 dim 1 : vector<1x1024xf32>, i32 -> vector<1x1024xf32>
    %16 = arith.addf %14, %15 : vector<1x1024xf32>
    %cst_10 = arith.constant 3.125000e-02 : f32
    %17 = vector.broadcast %cst_10 : f32 to vector<1x1024xf32>
    %18 = arith.mulf %16, %17 : vector<1x1024xf32>
    %19 = vector.broadcast %18 : vector<1x1024xf32> to vector<2x1024xf32>
    %20 = arith.subf %6, %19 : vector<2x1024xf32>
    %21 = arith.mulf %20, %20 : vector<2x1024xf32>
    %cst_11 = arith.constant dense<0.000000e+00> : vector<1x1024xf32>
    %22 = tpu.matmul %7, %21, %cst_11 {dimension_numbers = #tpu.dot_dimension_numbers<[1], [0], [0], [1], [0, 0, 1, 1], [], []>} : vector<1x2xf32>, vector<2x1024xf32>, vector<1x1024xf32> -> vector<1x1024xf32>
    %c64_i32_12 = arith.constant 64 : i32
    %23 = tpu.dynamic_rotate %22 by %c64_i32_12 dim 1 : vector<1x1024xf32>, i32 -> vector<1x1024xf32>
    %24 = arith.addf %22, %23 : vector<1x1024xf32>
    %c128_i32_13 = arith.constant 128 : i32
    %25 = tpu.dynamic_rotate %24 by %c128_i32_13 dim 1 : vector<1x1024xf32>, i32 -> vector<1x1024xf32>
    %26 = arith.addf %24, %25 : vector<1x1024xf32>
    %c256_i32_14 = arith.constant 256 : i32
    %27 = tpu.dynamic_rotate %26 by %c256_i32_14 dim 1 : vector<1x1024xf32>, i32 -> vector<1x1024xf32>
    %28 = arith.addf %26, %27 : vector<1x1024xf32>
    %c512_i32_15 = arith.constant 512 : i32
    %29 = tpu.dynamic_rotate %28 by %c512_i32_15 dim 1 : vector<1x1024xf32>, i32 -> vector<1x1024xf32>
    %30 = arith.addf %28, %29 : vector<1x1024xf32>
    %cst_16 = arith.constant 3.125000e-02 : f32
    %31 = vector.broadcast %cst_16 : f32 to vector<1x1024xf32>
    %32 = arith.mulf %30, %31 : vector<1x1024xf32>
    %c0_17 = arith.constant 0 : index
    %c0_18 = arith.constant 0 : index
    %33 = vector.load %arg4[%c0_17, %c0_18] : memref<1x1024xf32, #tpu.memory_space<vmem>>, vector<1x1024xf32>
    %cst_19 = arith.constant 9.99999974E-6 : f32
    %34 = vector.broadcast %cst_19 : f32 to vector<1x1024xf32>
    %35 = arith.addf %32, %34 : vector<1x1024xf32>
    %36 = math.rsqrt %35 : vector<1x1024xf32>
    %37 = arith.mulf %33, %36 : vector<1x1024xf32>
    %c0_20 = arith.constant 0 : index
    %c0_21 = arith.constant 0 : index
    %38 = vector.load %arg5[%c0_20, %c0_21] : memref<1x1024xf32, #tpu.memory_space<vmem>>, vector<1x1024xf32>
    %39 = arith.mulf %18, %37 : vector<1x1024xf32>
    %40 = arith.subf %38, %39 : vector<1x1024xf32>
    %41 = vector.broadcast %37 : vector<1x1024xf32> to vector<2x1024xf32>
    %42 = arith.mulf %6, %41 : vector<2x1024xf32>
    %43 = vector.broadcast %40 : vector<1x1024xf32> to vector<2x1024xf32>
    %44 = arith.addf %42, %43 : vector<2x1024xf32>
    %cst_22 = arith.constant 0.000000e+00 : f32
    %45 = vector.broadcast %cst_22 : f32 to vector<2x1024xf32>
    %46 = arith.cmpf oge, %44, %45 : vector<2x1024xf32>
    %cst_23 = arith.constant 2.000000e-01 : f32
    %47 = vector.broadcast %cst_23 : f32 to vector<2x1024xf32>
    %48 = arith.mulf %47, %44 : vector<2x1024xf32>
    %49 = arith.select %46, %44, %48 : vector<2x1024xi1>, vector<2x1024xf32>
    %c0_24 = arith.constant 0 : index
    %c0_25 = arith.constant 0 : index
    %50 = vector.load %arg6[%c0_24, %c0_25] : memref<1024x1xf32, #tpu.memory_space<vmem>>, vector<1024x1xf32>
    %cst_26 = arith.constant dense<0.000000e+00> : vector<2x1xf32>
    %51 = tpu.matmul %49, %50, %cst_26 {dimension_numbers = #tpu.dot_dimension_numbers<[1], [0], [0], [1], [0, 0, 1, 1], [], []>} : vector<2x1024xf32>, vector<1024x1xf32>, vector<2x1xf32> -> vector<2x1xf32>
    %c0_27 = arith.constant 0 : index
    %c0_28 = arith.constant 0 : index
    %52 = memref.load %arg7[%c0_27, %c0_28] : memref<1x1xf32, #tpu.memory_space<smem>>
    %53 = vector.broadcast %52 : f32 to vector<2x1xf32>
    %54 = arith.addf %51, %53 : vector<2x1xf32>
    %55 = arith.negf %54 : vector<2x1xf32>
    %56 = math.exp %55 : vector<2x1xf32>
    %cst_29 = arith.constant 1.000000e+00 : f32
    %57 = vector.broadcast %cst_29 : f32 to vector<2x1xf32>
    %58 = arith.addf %57, %56 : vector<2x1xf32>
    %59 = arith.divf %57, %58 : vector<2x1xf32>
    %c0_30 = arith.constant 0 : index
    %c0_31 = arith.constant 0 : index
    %60 = vector.load %arg8[%c0_30, %c0_31] : memref<2x1xf32, #tpu.memory_space<vmem>>, vector<2x1xf32>
    tpu.vector_store %arg8[%c0_30, %c0_31], %59 {strides = array<i32>} : memref<2x1xf32, #tpu.memory_space<vmem>>, vector<2x1xf32>,
    return
  }
}

</mosaic_0001>

<bundles_post_ra>
// kernel: _lambda_.1
= control target key start
LH: loop header
LB: loop body
LE: loop exit
PB: predicated region body
PF: predicated region fallthrough
CT: control target
= control target key end

     0   :  { %14 = vsyncpa [#allocation4], 0  ;;  %s7198_s0 = inlined_call_operand.vmem [shape: bf16[2,1024], index: 0, kind: input, shape index: {}]   ;;  %s7199_s1 = inlined_call_operand.vmem [shape: bf16[2,32], index: 1, kind: input, shape index: {}]   ;;  %s7200_s2 = inlined_call_operand.hbm [shape: bf16[1024,1024], index: 2, kind: input, shape index: {}]   ;;  %s7201_s3 = inlined_call_operand.hbm [shape: bf16[32,1024], index: 3, kind: input, shape index: {}]   ;;  %s7202_s4 = inlined_call_operand.hbm [shape: f32[1,1024], index: 4, kind: input, shape index: {}]   ;;  %s7203_s5 = inlined_call_operand.hbm [shape: f32[1,1024], index: 5, kind: input, shape index: {}]   ;;  %s7204_s6 = inlined_call_operand.vmem [shape: f32[1024,1], index: 6, kind: input, shape index: {}]   ;;  %s7205_s7 = inlined_call_operand.<no memory space> [shape: f32[1,1], index: 7, kind: input, shape index: {}]   ;;  %s7206_s8 = inlined_call_operand.vmem [shape: f32[2,1], index: 8, kind: output, shape index: {}]  }
   0x1   :  { %15 = vsyncpa [#allocation6], 0 }
   0x2   :  { %16 = vsyncpa [#allocation9], 0  ;;  %s6364_s27 = smov [#allocation5]   ;;  %s6365_s29 = smov [#allocation3]  }
   0x3   :  { %s38_s28 = sshll.u32 %s6364_s27, 4  ;;  %s26_s30 = sshll.u32 %s6365_s29, 4  ;;  %s39_s28 = int_to_ptr.vmem [resolvable:$true] %s38_s28  ;;  %s27_s30 = int_to_ptr.vmem [resolvable:$true] %s26_s30 }
   0x4   :  { %s6286_s9 = scalar_lea.vmem %s39_s28, 2048  ;;  %p6291_p1 = scmp.lt.s32.totalorder %s39_s28, %s39_s28 }
   0x5   :  { %p6287_p0 = scmp.ne.s32.totalorder %s39_s28, %s6286_s9  ;;  %p6292_p2 = scmp.lt.s32.totalorder %s6286_s9, %s6286_s9 }
   0x7   :  { %p6293_p3 = por %p6292_p2, %p6291_p1 }
   0x9   :  { %p6294_p4 = pnand %p6293_p3, %p6287_p0 }
   0xb   :  { %6297 = shalt.err (!%p6294_p4)
}
   0xc   :  { %s6366_s10 = smov 512   ;;  %s6367_s11 = smov 32  }
   0xd   :  { %44 = dma.hbm_to_vmem [thread:$0]  %s7201_s3, 2048, %s39_s28, [#allocation6], %s6366_s10, %s6366_s10, %s6367_s11  }
   0xe   :  { %s6306_s14 = scalar_lea.vmem %s27_s30, 65536  ;;  %p6311_p6 = scmp.lt.s32.totalorder %s27_s30, %s27_s30 }
   0xf   :  { %p6307_p5 = scmp.ne.s32.totalorder %s27_s30, %s6306_s14  ;;  %p6312_p7 = scmp.lt.s32.totalorder %s6306_s14, %s6306_s14 }
  0x11   :  { %p6313_p8 = por %p6312_p7, %p6311_p6 }
  0x13   :  { %p6314_p9 = pnand %p6313_p8, %p6307_p5 }
  0x15   :  { %6317 = shalt.err (!%p6314_p9)
}
  0x16   :  { %32 = dma.hbm_to_vmem [thread:$0]  %s7200_s2, 65536, %s27_s30, [#allocation4], %s6366_s10, %s6366_s10, %s6367_s11  }
  0x17   :  { %s6368_s17 = smov [#allocation7]   ;;  %s6369_s19 = smov [#allocation8]  }
  0x18   :  { %s51_s18 = sshll.u32 %s6368_s17, 4  ;;  %s61_s20 = sshll.u32 %s6369_s19, 4  ;;  %s52_s18 = int_to_ptr.vmem [resolvable:$true] %s51_s18  ;;  %s62_s20 = int_to_ptr.vmem [resolvable:$true] %s61_s20 }
  0x19   :  { %s6326_s21 = scalar_lea.vmem %s52_s18, 128  ;;  %p6331_p11 = scmp.lt.s32.totalorder %s52_s18, %s52_s18 }
  0x1a   :  { %p6327_p10 = scmp.ne.s32.totalorder %s52_s18, %s6326_s21  ;;  %p6332_p12 = scmp.lt.s32.totalorder %s6326_s21, %s6326_s21 }
  0x1c   :  { %p6333_p13 = por %p6332_p12, %p6331_p11 }
  0x1e   :  { %p6334_p0 = pnand %p6333_p13, %p6327_p10 }
  0x20   :  { %6337 = shalt.err (!%p6334_p0)
}
  0x21   :  { %54 = dma.hbm_to_vmem [thread:$0]  %s7202_s4, 128, %s52_s18, [#allocation6]  }
  0x22   :  { %s6346_s23 = scalar_lea.vmem %s62_s20, 128  ;;  %p6351_p2 = scmp.lt.s32.totalorder %s62_s20, %s62_s20 }
  0x23   :  { %p6347_p1 = scmp.ne.s32.totalorder %s62_s20, %s6346_s23  ;;  %p6352_p3 = scmp.lt.s32.totalorder %s6346_s23, %s6346_s23 }
  0x25   :  { %p6353_p4 = por %p6352_p3, %p6351_p2 }
  0x27   :  { %p6354_p5 = pnand %p6353_p4, %p6347_p1 }
  0x29   :  { %6357 = shalt.err (!%p6354_p5)
}
  0x2a   :  { %64 = dma.hbm_to_vmem [thread:$0]  %s7203_s5, 128, %s62_s20, [#allocation9]  }
  0x2b   :  { %6358 = dma.done.wait [#allocation4], 65536  }
  0x2c   :  { %6359 = vsyncadd [#allocation4], 4294901760 }
  0x2d   :  { %6360 = dma.done.wait [#allocation6], 2176  }
  0x2e   :  { %6361 = vsyncadd [#allocation6], 4294965120 }
  0x2f   :  { %6362 = dma.done.wait [#allocation9], 128  }
  0x30   :  { %6363 = vsyncadd [#allocation9], 4294967168  ;;  %v6370_v0 = vmov 0   ;;  %v604_v1 = vld [vmem:[#allocation5 + $0x40] sm:$0xff]  ;;  %v605_v3 = vld [vmem:[#allocation5 + $0x48] sm:$0xff]  ;;  %vm692_vm0 = vcmask 261120   ;;  %v865_v47 = vlaneseq }
  0x31   :  { %728 = vmatprep.mubr.bf16.mxu0 %v6370_v0  ;;  %769 = vmatprep.mubr.bf16.mxu1 %v6370_v0  ;;  %v608_v2 = vld [vmem:[#allocation5 + $0x60] sm:$0xff]  ;;  %v609_v5 = vld [vmem:[#allocation5 + $0x68] sm:$0xff]  ;;  %v606_v15 = vld [vmem:[#allocation5 + $0x50] sm:$0xff]  ;;  %v6371_v45 = vmov 1966171168   ;;  %vm4138_vm1 = vcmask 1041408  }
  0x32   :  { %v5566_v4 = vcombine.high %v604_v1, %v608_v2  ;;  %v5565_v6 = vcombine.low %v604_v1, %v608_v2  ;;  %v596_v7 = vld [vmem:[#allocation5] sm:$0xff]  ;;  %v5568_v9 = vcombine.high %v605_v3, %v609_v5  ;;  %v5567_v10 = vcombine.low %v605_v3, %v609_v5  ;;  %v597_v12 = vld [vmem:[#allocation5 + $0x8] sm:$0xff]  ;;  %v610_v16 = vld [vmem:[#allocation5 + $0x70] sm:$0xff] }
  0x33   :  { %v600_v8 = vld [vmem:[#allocation5 + $0x20] sm:$0xff]  ;;  %v601_v13 = vld [vmem:[#allocation5 + $0x28] sm:$0xff]  ;;  %v607_v17 = vld [vmem:[#allocation5 + $0x58] sm:$0xff]  ;;  %v5570_v21 = vcombine.high %v606_v15, %v610_v16  ;;  %v5569_v28 = vcombine.low %v606_v15, %v610_v16  ;;  %v863_v46 = vunpack.c.l.s4 %v6371_v45  ;;  %v6440_v57 = vshrl.u32 %v865_v47, 7 }
  0x34   :  { %v5558_v11 = vcombine.high %v596_v7, %v600_v8  ;;  %708 = vmatprep.subr.bf16.mxu0 %v5566_v4  ;;  %v5560_v14 = vcombine.high %v597_v12, %v601_v13  ;;  %749 = vmatprep.subr.bf16.mxu1 %v5568_v9  ;;  %v5557_v18 = vcombine.low %v596_v7, %v600_v8  ;;  %v611_v19 = vld [vmem:[#allocation5 + $0x78] sm:$0xff]  ;;  %v598_v23 = vld [vmem:[#allocation5 + $0x10] sm:$0xff]  ;;  %v595_v27 = vld [vmem:[%s7199_s1] sm:$0x1]  ;;  %vm4134_vm2 = vcmask 15360  }
  0x35   :  { %709 = vmatpush1.bf16.msra.mxu0 %v5565_v6  ;;  %750 = vmatpush1.bf16.msra.mxu1 %v5567_v10  ;;  %v5559_v20 = vcombine.low %v597_v12, %v601_v13  ;;  %v5572_v22 = vcombine.high %v607_v17, %v611_v19  ;;  %v602_v24 = vld [vmem:[#allocation5 + $0x30] sm:$0xff]  ;;  %v599_v25 = vld [vmem:[#allocation5 + $0x18] sm:$0xff]  ;;  %v5571_v29 = vcombine.low %v607_v17, %v611_v19  ;;  %v139_v32 = vld [vmem:[#allocation3 + $0x1c0] sm:$0xff]  ;;  %v864_v56 = vunpack.c.0.s8 %v863_v46 }
  0x36   :  { %710 = vmatprep.subr.bf16.mxu0 %v5558_v11  ;;  %751 = vmatprep.subr.bf16.mxu1 %v5560_v14  ;;  %v603_v26 = vld [vmem:[#allocation5 + $0x38] sm:$0xff]  ;;  %v5562_v30 = vcombine.high %v598_v23, %v602_v24  ;;  %v143_v33 = vld [vmem:[#allocation3 + $0x1e0] sm:$0xff]  ;;  %v5561_v36 = vcombine.low %v598_v23, %v602_v24  ;;  %vm5548_vm12 = vcmask 1024  }
  0x37   :  { %v5564_v31 = vcombine.high %v599_v25, %v603_v26  ;;  %v267_v34 = vld [vmem:[#allocation3 + $0x5c0] sm:$0xff]  ;;  %v5563_v37 = vcombine.low %v599_v25, %v603_v26  ;;  %v5634_v38 = vcombine.high %v139_v32, %v143_v33  ;;  %v5633_v44 = vcombine.low %v139_v32, %v143_v33 }
  0x38   :  { %v271_v35 = vld [vmem:[#allocation3 + $0x5e0] sm:$0xff]  ;;  %v6443_v2 = vsub.s32 %v864_v56, %v6440_v57 }
  0x39   :  { %711 = vmatpush1.bf16.msra.mxu0 %v5557_v18  ;;  %752 = vmatpush1.bf16.msra.mxu1 %v5559_v20  ;;  %v5762_v39 = vcombine.high %v267_v34, %v271_v35  ;;  %v131_v40 = vld [vmem:[#allocation3 + $0x180] sm:$0xff]  ;;  %v5761_v48 = vcombine.low %v267_v34, %v271_v35 }
  0x3a   :  { %790 = vmatprep.subr.bf16.mxu0 %v5570_v21  ;;  %831 = vmatprep.subr.bf16.mxu1 %v5572_v22  ;;  %v135_v41 = vld [vmem:[#allocation3 + $0x1a0] sm:$0xff] }
  0x3b   :  { %v259_v42 = vld [vmem:[#allocation3 + $0x580] sm:$0xff]  ;;  %v5626_v49 = vcombine.high %v131_v40, %v135_v41  ;;  %v5625_v55 = vcombine.low %v131_v40, %v135_v41 }
  0x3c   :  { %5573 = vmatmul.mubr.msk.bf16.vlgmr.msra.gmra.mxu0 %vm692_vm0, %v595_v27  ;;  %5574 = vmatmul.mubr.msk.bf16.vlgmr.msra.gmra.mxu1 %vm692_vm0, %v595_v27  ;;  %v263_v43 = vld [vmem:[#allocation3 + $0x5a0] sm:$0xff] }
  0x3d   :  { %791 = vmatpush1.bf16.msra.mxu0 %v5569_v28  ;;  %832 = vmatpush1.bf16.msra.mxu1 %v5571_v29  ;;  %v5754_v50 = vcombine.high %v259_v42, %v263_v43  ;;  %v123_v51 = vld [vmem:[#allocation3 + $0x140] sm:$0xff]  ;;  %v5753_v58 = vcombine.low %v259_v42, %v263_v43 }
  0x3e   :  { %792 = vmatprep.subr.bf16.mxu0 %v5562_v30  ;;  %833 = vmatprep.subr.bf16.mxu1 %v5564_v31  ;;  %v127_v52 = vld [vmem:[#allocation3 + $0x160] sm:$0xff] }
  0x3f   :  { %810 = vmatprep.mubr.bf16.mxu0 %v6370_v0  ;;  %851 = vmatprep.mubr.bf16.mxu1 %v6370_v0  ;;  %v251_v53 = vld [vmem:[#allocation3 + $0x540] sm:$0xff]  ;;  %v5618_v59 = vcombine.high %v123_v51, %v127_v52  ;;  %v5617_v1 = vcombine.low %v123_v51, %v127_v52 }
  0x40   :  { %v255_v54 = vld [vmem:[#allocation3 + $0x560] sm:$0xff] }
  0x41   :  { %793 = vmatpush1.bf16.msra.mxu0 %v5561_v36  ;;  %834 = vmatpush1.bf16.msra.mxu1 %v5563_v37  ;;  %v5746_v60 = vcombine.high %v251_v53, %v255_v54  ;;  %v115_v61 = vld [vmem:[#allocation3 + $0x100] sm:$0xff]  ;;  %v5745_v3 = vcombine.low %v251_v53, %v255_v54 }
  0x42   :  { %3478 = vmatprep.subr.bf16.mxu0 %v5634_v38  ;;  %3519 = vmatprep.subr.bf16.mxu1 %v5762_v39  ;;  %v119_v62 = vld [vmem:[#allocation3 + $0x120] sm:$0xff] }
  0x43   :  { %v243_v63 = vld [vmem:[#allocation3 + $0x500] sm:$0xff]  ;;  %v5610_v4 = vcombine.high %v115_v61, %v119_v62  ;;  %v5609_v11 = vcombine.low %v115_v61, %v119_v62 }
  0x44   :  { %5575 = vmatmul.mubr.msk.bf16.vlgmr.msra.gmra.mxu0 %vm692_vm0, %v595_v27  ;;  %5576 = vmatmul.mubr.msk.bf16.vlgmr.msra.gmra.mxu1 %vm692_vm0, %v595_v27  ;;  %v247_v0 = vld [vmem:[#allocation3 + $0x520] sm:$0xff] }
  0x45   :  { %3479 = vmatpush1.bf16.msra.mxu0 %v5633_v44  ;;  %3520 = vmatpush1.bf16.msra.mxu1 %v5761_v48  ;;  %v5738_v5 = vcombine.high %v243_v63, %v247_v0  ;;  %v107_v6 = vld [vmem:[#allocation3 + $0xc0] sm:$0xff]  ;;  %v5737_v13 = vcombine.low %v243_v63, %v247_v0 }
  0x46   :  { %3480 = vmatprep.subr.bf16.mxu0 %v5626_v49  ;;  %3521 = vmatprep.subr.bf16.mxu1 %v5754_v50  ;;  %v111_v7 = vld [vmem:[#allocation3 + $0xe0] sm:$0xff] }
  0x47   :  { %v235_v8 = vld [vmem:[#allocation3 + $0x4c0] sm:$0xff]  ;;  %v5602_v14 = vcombine.high %v107_v6, %v111_v7  ;;  %v5601_v21 = vcombine.low %v107_v6, %v111_v7 }
  0x48   :  { %v239_v9 = vld [vmem:[#allocation3 + $0x4e0] sm:$0xff] }
  0x49   :  { %3481 = vmatpush1.bf16.msra.mxu0 %v5625_v55  ;;  %3522 = vmatpush1.bf16.msra.mxu1 %v5753_v58  ;;  %v6448_v10 = vld [vmem:[%s7198_s0] sm:$0xff]  ;;  %v5730_v15 = vcombine.high %v235_v8, %v239_v9  ;;  %v5729_v23 = vcombine.low %v235_v8, %v239_v9  ;;  %s6374_s0 = smov 64  }
  0x4a   :  { %3482 = vmatprep.subr.bf16.mxu0 %v5618_v59  ;;  %3523 = vmatprep.subr.bf16.mxu1 %v5746_v60  ;;  %v6452_v12 = vrot.slane %v6448_v10, %v6443_v2  ;;  %v99_v16 = vld [vmem:[#allocation3 + $0x80] sm:$0xff] }
  0x4b   :  { %v103_v17 = vld [vmem:[#allocation3 + $0xa0] sm:$0xff] }
  0x4c   :  { %v876_v18 = vcombine.high %v6452_v12, %v6452_v12  ;;  %v227_v19 = vld [vmem:[#allocation3 + $0x480] sm:$0xff]  ;;  %v5594_v24 = vcombine.high %v99_v16, %v103_v17  ;;  %v5593_v31 = vcombine.low %v99_v16, %v103_v17 }
  0x4d   :  { %3483 = vmatpush1.bf16.msra.mxu0 %v5617_v1  ;;  %3524 = vmatpush1.bf16.msra.mxu1 %v5745_v3  ;;  %v231_v20 = vld [vmem:[#allocation3 + $0x4a0] sm:$0xff] }
  0x4e   :  { %3484 = vmatprep.subr.bf16.mxu0 %v5610_v4  ;;  %3525 = vmatprep.subr.bf16.mxu1 %v5738_v5  ;;  %v6457_v22 = vrot.slane %v876_v18, %v6443_v2  ;;  %v5722_v25 = vcombine.high %v227_v19, %v231_v20  ;;  %v91_v26 = vld [vmem:[#allocation3 + $0x40] sm:$0xff]  ;;  %v5721_v32 = vcombine.low %v227_v19, %v231_v20 }
  0x4f   :  { %v95_v27 = vld [vmem:[#allocation3 + $0x60] sm:$0xff] }
  0x50   :  { %3510 = vmatprep.mubr.bf16.mxu0 %v6457_v22  ;;  %v6462_v28 = vcombine.high %v6457_v22, %v6457_v22  ;;  %v219_v29 = vld [vmem:[#allocation3 + $0x440] sm:$0xff]  ;;  %v5586_v33 = vcombine.high %v91_v26, %v95_v27  ;;  %v5585_v39 = vcombine.low %v91_v26, %v95_v27 }
  0x51   :  { %3485 = vmatpush1.bf16.msra.mxu0 %v5609_v11  ;;  %3526 = vmatpush1.bf16.msra.mxu1 %v5737_v13  ;;  %v223_v30 = vld [vmem:[#allocation3 + $0x460] sm:$0xff] }
  0x52   :  { %3486 = vmatprep.subr.bf16.mxu0 %v5602_v14  ;;  %3527 = vmatprep.subr.bf16.mxu1 %v5730_v15  ;;  %v5714_v34 = vcombine.high %v219_v29, %v223_v30  ;;  %v83_v35 = vld [vmem:[#allocation3] sm:$0xff]  ;;  %v5713_v40 = vcombine.low %v219_v29, %v223_v30 }
  0x53   :  { %3551 = vmatprep.mubr.bf16.mxu1 %v6462_v28  ;;  %v87_v36 = vld [vmem:[#allocation3 + $0x20] sm:$0xff] }
  0x54   :  { %v211_v37 = vld [vmem:[#allocation3 + $0x400] sm:$0xff]  ;;  %v5578_v41 = vcombine.high %v83_v35, %v87_v36  ;;  %v5577_v48 = vcombine.low %v83_v35, %v87_v36 }
  0x55   :  { %3487 = vmatpush1.bf16.msra.mxu0 %v5601_v21  ;;  %3528 = vmatpush1.bf16.msra.mxu1 %v5729_v23  ;;  %v215_v38 = vld [vmem:[#allocation3 + $0x420] sm:$0xff] }
  0x56   :  { %3488 = vmatprep.subr.bf16.mxu0 %v5594_v24  ;;  %3529 = vmatprep.subr.bf16.mxu1 %v5722_v25  ;;  %v5706_v42 = vcombine.high %v211_v37, %v215_v38  ;;  %v203_v43 = vld [vmem:[#allocation3 + $0x3c0] sm:$0xff]  ;;  %v5705_v49 = vcombine.low %v211_v37, %v215_v38  ;;  %v861_v38 = vcombine.high %v6448_v10, %v6448_v10 }
  0x57   :  { %v207_v44 = vld [vmem:[#allocation3 + $0x3e0] sm:$0xff] }
  0x58   :  { %v331_v45 = vld [vmem:[#allocation3 + $0x7c0] sm:$0xff]  ;;  %v5698_v50 = vcombine.high %v203_v43, %v207_v44  ;;  %v5697_v56 = vcombine.low %v203_v43, %v207_v44 }
  0x59   :  { %3489 = vmatpush1.bf16.msra.mxu0 %v5593_v31  ;;  %3530 = vmatpush1.bf16.msra.mxu1 %v5721_v32  ;;  %v335_v46 = vld [vmem:[#allocation3 + $0x7e0] sm:$0xff] }
  0x5a   :  { %3490 = vmatprep.subr.bf16.mxu0 %v5586_v33  ;;  %3531 = vmatprep.subr.bf16.mxu1 %v5714_v34  ;;  %v5826_v51 = vcombine.high %v331_v45, %v335_v46  ;;  %v195_v52 = vld [vmem:[#allocation3 + $0x380] sm:$0xff]  ;;  %v5825_v58 = vcombine.low %v331_v45, %v335_v46 }
  0x5b   :  { %v199_v53 = vld [vmem:[#allocation3 + $0x3a0] sm:$0xff] }
  0x5c   :  { %v323_v54 = vld [vmem:[#allocation3 + $0x780] sm:$0xff]  ;;  %v5690_v59 = vcombine.high %v195_v52, %v199_v53  ;;  %v5689_v1 = vcombine.low %v195_v52, %v199_v53 }
  0x5d   :  { %3491 = vmatpush1.bf16.msra.mxu0 %v5585_v39  ;;  %3532 = vmatpush1.bf16.msra.mxu1 %v5713_v40  ;;  %v327_v55 = vld [vmem:[#allocation3 + $0x7a0] sm:$0xff] }
  0x5e   :  { %3492 = vmatprep.subr.bf16.mxu0 %v5578_v41  ;;  %3533 = vmatprep.subr.bf16.mxu1 %v5706_v42  ;;  %v5818_v60 = vcombine.high %v323_v54, %v327_v55  ;;  %v187_v61 = vld [vmem:[#allocation3 + $0x340] sm:$0xff]  ;;  %v5817_v3 = vcombine.low %v323_v54, %v327_v55 }
  0x5f   :  { %v191_v62 = vld [vmem:[#allocation3 + $0x360] sm:$0xff] }
  0x60   :  { %v315_v63 = vld [vmem:[#allocation3 + $0x740] sm:$0xff]  ;;  %v5682_v4 = vcombine.high %v187_v61, %v191_v62  ;;  %v5681_v11 = vcombine.low %v187_v61, %v191_v62 }
  0x61   :  { %3493 = vmatpush1.bf16.msra.mxu0 %v5577_v48  ;;  %3534 = vmatpush1.bf16.msra.mxu1 %v5705_v49  ;;  %v319_v0 = vld [vmem:[#allocation3 + $0x760] sm:$0xff]  ;;  %v6468_v48 = vrot.slane %v861_v38, %v6443_v2 }
  0x62   :  { %3494 = vmatprep.subr.bf16.mxu0 %v5698_v50  ;;  %3535 = vmatprep.subr.bf16.mxu1 %v5826_v51  ;;  %v5810_v5 = vcombine.high %v315_v63, %v319_v0  ;;  %v179_v6 = vld [vmem:[#allocation3 + $0x300] sm:$0xff]  ;;  %v5809_v13 = vcombine.low %v315_v63, %v319_v0 }
  0x63   :  { %v183_v7 = vld [vmem:[#allocation3 + $0x320] sm:$0xff] }
  0x64   :  { %v307_v8 = vld [vmem:[#allocation3 + $0x700] sm:$0xff]  ;;  %v5674_v14 = vcombine.high %v179_v6, %v183_v7  ;;  %v5673_v20 = vcombine.low %v179_v6, %v183_v7 }
  0x65   :  { %3495 = vmatpush2.bf16.msra.mxu0 %v5697_v56  ;;  %3536 = vmatpush2.bf16.msra.mxu1 %v5825_v58  ;;  %v311_v9 = vld [vmem:[#allocation3 + $0x720] sm:$0xff]  ;;  %v877_v56 = vcombine.high %v6468_v48, %v6468_v48 }
  0x66   :  { %3496 = vmatprep.subr.bf16.mxu0 %v5690_v59  ;;  %3537 = vmatprep.subr.bf16.mxu1 %v5818_v60  ;;  %v5802_v15 = vcombine.high %v307_v8, %v311_v9  ;;  %v171_v16 = vld [vmem:[#allocation3 + $0x2c0] sm:$0xff]  ;;  %v5801_v21 = vcombine.low %v307_v8, %v311_v9  ;;  %v6474_v59 = vrot.slane %v6452_v12, %v6443_v2 }
  0x67   :  { %v175_v17 = vld [vmem:[#allocation3 + $0x2e0] sm:$0xff] }
  0x68   :  { %v299_v18 = vld [vmem:[#allocation3 + $0x6c0] sm:$0xff]  ;;  %v5666_v23 = vcombine.high %v171_v16, %v175_v17  ;;  %v5665_v30 = vcombine.low %v171_v16, %v175_v17 }
  0x69   :  { %3497 = vmatpush2.bf16.msra.mxu0 %v5689_v1  ;;  %3538 = vmatpush2.bf16.msra.mxu1 %v5817_v3  ;;  %v303_v19 = vld [vmem:[#allocation3 + $0x6e0] sm:$0xff] }
  0x6a   :  { %3498 = vmatprep.subr.bf16.mxu0 %v5682_v4  ;;  %3539 = vmatprep.subr.bf16.mxu1 %v5810_v5  ;;  %v5794_v24 = vcombine.high %v299_v18, %v303_v19  ;;  %v163_v25 = vld [vmem:[#allocation3 + $0x280] sm:$0xff]  ;;  %v5793_v31 = vcombine.low %v299_v18, %v303_v19  ;;  %v6477_v4 = vrot.slane %v877_v56, %v6443_v2 }
  0x6b   :  { %v167_v26 = vld [vmem:[#allocation3 + $0x2a0] sm:$0xff]  ;;  %v6481_v5 = vcombine.high %v6474_v59, %v6474_v59 }
  0x6c   :  { %v291_v27 = vld [vmem:[#allocation3 + $0x680] sm:$0xff]  ;;  %v5658_v32 = vcombine.high %v163_v25, %v167_v26  ;;  %v5657_v39 = vcombine.low %v163_v25, %v167_v26 }
  0x6d   :  { %3499 = vmatpush2.bf16.msra.mxu0 %v5681_v11  ;;  %3540 = vmatpush2.bf16.msra.mxu1 %v5809_v13  ;;  %v295_v29 = vld [vmem:[#allocation3 + $0x6a0] sm:$0xff] }
  0x6e   :  { %3500 = vmatprep.subr.bf16.mxu0 %v5674_v14  ;;  %3541 = vmatprep.subr.bf16.mxu1 %v5802_v15  ;;  %v5786_v33 = vcombine.high %v291_v27, %v295_v29  ;;  %v155_v34 = vld [vmem:[#allocation3 + $0x240] sm:$0xff]  ;;  %v5785_v40 = vcombine.low %v291_v27, %v295_v29  ;;  %v6486_v15 = vcombine.high %v6477_v4, %v6477_v4 }
  0x6f   :  { %v159_v35 = vld [vmem:[#allocation3 + $0x260] sm:$0xff] }
  0x70   :  { %v283_v36 = vld [vmem:[#allocation3 + $0x640] sm:$0xff]  ;;  %v5650_v41 = vcombine.high %v155_v34, %v159_v35  ;;  %v5649_v49 = vcombine.low %v155_v34, %v159_v35 }
  0x71   :  { %3501 = vmatpush2.bf16.msra.mxu0 %v5673_v20  ;;  %3542 = vmatpush2.bf16.msra.mxu1 %v5801_v21  ;;  %v287_v37 = vld [vmem:[#allocation3 + $0x660] sm:$0xff] }
  0x72   :  { %3502 = vmatprep.subr.bf16.mxu0 %v5666_v23  ;;  %3543 = vmatprep.subr.bf16.mxu1 %v5794_v24  ;;  %v5778_v42 = vcombine.high %v283_v36, %v287_v37  ;;  %v147_v43 = vld [vmem:[#allocation3 + $0x200] sm:$0xff]  ;;  %v5777_v10 = vcombine.low %v283_v36, %v287_v37 }
  0x73   :  { %v151_v44 = vld [vmem:[#allocation3 + $0x220] sm:$0xff] }
  0x74   :  { %v275_v45 = vld [vmem:[#allocation3 + $0x600] sm:$0xff]  ;;  %v5642_v50 = vcombine.high %v147_v43, %v151_v44  ;;  %v5641_v58 = vcombine.low %v147_v43, %v151_v44 }
  0x75   :  { %3503 = vmatpush2.bf16.msra.mxu0 %v5665_v30  ;;  %3544 = vmatpush2.bf16.msra.mxu1 %v5793_v31  ;;  %v279_v46 = vld [vmem:[#allocation3 + $0x620] sm:$0xff] }
  0x76   :  { %3504 = vmatprep.subr.bf16.mxu0 %v5658_v32  ;;  %3545 = vmatprep.subr.bf16.mxu1 %v5786_v33  ;;  %v5770_v51 = vcombine.high %v275_v45, %v279_v46  ;;  %v395_v52 = vld [vmem:[#allocation3 + $0x9c0] sm:$0xff]  ;;  %v5769_v60 = vcombine.low %v275_v45, %v279_v46 }
  0x77   :  { %v399_v53 = vld [vmem:[#allocation3 + $0x9e0] sm:$0xff] }
  0x78   :  { %v523_v54 = vld [vmem:[#allocation3 + $0xdc0] sm:$0xff]  ;;  %v5890_v61 = vcombine.high %v395_v52, %v399_v53  ;;  %v5889_v12 = vcombine.low %v395_v52, %v399_v53 }
  0x79   :  { %3505 = vmatpush2.bf16.msra.mxu0 %v5657_v39  ;;  %3546 = vmatpush2.bf16.msra.mxu1 %v5785_v40  ;;  %v527_v55 = vld [vmem:[#allocation3 + $0xde0] sm:$0xff] }
  0x7a   :  { %3506 = vmatprep.subr.bf16.mxu0 %v5650_v41  ;;  %3547 = vmatprep.subr.bf16.mxu1 %v5778_v42  ;;  %v6018_v62 = vcombine.high %v523_v54, %v527_v55  ;;  %v387_v63 = vld [vmem:[#allocation3 + $0x980] sm:$0xff]  ;;  %v6017_v6 = vcombine.low %v523_v54, %v527_v55 }
  0x7b   :  { %v391_v0 = vld [vmem:[#allocation3 + $0x9a0] sm:$0xff] }
  0x7c   :  { %v515_v1 = vld [vmem:[#allocation3 + $0xd80] sm:$0xff]  ;;  %v5882_v7 = vcombine.high %v387_v63, %v391_v0  ;;  %v5881_v16 = vcombine.low %v387_v63, %v391_v0 }
  0x7d   :  { %3507 = vmatpush2.bf16.msra.mxu0 %v5649_v49  ;;  %3548 = vmatpush2.bf16.msra.mxu1 %v5777_v10  ;;  %v519_v3 = vld [vmem:[#allocation3 + $0xda0] sm:$0xff] }
  0x7e   :  { %3508 = vmatprep.subr.bf16.mxu0 %v5642_v50  ;;  %3549 = vmatprep.subr.bf16.mxu1 %v5770_v51  ;;  %v6010_v8 = vcombine.high %v515_v1, %v519_v3  ;;  %v379_v9 = vld [vmem:[#allocation3 + $0x940] sm:$0xff]  ;;  %v6009_v17 = vcombine.low %v515_v1, %v519_v3 }
  0x7f   :  { %v383_v11 = vld [vmem:[#allocation3 + $0x960] sm:$0xff] }
  0x80   :  { %v507_v13 = vld [vmem:[#allocation3 + $0xd40] sm:$0xff]  ;;  %v5874_v18 = vcombine.high %v379_v9, %v383_v11  ;;  %v5873_v25 = vcombine.low %v379_v9, %v383_v11 }
  0x81   :  { %3509 = vmatpush2.bf16.msra.mxu0 %v5641_v58  ;;  %3550 = vmatpush2.bf16.msra.mxu1 %v5769_v60  ;;  %v511_v14 = vld [vmem:[#allocation3 + $0xd60] sm:$0xff] }
  0x82   :  { %3560 = vmatprep.subr.bf16.mxu0 %v5890_v61  ;;  %3601 = vmatprep.subr.bf16.mxu1 %v6018_v62  ;;  %v6002_v19 = vcombine.high %v507_v13, %v511_v14  ;;  %v371_v20 = vld [vmem:[#allocation3 + $0x900] sm:$0xff]  ;;  %v6001_v26 = vcombine.low %v507_v13, %v511_v14 }
  0x83   :  { %v375_v21 = vld [vmem:[#allocation3 + $0x920] sm:$0xff] }
  0x84   :  { %3511 = vmatmul.mubr.bf16.vlgmr.msra.gmra.mxu0 %v6474_v59  ;;  %3552 = vmatmul.mubr.bf16.vlgmr.msra.gmra.mxu1 %v6481_v5  ;;  %v499_v23 = vld [vmem:[#allocation3 + $0xd00] sm:$0xff]  ;;  %v5866_v27 = vcombine.high %v371_v20, %v375_v21  ;;  %v5865_v34 = vcombine.low %v371_v20, %v375_v21 }
  0x85   :  { %3561 = vmatpush1.bf16.msra.mxu0 %v5889_v12  ;;  %3602 = vmatpush1.bf16.msra.mxu1 %v6017_v6  ;;  %v503_v24 = vld [vmem:[#allocation3 + $0xd20] sm:$0xff] }
  0x86   :  { %3562 = vmatprep.subr.bf16.mxu0 %v5882_v7  ;;  %3603 = vmatprep.subr.bf16.mxu1 %v6010_v8  ;;  %v5994_v29 = vcombine.high %v499_v23, %v503_v24  ;;  %v363_v30 = vld [vmem:[#allocation3 + $0x8c0] sm:$0xff]  ;;  %v5993_v35 = vcombine.low %v499_v23, %v503_v24 }
  0x87   :  { %3592 = vmatprep.mubr.bf16.mxu0 %v6477_v4  ;;  %3633 = vmatprep.mubr.bf16.mxu1 %v6486_v15  ;;  %v367_v31 = vld [vmem:[#allocation3 + $0x8e0] sm:$0xff] }
  0x88   :  { %v491_v32 = vld [vmem:[#allocation3 + $0xcc0] sm:$0xff]  ;;  %v5858_v36 = vcombine.high %v363_v30, %v367_v31  ;;  %v5857_v42 = vcombine.low %v363_v30, %v367_v31 }
  0x89   :  { %3563 = vmatpush1.bf16.msra.mxu0 %v5881_v16  ;;  %3604 = vmatpush1.bf16.msra.mxu1 %v6009_v17  ;;  %v495_v33 = vld [vmem:[#allocation3 + $0xce0] sm:$0xff] }
  0x8a   :  { %3564 = vmatprep.subr.bf16.mxu0 %v5874_v18  ;;  %3605 = vmatprep.subr.bf16.mxu1 %v6002_v19  ;;  %v5986_v37 = vcombine.high %v491_v32, %v495_v33  ;;  %v355_v38 = vld [vmem:[#allocation3 + $0x880] sm:$0xff]  ;;  %v5985_v43 = vcombine.low %v491_v32, %v495_v33 }
  0x8b   :  { %v359_v39 = vld [vmem:[#allocation3 + $0x8a0] sm:$0xff] }
  0x8c   :  { %v483_v40 = vld [vmem:[#allocation3 + $0xc80] sm:$0xff]  ;;  %v5850_v44 = vcombine.high %v355_v38, %v359_v39  ;;  %v5849_v51 = vcombine.low %v355_v38, %v359_v39 }
  0x8d   :  { %3565 = vmatpush1.bf16.msra.mxu0 %v5873_v25  ;;  %3606 = vmatpush1.bf16.msra.mxu1 %v6001_v26  ;;  %v487_v41 = vld [vmem:[#allocation3 + $0xca0] sm:$0xff] }
  0x8e   :  { %3566 = vmatprep.subr.bf16.mxu0 %v5866_v27  ;;  %3607 = vmatprep.subr.bf16.mxu1 %v5994_v29  ;;  %v5978_v45 = vcombine.high %v483_v40, %v487_v41  ;;  %v347_v46 = vld [vmem:[#allocation3 + $0x840] sm:$0xff]  ;;  %v5977_v52 = vcombine.low %v483_v40, %v487_v41 }
  0x8f   :  { %v351_v49 = vld [vmem:[#allocation3 + $0x860] sm:$0xff] }
  0x90   :  { %v475_v10 = vld [vmem:[#allocation3 + $0xc40] sm:$0xff]  ;;  %v5842_v53 = vcombine.high %v347_v46, %v351_v49  ;;  %v5841_v61 = vcombine.low %v347_v46, %v351_v49 }
  0x91   :  { %3567 = vmatpush1.bf16.msra.mxu0 %v5865_v34  ;;  %3608 = vmatpush1.bf16.msra.mxu1 %v5993_v35  ;;  %v479_v50 = vld [vmem:[#allocation3 + $0xc60] sm:$0xff] }
  0x92   :  { %3568 = vmatprep.subr.bf16.mxu0 %v5858_v36  ;;  %3609 = vmatprep.subr.bf16.mxu1 %v5986_v37  ;;  %v5970_v54 = vcombine.high %v475_v10, %v479_v50  ;;  %v339_v55 = vld [vmem:[#allocation3 + $0x800] sm:$0xff]  ;;  %v5969_v62 = vcombine.low %v475_v10, %v479_v50 }
  0x93   :  { %v343_v56 = vld [vmem:[#allocation3 + $0x820] sm:$0xff] }
  0x94   :  { %v467_v58 = vld [vmem:[#allocation3 + $0xc00] sm:$0xff]  ;;  %v5834_v63 = vcombine.high %v339_v55, %v343_v56  ;;  %v5833_v7 = vcombine.low %v339_v55, %v343_v56 }
  0x95   :  { %3569 = vmatpush1.bf16.msra.mxu0 %v5857_v42  ;;  %3610 = vmatpush1.bf16.msra.mxu1 %v5985_v43  ;;  %v471_v60 = vld [vmem:[#allocation3 + $0xc20] sm:$0xff] }
  0x96   :  { %3570 = vmatprep.subr.bf16.mxu0 %v5850_v44  ;;  %3611 = vmatprep.subr.bf16.mxu1 %v5978_v45  ;;  %v5962_v0 = vcombine.high %v467_v58, %v471_v60  ;;  %v459_v1 = vld [vmem:[#allocation3 + $0xbc0] sm:$0xff]  ;;  %v5961_v8 = vcombine.low %v467_v58, %v471_v60 }
  0x97   :  { %v463_v3 = vld [vmem:[#allocation3 + $0xbe0] sm:$0xff] }
  0x98   :  { %v587_v12 = vld [vmem:[#allocation3 + $0xfc0] sm:$0xff]  ;;  %v5954_v9 = vcombine.high %v459_v1, %v463_v3  ;;  %v5953_v18 = vcombine.low %v459_v1, %v463_v3 }
  0x99   :  { %3571 = vmatpush1.bf16.msra.mxu0 %v5849_v51  ;;  %3612 = vmatpush1.bf16.msra.mxu1 %v5977_v52  ;;  %v591_v6 = vld [vmem:[#allocation3 + $0xfe0] sm:$0xff] }
  0x9a   :  { %3572 = vmatprep.subr.bf16.mxu0 %v5842_v53  ;;  %3613 = vmatprep.subr.bf16.mxu1 %v5970_v54  ;;  %v6082_v11 = vcombine.high %v587_v12, %v591_v6  ;;  %v451_v13 = vld [vmem:[#allocation3 + $0xb80] sm:$0xff]  ;;  %v6081_v19 = vcombine.low %v587_v12, %v591_v6 }
  0x9b   :  { %v455_v14 = vld [vmem:[#allocation3 + $0xba0] sm:$0xff] }
  0x9c   :  { %v579_v16 = vld [vmem:[#allocation3 + $0xf80] sm:$0xff]  ;;  %v5946_v20 = vcombine.high %v451_v13, %v455_v14  ;;  %v5945_v27 = vcombine.low %v451_v13, %v455_v14 }
  0x9d   :  { %3573 = vmatpush1.bf16.msra.mxu0 %v5841_v61  ;;  %3614 = vmatpush1.bf16.msra.mxu1 %v5969_v62  ;;  %v583_v17 = vld [vmem:[#allocation3 + $0xfa0] sm:$0xff] }
  0x9e   :  { %3574 = vmatprep.subr.bf16.mxu0 %v5834_v63  ;;  %3615 = vmatprep.subr.bf16.mxu1 %v5962_v0  ;;  %v6074_v21 = vcombine.high %v579_v16, %v583_v17  ;;  %v443_v23 = vld [vmem:[#allocation3 + $0xb40] sm:$0xff]  ;;  %v6073_v29 = vcombine.low %v579_v16, %v583_v17  ;;  %v140_v16 = vld [vmem:[#allocation3 + $0x1c8] sm:$0xff] }
  0x9f   :  { %v447_v24 = vld [vmem:[#allocation3 + $0xb60] sm:$0xff]  ;;  %v144_v17 = vld [vmem:[#allocation3 + $0x1e8] sm:$0xff] }
  0xa0   :  { %v571_v25 = vld [vmem:[#allocation3 + $0xf40] sm:$0xff]  ;;  %v5938_v30 = vcombine.high %v443_v23, %v447_v24  ;;  %v5937_v36 = vcombine.low %v443_v23, %v447_v24  ;;  %v5636_v24 = vcombine.high %v140_v16, %v144_v17 }
  0xa1   :  { %3575 = vmatpush1.bf16.msra.mxu0 %v5833_v7  ;;  %3616 = vmatpush1.bf16.msra.mxu1 %v5961_v8  ;;  %v575_v26 = vld [vmem:[#allocation3 + $0xf60] sm:$0xff] }
  0xa2   :  { %3576 = vmatprep.subr.bf16.mxu0 %v5954_v9  ;;  %3617 = vmatprep.subr.bf16.mxu1 %v6082_v11  ;;  %v6066_v31 = vcombine.high %v571_v25, %v575_v26  ;;  %v435_v32 = vld [vmem:[#allocation3 + $0xb00] sm:$0xff]  ;;  %v6065_v37 = vcombine.low %v571_v25, %v575_v26  ;;  %v132_v26 = vld [vmem:[#allocation3 + $0x188] sm:$0xff] }
  0xa3   :  { %v439_v33 = vld [vmem:[#allocation3 + $0xb20] sm:$0xff] }
  0xa4   :  { %v563_v34 = vld [vmem:[#allocation3 + $0xf00] sm:$0xff]  ;;  %v5930_v38 = vcombine.high %v435_v32, %v439_v33  ;;  %v5929_v44 = vcombine.low %v435_v32, %v439_v33  ;;  %v5635_v32 = vcombine.low %v140_v16, %v144_v17 }
  0xa5   :  { %3577 = vmatpush2.bf16.msra.mxu0 %v5953_v18  ;;  %3618 = vmatpush2.bf16.msra.mxu1 %v6081_v19  ;;  %v567_v35 = vld [vmem:[#allocation3 + $0xf20] sm:$0xff]  ;;  %v268_v18 = vld [vmem:[#allocation3 + $0x5c8] sm:$0xff] }
  0xa6   :  { %3578 = vmatprep.subr.bf16.mxu0 %v5946_v20  ;;  %3619 = vmatprep.subr.bf16.mxu1 %v6074_v21  ;;  %v6058_v39 = vcombine.high %v563_v34, %v567_v35  ;;  %v427_v40 = vld [vmem:[#allocation3 + $0xac0] sm:$0xff]  ;;  %v6057_v45 = vcombine.low %v563_v34, %v567_v35  ;;  %v272_v19 = vld [vmem:[#allocation3 + $0x5e8] sm:$0xff]  ;;  %v6493_v21 = vrot.slane %v6468_v48, %v6443_v2 }
  0xa7   :  { %v431_v41 = vld [vmem:[#allocation3 + $0xae0] sm:$0xff]  ;;  %v5764_v25 = vcombine.high %v268_v18, %v272_v19  ;;  %v5763_v48 = vcombine.low %v268_v18, %v272_v19  ;;  %v124_v35 = vld [vmem:[#allocation3 + $0x148] sm:$0xff] }
  0xa8   :  { %v555_v42 = vld [vmem:[#allocation3 + $0xec0] sm:$0xff]  ;;  %v5922_v46 = vcombine.high %v427_v40, %v431_v41  ;;  %v5921_v53 = vcombine.low %v427_v40, %v431_v41  ;;  %v84_v19 = vld [vmem:[#allocation3 + $0x8] sm:$0xff] }
  0xa9   :  { %3579 = vmatpush2.bf16.msra.mxu0 %v5945_v27  ;;  %3620 = vmatpush2.bf16.msra.mxu1 %v6073_v29  ;;  %v559_v43 = vld [vmem:[#allocation3 + $0xee0] sm:$0xff]  ;;  %v136_v27 = vld [vmem:[#allocation3 + $0x1a8] sm:$0xff] }
  0xaa   :  { %3580 = vmatprep.subr.bf16.mxu0 %v5938_v30  ;;  %3621 = vmatprep.subr.bf16.mxu1 %v6066_v31  ;;  %v6050_v49 = vcombine.high %v555_v42, %v559_v43  ;;  %v419_v10 = vld [vmem:[#allocation3 + $0xa80] sm:$0xff]  ;;  %v6049_v54 = vcombine.low %v555_v42, %v559_v43  ;;  %v260_v29 = vld [vmem:[#allocation3 + $0x588] sm:$0xff]  ;;  %v6497_v31 = vcombine.high %v6493_v21, %v6493_v21 }
  0xab   :  { %v423_v50 = vld [vmem:[#allocation3 + $0xaa0] sm:$0xff]  ;;  %v264_v30 = vld [vmem:[#allocation3 + $0x5a8] sm:$0xff]  ;;  %v5628_v33 = vcombine.high %v132_v26, %v136_v27 }
  0xac   :  { %v547_v51 = vld [vmem:[#allocation3 + $0xe80] sm:$0xff]  ;;  %v5914_v55 = vcombine.high %v419_v10, %v423_v50  ;;  %v5913_v63 = vcombine.low %v419_v10, %v423_v50  ;;  %v5756_v34 = vcombine.high %v260_v29, %v264_v30  ;;  %v5755_v40 = vcombine.low %v260_v29, %v264_v30  ;;  %v116_v43 = vld [vmem:[#allocation3 + $0x108] sm:$0xff] }
  0xad   :  { %3581 = vmatpush2.bf16.msra.mxu0 %v5937_v36  ;;  %3622 = vmatpush2.bf16.msra.mxu1 %v6065_v37  ;;  %v551_v52 = vld [vmem:[#allocation3 + $0xea0] sm:$0xff]  ;;  %v128_v36 = vld [vmem:[#allocation3 + $0x168] sm:$0xff] }
  0xae   :  { %3582 = vmatprep.subr.bf16.mxu0 %v5930_v38  ;;  %3623 = vmatprep.subr.bf16.mxu1 %v6058_v39  ;;  %v6042_v56 = vcombine.high %v547_v51, %v551_v52  ;;  %v411_v58 = vld [vmem:[#allocation3 + $0xa40] sm:$0xff]  ;;  %v6041_v0 = vcombine.low %v547_v51, %v551_v52  ;;  %v252_v37 = vld [vmem:[#allocation3 + $0x548] sm:$0xff]  ;;  %v5627_v39 = vcombine.low %v132_v26, %v136_v27 }
  0xaf   :  { %v415_v60 = vld [vmem:[#allocation3 + $0xa60] sm:$0xff]  ;;  %v256_v38 = vld [vmem:[#allocation3 + $0x568] sm:$0xff]  ;;  %v5620_v41 = vcombine.high %v124_v35, %v128_v36 }
  0xb0   :  { %v539_v61 = vld [vmem:[#allocation3 + $0xe40] sm:$0xff]  ;;  %v5906_v1 = vcombine.high %v411_v58, %v415_v60  ;;  %v5905_v9 = vcombine.low %v411_v58, %v415_v60  ;;  %v5748_v42 = vcombine.high %v252_v37, %v256_v38  ;;  %v5747_v10 = vcombine.low %v252_v37, %v256_v38  ;;  %v108_v52 = vld [vmem:[#allocation3 + $0xc8] sm:$0xff] }
  0xb1   :  { %3583 = vmatpush2.bf16.msra.mxu0 %v5929_v44  ;;  %3624 = vmatpush2.bf16.msra.mxu1 %v6057_v45  ;;  %v543_v62 = vld [vmem:[#allocation3 + $0xe60] sm:$0xff]  ;;  %v120_v44 = vld [vmem:[#allocation3 + $0x128] sm:$0xff] }
  0xb2   :  { %3584 = vmatprep.subr.bf16.mxu0 %v5922_v46  ;;  %3625 = vmatprep.subr.bf16.mxu1 %v6050_v49  ;;  %v6034_v3 = vcombine.high %v539_v61, %v543_v62  ;;  %v403_v12 = vld [vmem:[#allocation3 + $0xa00] sm:$0xff]  ;;  %v6033_v11 = vcombine.low %v539_v61, %v543_v62  ;;  %v244_v45 = vld [vmem:[#allocation3 + $0x508] sm:$0xff]  ;;  %v5619_v49 = vcombine.low %v124_v35, %v128_v36 }
  0xb3   :  { %v407_v6 = vld [vmem:[#allocation3 + $0xa20] sm:$0xff]  ;;  %v248_v46 = vld [vmem:[#allocation3 + $0x528] sm:$0xff]  ;;  %v5612_v50 = vcombine.high %v116_v43, %v120_v44 }
  0xb4   :  { %v531_v7 = vld [vmem:[#allocation3 + $0xe00] sm:$0xff]  ;;  %v5898_v13 = vcombine.high %v403_v12, %v407_v6  ;;  %v5897_v20 = vcombine.low %v403_v12, %v407_v6  ;;  %v5740_v51 = vcombine.high %v244_v45, %v248_v46  ;;  %v5739_v58 = vcombine.low %v244_v45, %v248_v46  ;;  %v100_v62 = vld [vmem:[#allocation3 + $0x88] sm:$0xff] }
  0xb5   :  { %3585 = vmatpush2.bf16.msra.mxu0 %v5921_v53  ;;  %3626 = vmatpush2.bf16.msra.mxu1 %v6049_v54  ;;  %v535_v8 = vld [vmem:[#allocation3 + $0xe20] sm:$0xff]  ;;  %v112_v53 = vld [vmem:[#allocation3 + $0xe8] sm:$0xff] }
  0xb6   :  { %3586 = vmatprep.subr.bf16.mxu0 %v5914_v55  ;;  %3627 = vmatprep.subr.bf16.mxu1 %v6042_v56  ;;  %v6026_v14 = vcombine.high %v531_v7, %v535_v8  ;;  %v6025_v23 = vcombine.low %v531_v7, %v535_v8  ;;  %v236_v54 = vld [vmem:[#allocation3 + $0x4c8] sm:$0xff]  ;;  %v5611_v56 = vcombine.low %v116_v43, %v120_v44 }
  0xb7   :  { %v240_v55 = vld [vmem:[#allocation3 + $0x4e8] sm:$0xff]  ;;  %v5604_v60 = vcombine.high %v108_v52, %v112_v53 }
  0xb8   :  { %v5732_v61 = vcombine.high %v236_v54, %v240_v55  ;;  %v5731_v12 = vcombine.low %v236_v54, %v240_v55  ;;  %v92_v8 = vld [vmem:[#allocation3 + $0x48] sm:$0xff] }
  0xb9   :  { %3587 = vmatpush2.bf16.msra.mxu0 %v5913_v63  ;;  %3628 = vmatpush2.bf16.msra.mxu1 %v6041_v0  ;;  %v104_v63 = vld [vmem:[#allocation3 + $0xa8] sm:$0xff] }
  0xba   :  { %3588 = vmatprep.subr.bf16.mxu0 %v5906_v1  ;;  %3629 = vmatprep.subr.bf16.mxu1 %v6034_v3  ;;  %v228_v0 = vld [vmem:[#allocation3 + $0x488] sm:$0xff]  ;;  %v5603_v3 = vcombine.low %v108_v52, %v112_v53  ;;  %v5596_v6 = vcombine.high %v100_v62, %v104_v63 }
  0xbb   :  { %v232_v1 = vld [vmem:[#allocation3 + $0x4a8] sm:$0xff] }
  0xbc   :  { %v5724_v7 = vcombine.high %v228_v0, %v232_v1  ;;  %v5723_v16 = vcombine.low %v228_v0, %v232_v1  ;;  %v204_v30 = vld [vmem:[#allocation3 + $0x3c8] sm:$0xff] }
  0xbd   :  { %3589 = vmatpush2.bf16.msra.mxu0 %v5905_v9  ;;  %3630 = vmatpush2.bf16.msra.mxu1 %v6033_v11  ;;  %v96_v9 = vld [vmem:[#allocation3 + $0x68] sm:$0xff] }
  0xbe   :  { %3590 = vmatprep.subr.bf16.mxu0 %v5898_v13  ;;  %3631 = vmatprep.subr.bf16.mxu1 %v6026_v14  ;;  %v220_v11 = vld [vmem:[#allocation3 + $0x448] sm:$0xff]  ;;  %v5595_v14 = vcombine.low %v100_v62, %v104_v63  ;;  %v5588_v17 = vcombine.high %v92_v8, %v96_v9 }
  0xbf   :  { %v224_v13 = vld [vmem:[#allocation3 + $0x468] sm:$0xff] }
  0xc0   :  { %v5716_v18 = vcombine.high %v220_v11, %v224_v13  ;;  %v5715_v26 = vcombine.low %v220_v11, %v224_v13  ;;  %v196_v38 = vld [vmem:[#allocation3 + $0x388] sm:$0xff] }
  0xc1   :  { %3591 = vmatpush2.bf16.msra.mxu0 %v5897_v20  ;;  %3632 = vmatpush2.bf16.msra.mxu1 %v6025_v23  ;;  %v88_v20 = vld [vmem:[#allocation3 + $0x28] sm:$0xff] }
  0xc2   :  { %3642 = vmatprep.subr.bf16.mxu0 %v5636_v24  ;;  %3683 = vmatprep.subr.bf16.mxu1 %v5764_v25  ;;  %v212_v23 = vld [vmem:[#allocation3 + $0x408] sm:$0xff]  ;;  %v5587_v25 = vcombine.low %v92_v8, %v96_v9  ;;  %v5580_v27 = vcombine.high %v84_v19, %v88_v20 }
  0xc3   :  { %v216_v24 = vld [vmem:[#allocation3 + $0x428] sm:$0xff] }
  0xc4   :  { %3593 = vmatmul.mubr.bf16.vlgmr.msra.gmra.mxu0 %v6493_v21  ;;  %3634 = vmatmul.mubr.bf16.vlgmr.msra.gmra.mxu1 %v6497_v31  ;;  %v5708_v29 = vcombine.high %v212_v23, %v216_v24  ;;  %v5707_v35 = vcombine.low %v212_v23, %v216_v24  ;;  %v188_v46 = vld [vmem:[#allocation3 + $0x348] sm:$0xff] }
  0xc5   :  { %3643 = vmatpush1.bf16.msra.mxu0 %v5635_v32  ;;  %3684 = vmatpush1.bf16.msra.mxu1 %v5763_v48  ;;  %v208_v32 = vld [vmem:[#allocation3 + $0x3e8] sm:$0xff] }
  0xc6   :  { %3644 = vmatprep.subr.bf16.mxu0 %v5628_v33  ;;  %3685 = vmatprep.subr.bf16.mxu1 %v5756_v34  ;;  %v332_v48 = vld [vmem:[#allocation3 + $0x7c8] sm:$0xff]  ;;  %v5579_v34 = vcombine.low %v84_v19, %v88_v20  ;;  %v5700_v36 = vcombine.high %v204_v30, %v208_v32 }
  0xc7   :  { %3674 = vmatprep.mubr.bf16.mxu0 %v6457_v22  ;;  %3715 = vmatprep.mubr.bf16.mxu1 %v6462_v28  ;;  %v336_v33 = vld [vmem:[#allocation3 + $0x7e8] sm:$0xff] }
  0xc8   :  { %v5828_v37 = vcombine.high %v332_v48, %v336_v33  ;;  %v5827_v43 = vcombine.low %v332_v48, %v336_v33  ;;  %v180_v55 = vld [vmem:[#allocation3 + $0x308] sm:$0xff] }
  0xc9   :  { %3645 = vmatpush1.bf16.msra.mxu0 %v5627_v39  ;;  %3686 = vmatpush1.bf16.msra.mxu1 %v5755_v40  ;;  %v200_v39 = vld [vmem:[#allocation3 + $0x3a8] sm:$0xff] }
  0xca   :  { %3646 = vmatprep.subr.bf16.mxu0 %v5620_v41  ;;  %3687 = vmatprep.subr.bf16.mxu1 %v5748_v42  ;;  %v324_v40 = vld [vmem:[#allocation3 + $0x788] sm:$0xff]  ;;  %v5699_v42 = vcombine.low %v204_v30, %v208_v32  ;;  %v5692_v44 = vcombine.high %v196_v38, %v200_v39 }
  0xcb   :  { %v328_v41 = vld [vmem:[#allocation3 + $0x7a8] sm:$0xff] }
  0xcc   :  { %v5820_v45 = vcombine.high %v324_v40, %v328_v41  ;;  %v5819_v52 = vcombine.low %v324_v40, %v328_v41  ;;  %v172_v1 = vld [vmem:[#allocation3 + $0x2c8] sm:$0xff] }
  0xcd   :  { %3647 = vmatpush1.bf16.msra.mxu0 %v5619_v49  ;;  %3688 = vmatpush1.bf16.msra.mxu1 %v5747_v10  ;;  %v192_v49 = vld [vmem:[#allocation3 + $0x368] sm:$0xff] }
  0xce   :  { %3648 = vmatprep.subr.bf16.mxu0 %v5612_v50  ;;  %3689 = vmatprep.subr.bf16.mxu1 %v5740_v51  ;;  %v316_v10 = vld [vmem:[#allocation3 + $0x748] sm:$0xff]  ;;  %v5691_v51 = vcombine.low %v196_v38, %v200_v39  ;;  %v5684_v53 = vcombine.high %v188_v46, %v192_v49 }
  0xcf   :  { %v320_v50 = vld [vmem:[#allocation3 + $0x768] sm:$0xff] }
  0xd0   :  { %v5812_v54 = vcombine.high %v316_v10, %v320_v50  ;;  %v5811_v62 = vcombine.low %v316_v10, %v320_v50  ;;  %v164_v13 = vld [vmem:[#allocation3 + $0x288] sm:$0xff] }
  0xd1   :  { %3649 = vmatpush1.bf16.msra.mxu0 %v5611_v56  ;;  %3690 = vmatpush1.bf16.msra.mxu1 %v5739_v58  ;;  %v184_v56 = vld [vmem:[#allocation3 + $0x328] sm:$0xff] }
  0xd2   :  { %3650 = vmatprep.subr.bf16.mxu0 %v5604_v60  ;;  %3691 = vmatprep.subr.bf16.mxu1 %v5732_v61  ;;  %v308_v58 = vld [vmem:[#allocation3 + $0x708] sm:$0xff]  ;;  %v5683_v61 = vcombine.low %v188_v46, %v192_v49  ;;  %v5676_v63 = vcombine.high %v180_v55, %v184_v56 }
  0xd3   :  { %v312_v60 = vld [vmem:[#allocation3 + $0x728] sm:$0xff] }
  0xd4   :  { %v5804_v0 = vcombine.high %v308_v58, %v312_v60  ;;  %v5803_v8 = vcombine.low %v308_v58, %v312_v60  ;;  %v156_v24 = vld [vmem:[#allocation3 + $0x248] sm:$0xff] }
  0xd5   :  { %3651 = vmatpush1.bf16.msra.mxu0 %v5603_v3  ;;  %3692 = vmatpush1.bf16.msra.mxu1 %v5731_v12  ;;  %v176_v3 = vld [vmem:[#allocation3 + $0x2e8] sm:$0xff] }
  0xd6   :  { %3652 = vmatprep.subr.bf16.mxu0 %v5596_v6  ;;  %3693 = vmatprep.subr.bf16.mxu1 %v5724_v7  ;;  %v300_v12 = vld [vmem:[#allocation3 + $0x6c8] sm:$0xff]  ;;  %v5675_v7 = vcombine.low %v180_v55, %v184_v56  ;;  %v5668_v9 = vcombine.high %v172_v1, %v176_v3 }
  0xd7   :  { %v304_v6 = vld [vmem:[#allocation3 + $0x6e8] sm:$0xff] }
  0xd8   :  { %v5796_v11 = vcombine.high %v300_v12, %v304_v6  ;;  %v5795_v19 = vcombine.low %v300_v12, %v304_v6  ;;  %v148_v33 = vld [vmem:[#allocation3 + $0x208] sm:$0xff] }
  0xd9   :  { %3653 = vmatpush1.bf16.msra.mxu0 %v5595_v14  ;;  %3694 = vmatpush1.bf16.msra.mxu1 %v5723_v16  ;;  %v168_v14 = vld [vmem:[#allocation3 + $0x2a8] sm:$0xff] }
  0xda   :  { %3654 = vmatprep.subr.bf16.mxu0 %v5588_v17  ;;  %3695 = vmatprep.subr.bf16.mxu1 %v5716_v18  ;;  %v292_v16 = vld [vmem:[#allocation3 + $0x688] sm:$0xff]  ;;  %v5667_v18 = vcombine.low %v172_v1, %v176_v3  ;;  %v5660_v20 = vcombine.high %v164_v13, %v168_v14 }
  0xdb   :  { %v296_v17 = vld [vmem:[#allocation3 + $0x6a8] sm:$0xff] }
  0xdc   :  { %v5788_v23 = vcombine.high %v292_v16, %v296_v17  ;;  %v5787_v30 = vcombine.low %v292_v16, %v296_v17  ;;  %v396_v41 = vld [vmem:[#allocation3 + $0x9c8] sm:$0xff] }
  0xdd   :  { %3655 = vmatpush1.bf16.msra.mxu0 %v5587_v25  ;;  %3696 = vmatpush1.bf16.msra.mxu1 %v5715_v26  ;;  %v160_v25 = vld [vmem:[#allocation3 + $0x268] sm:$0xff] }
  0xde   :  { %3656 = vmatprep.subr.bf16.mxu0 %v5580_v27  ;;  %3697 = vmatprep.subr.bf16.mxu1 %v5708_v29  ;;  %v284_v26 = vld [vmem:[#allocation3 + $0x648] sm:$0xff]  ;;  %v5659_v29 = vcombine.low %v164_v13, %v168_v14  ;;  %v5652_v32 = vcombine.high %v156_v24, %v160_v25 }
  0xdf   :  { %v288_v27 = vld [vmem:[#allocation3 + $0x668] sm:$0xff] }
  0xe0   :  { %v5780_v48 = vcombine.high %v284_v26, %v288_v27  ;;  %v5779_v38 = vcombine.low %v284_v26, %v288_v27  ;;  %v392_v55 = vld [vmem:[#allocation3 + $0x9a8] sm:$0xff] }
  0xe1   :  { %3657 = vmatpush1.bf16.msra.mxu0 %v5579_v34  ;;  %3698 = vmatpush1.bf16.msra.mxu1 %v5707_v35  ;;  %v152_v34 = vld [vmem:[#allocation3 + $0x228] sm:$0xff] }
  0xe2   :  { %3658 = vmatprep.subr.bf16.mxu0 %v5700_v36  ;;  %3699 = vmatprep.subr.bf16.mxu1 %v5828_v37  ;;  %v276_v35 = vld [vmem:[#allocation3 + $0x608] sm:$0xff]  ;;  %v5651_v37 = vcombine.low %v156_v24, %v160_v25  ;;  %v5644_v39 = vcombine.high %v148_v33, %v152_v34  ;;  %v5643_v49 = vcombine.low %v148_v33, %v152_v34 }
  0xe3   :  { %v280_v36 = vld [vmem:[#allocation3 + $0x628] sm:$0xff] }
  0xe4   :  { %v5772_v40 = vcombine.high %v276_v35, %v280_v36  ;;  %v5771_v50 = vcombine.low %v276_v35, %v280_v36  ;;  %v516_v58 = vld [vmem:[#allocation3 + $0xd88] sm:$0xff] }
  0xe5   :  { %3659 = vmatpush2.bf16.msra.mxu0 %v5699_v42  ;;  %3700 = vmatpush2.bf16.msra.mxu1 %v5827_v43  ;;  %v400_v42 = vld [vmem:[#allocation3 + $0x9e8] sm:$0xff] }
  0xe6   :  { %3660 = vmatprep.subr.bf16.mxu0 %v5692_v44  ;;  %3701 = vmatprep.subr.bf16.mxu1 %v5820_v45  ;;  %v524_v44 = vld [vmem:[#allocation3 + $0xdc8] sm:$0xff] }
  0xe7   :  { %v528_v45 = vld [vmem:[#allocation3 + $0xde8] sm:$0xff] }
  0xe8   :  { %v520_v60 = vld [vmem:[#allocation3 + $0xda8] sm:$0xff] }
  0xe9   :  { %3661 = vmatpush2.bf16.msra.mxu0 %v5691_v51  ;;  %3702 = vmatpush2.bf16.msra.mxu1 %v5819_v52  ;;  %v5892_v51 = vcombine.high %v396_v41, %v400_v42  ;;  %v6012_v12 = vcombine.high %v516_v58, %v520_v60  ;;  %v380_v6 = vld [vmem:[#allocation3 + $0x948] sm:$0xff]  ;;  %v6011_v17 = vcombine.low %v516_v58, %v520_v60 }
  0xea   :  { %3662 = vmatprep.subr.bf16.mxu0 %v5684_v53  ;;  %3703 = vmatprep.subr.bf16.mxu1 %v5812_v54  ;;  %v6020_v53 = vcombine.high %v524_v44, %v528_v45  ;;  %v388_v54 = vld [vmem:[#allocation3 + $0x988] sm:$0xff] }
  0xeb   :  { %v5884_v1 = vcombine.high %v388_v54, %v392_v55  ;;  %v5883_v14 = vcombine.low %v388_v54, %v392_v55  ;;  %v376_v24 = vld [vmem:[#allocation3 + $0x928] sm:$0xff] }
  0xec   :  { %v500_v26 = vld [vmem:[#allocation3 + $0xd08] sm:$0xff] }
  0xed   :  { %3663 = vmatpush2.bf16.msra.mxu0 %v5683_v61  ;;  %3704 = vmatpush2.bf16.msra.mxu1 %v5811_v62  ;;  %v5891_v62 = vcombine.low %v396_v41, %v400_v42  ;;  %v504_v27 = vld [vmem:[#allocation3 + $0xd28] sm:$0xff] }
  0xee   :  { %3664 = vmatprep.subr.bf16.mxu0 %v5676_v63  ;;  %3705 = vmatprep.subr.bf16.mxu1 %v5804_v0  ;;  %v6019_v0 = vcombine.low %v524_v44, %v528_v45  ;;  %v5996_v35 = vcombine.high %v500_v26, %v504_v27  ;;  %v364_v36 = vld [vmem:[#allocation3 + $0x8c8] sm:$0xff]  ;;  %v5995_v41 = vcombine.low %v500_v26, %v504_v27 }
  0xef   :  { %v356_v45 = vld [vmem:[#allocation3 + $0x888] sm:$0xff] }
  0xf0   :  { %v348_v58 = vld [vmem:[#allocation3 + $0x848] sm:$0xff] }
  0xf1   :  { %3665 = vmatpush2.bf16.msra.mxu0 %v5675_v7  ;;  %3706 = vmatpush2.bf16.msra.mxu1 %v5803_v8  ;;  %v384_v7 = vld [vmem:[#allocation3 + $0x968] sm:$0xff] }
  0xf2   :  { %3666 = vmatprep.subr.bf16.mxu0 %v5668_v9  ;;  %3707 = vmatprep.subr.bf16.mxu1 %v5796_v11  ;;  %v508_v9 = vld [vmem:[#allocation3 + $0xd48] sm:$0xff] }
  0xf3   :  { %v512_v11 = vld [vmem:[#allocation3 + $0xd68] sm:$0xff] }
  0xf4   :  { %v352_v60 = vld [vmem:[#allocation3 + $0x868] sm:$0xff] }
  0xf5   :  { %3667 = vmatpush2.bf16.msra.mxu0 %v5667_v18  ;;  %3708 = vmatpush2.bf16.msra.mxu1 %v5795_v19  ;;  %v5876_v18 = vcombine.high %v380_v6, %v384_v7 }
  0xf6   :  { %3668 = vmatprep.subr.bf16.mxu0 %v5660_v20  ;;  %3709 = vmatprep.subr.bf16.mxu1 %v5788_v23  ;;  %v6004_v20 = vcombine.high %v508_v9, %v512_v11  ;;  %v372_v23 = vld [vmem:[#allocation3 + $0x908] sm:$0xff] }
  0xf7   :  { %v5868_v33 = vcombine.high %v372_v23, %v376_v24 }
  0xf9   :  { %3669 = vmatpush2.bf16.msra.mxu0 %v5659_v29  ;;  %3710 = vmatpush2.bf16.msra.mxu1 %v5787_v30  ;;  %v5875_v30 = vcombine.low %v380_v6, %v384_v7  ;;  %v344_v6 = vld [vmem:[#allocation3 + $0x828] sm:$0xff] }
  0xfa   :  { %3670 = vmatprep.subr.bf16.mxu0 %v5652_v32  ;;  %3711 = vmatprep.subr.bf16.mxu1 %v5780_v48  ;;  %v6003_v48 = vcombine.low %v508_v9, %v512_v11  ;;  %v468_v7 = vld [vmem:[#allocation3 + $0xc08] sm:$0xff]  ;;  %v5843_v11 = vcombine.low %v348_v58, %v352_v60 }
  0xfb   :  { %v472_v9 = vld [vmem:[#allocation3 + $0xc28] sm:$0xff] }
  0xfc   :  { %v6503_v43 = vpop.f32.mrf.mxu0  ;;  %v6505_v46 = vpop.f32.mrf.mxu1  ;;  %v5963_v27 = vcombine.low %v468_v7, %v472_v9 }
  0xfd   :  { %3671 = vmatpush2.bf16.msra.mxu0 %v5651_v37  ;;  %3712 = vmatpush2.bf16.msra.mxu1 %v5779_v38  ;;  %v368_v37 = vld [vmem:[#allocation3 + $0x8e8] sm:$0xff] }
  0xfe   :  { %v6507_v10 = vpop.f32.mrf.mxu0  ;;  %3672 = vmatprep.subr.bf16.mxu0 %v5644_v39  ;;  %v6509_v52 = vpop.f32.mrf.mxu1  ;;  %3713 = vmatprep.subr.bf16.mxu1 %v5772_v40  ;;  %v492_v38 = vld [vmem:[#allocation3 + $0xcc8] sm:$0xff]  ;;  %v5867_v40 = vcombine.low %v372_v23, %v376_v24  ;;  %v5860_v42 = vcombine.high %v364_v36, %v368_v37 }
  0xff   :  { %v496_v39 = vld [vmem:[#allocation3 + $0xce8] sm:$0xff] }
 0x100   :  { %v734_v56 = vpop.f32.mrf.mxu0  ;;  %v775_v61 = vpop.f32.mrf.mxu1  ;;  %v5988_v44 = vcombine.high %v492_v38, %v496_v39  ;;  %v5987_v54 = vcombine.low %v492_v38, %v496_v39  ;;  %v464_v23 = vld [vmem:[#allocation3 + $0xbe8] sm:$0xff] }
 0x101   :  { %3673 = vmatpush2.bf16.msra.mxu0 %v5643_v49  ;;  %3714 = vmatpush2.bf16.msra.mxu1 %v5771_v50  ;;  %v360_v49 = vld [vmem:[#allocation3 + $0x8a8] sm:$0xff] }
 0x102   :  { %v735_v63 = vpop.f32.mrf.mxu0  ;;  %3724 = vmatprep.subr.bf16.mxu0 %v5892_v51  ;;  %v776_v3 = vpop.f32.mrf.mxu1  ;;  %3765 = vmatprep.subr.bf16.mxu1 %v6020_v53  ;;  %v484_v50 = vld [vmem:[#allocation3 + $0xc88] sm:$0xff]  ;;  %v5859_v53 = vcombine.low %v364_v36, %v368_v37  ;;  %v5852_v55 = vcombine.high %v356_v45, %v360_v49 }
 0x103   :  { %v488_v51 = vld [vmem:[#allocation3 + $0xca8] sm:$0xff]  ;;  %v5851_v63 = vcombine.low %v356_v45, %v360_v49 }
 0x104   :  { %v6511_v8 = vpop.f32.mrf.mxu0  ;;  %3675 = vmatmul.mubr.bf16.vlgmr.msra.gmra.mxu0 %v6474_v59  ;;  %v6514_v13 = vpop.f32.mrf.mxu1  ;;  %3716 = vmatmul.mubr.bf16.vlgmr.msra.gmra.mxu1 %v6481_v5  ;;  %v5980_v56 = vcombine.high %v484_v50, %v488_v51  ;;  %v476_v61 = vld [vmem:[#allocation3 + $0xc48] sm:$0xff] }
 0x105   :  { %3725 = vmatpush1.bf16.msra.mxu0 %v5891_v62  ;;  %3766 = vmatpush1.bf16.msra.mxu1 %v6019_v0  ;;  %v480_v62 = vld [vmem:[#allocation3 + $0xc68] sm:$0xff]  ;;  %v5979_v0 = vcombine.low %v484_v50, %v488_v51 }
 0x106   :  { %v6517_v16 = vpop.f32.mrf.mxu0  ;;  %3726 = vmatprep.subr.bf16.mxu0 %v5884_v1  ;;  %v6519_v19 = vpop.f32.mrf.mxu1  ;;  %3767 = vmatprep.subr.bf16.mxu1 %v6012_v12  ;;  %v5844_v1 = vcombine.high %v348_v58, %v352_v60  ;;  %v5972_v3 = vcombine.high %v476_v61, %v480_v62  ;;  %v340_v12 = vld [vmem:[#allocation3 + $0x808] sm:$0xff] }
 0x107   :  { %3756 = vmatprep.mubr.bf16.mxu0 %v6477_v4  ;;  %3797 = vmatprep.mubr.bf16.mxu1 %v6486_v15  ;;  %v588_v24 = vld [vmem:[#allocation3 + $0xfc8] sm:$0xff]  ;;  %v5835_v26 = vcombine.low %v340_v12, %v344_v6 }
 0x108   :  { %v816_v25 = vpop.f32.mrf.mxu0  ;;  %v857_v29 = vpop.f32.mrf.mxu1  ;;  %v444_v39 = vld [vmem:[#allocation3 + $0xb48] sm:$0xff] }
 0x109   :  { %3727 = vmatpush1.bf16.msra.mxu0 %v5883_v14  ;;  %3768 = vmatpush1.bf16.msra.mxu1 %v6011_v17  ;;  %v5971_v14 = vcombine.low %v476_v61, %v480_v62  ;;  %v5836_v17 = vcombine.high %v340_v12, %v344_v6  ;;  %v592_v25 = vld [vmem:[#allocation3 + $0xfe8] sm:$0xff] }
 0x10a   :  { %v817_v32 = vpop.f32.mrf.mxu0  ;;  %3728 = vmatprep.subr.bf16.mxu0 %v5876_v18  ;;  %v858_v34 = vpop.f32.mrf.mxu1  ;;  %3769 = vmatprep.subr.bf16.mxu1 %v6004_v20  ;;  %v5964_v18 = vcombine.high %v468_v7, %v472_v9  ;;  %v460_v20 = vld [vmem:[#allocation3 + $0xbc8] sm:$0xff]  ;;  %v6083_v36 = vcombine.low %v588_v24, %v592_v25 }
 0x10b   :  { %v5956_v29 = vcombine.high %v460_v20, %v464_v23  ;;  %v452_v32 = vld [vmem:[#allocation3 + $0xb88] sm:$0xff] }
 0x10c   :  { %v584_v34 = vld [vmem:[#allocation3 + $0xfa8] sm:$0xff] }
 0x10d   :  { %3729 = vmatpush1.bf16.msra.mxu0 %v5875_v30  ;;  %3770 = vmatpush1.bf16.msra.mxu1 %v6003_v48  ;;  %v6084_v30 = vcombine.high %v588_v24, %v592_v25  ;;  %v456_v48 = vld [vmem:[#allocation3 + $0xba8] sm:$0xff] }
 0x10e   :  { %3730 = vmatprep.subr.bf16.mxu0 %v5868_v33  ;;  %3771 = vmatprep.subr.bf16.mxu1 %v5996_v35  ;;  %v580_v33 = vld [vmem:[#allocation3 + $0xf88] sm:$0xff]  ;;  %v5955_v35 = vcombine.low %v460_v20, %v464_v23  ;;  %v5948_v37 = vcombine.high %v452_v32, %v456_v48 }
 0x10f   :  { %v6076_v38 = vcombine.high %v580_v33, %v584_v34  ;;  %v6075_v45 = vcombine.low %v580_v33, %v584_v34  ;;  %v436_v51 = vld [vmem:[#allocation3 + $0xb08] sm:$0xff] }
 0x110   :  { %v428_v62 = vld [vmem:[#allocation3 + $0xac8] sm:$0xff] }
 0x111   :  { %3731 = vmatpush1.bf16.msra.mxu0 %v5867_v40  ;;  %3772 = vmatpush1.bf16.msra.mxu1 %v5995_v41  ;;  %v448_v40 = vld [vmem:[#allocation3 + $0xb68] sm:$0xff] }
 0x112   :  { %3732 = vmatprep.subr.bf16.mxu0 %v5860_v42  ;;  %3773 = vmatprep.subr.bf16.mxu1 %v5988_v44  ;;  %v572_v41 = vld [vmem:[#allocation3 + $0xf48] sm:$0xff]  ;;  %v5947_v44 = vcombine.low %v452_v32, %v456_v48  ;;  %v5940_v49 = vcombine.high %v444_v39, %v448_v40 }
 0x113   :  { %v576_v42 = vld [vmem:[#allocation3 + $0xf68] sm:$0xff] }
 0x114   :  { %v6068_v50 = vcombine.high %v572_v41, %v576_v42  ;;  %v6067_v58 = vcombine.low %v572_v41, %v576_v42  ;;  %v420_v9 = vld [vmem:[#allocation3 + $0xa88] sm:$0xff]  ;;  %v141_v42 = vld [vmem:[#allocation3 + $0x1d0] sm:$0xff] }
 0x115   :  { %3733 = vmatpush1.bf16.msra.mxu0 %v5859_v53  ;;  %3774 = vmatpush1.bf16.msra.mxu1 %v5987_v54  ;;  %v440_v53 = vld [vmem:[#allocation3 + $0xb28] sm:$0xff] }
 0x116   :  { %3734 = vmatprep.subr.bf16.mxu0 %v5852_v55  ;;  %3775 = vmatprep.subr.bf16.mxu1 %v5980_v56  ;;  %v564_v54 = vld [vmem:[#allocation3 + $0xf08] sm:$0xff]  ;;  %v5939_v56 = vcombine.low %v444_v39, %v448_v40  ;;  %v5932_v60 = vcombine.high %v436_v51, %v440_v53 }
 0x117   :  { %v568_v55 = vld [vmem:[#allocation3 + $0xf28] sm:$0xff] }
 0x118   :  { %v6060_v61 = vcombine.high %v564_v54, %v568_v55  ;;  %v6059_v12 = vcombine.low %v564_v54, %v568_v55  ;;  %v412_v25 = vld [vmem:[#allocation3 + $0xa48] sm:$0xff]  ;;  %v133_v55 = vld [vmem:[#allocation3 + $0x190] sm:$0xff] }
 0x119   :  { %3735 = vmatpush1.bf16.msra.mxu0 %v5851_v63  ;;  %3776 = vmatpush1.bf16.msra.mxu1 %v5979_v0  ;;  %v432_v63 = vld [vmem:[#allocation3 + $0xae8] sm:$0xff] }
 0x11a   :  { %3736 = vmatprep.subr.bf16.mxu0 %v5844_v1  ;;  %3777 = vmatprep.subr.bf16.mxu1 %v5972_v3  ;;  %v556_v0 = vld [vmem:[#allocation3 + $0xec8] sm:$0xff]  ;;  %v5931_v3 = vcombine.low %v436_v51, %v440_v53  ;;  %v5924_v6 = vcombine.high %v428_v62, %v432_v63 }
 0x11b   :  { %v560_v1 = vld [vmem:[#allocation3 + $0xee8] sm:$0xff] }
 0x11c   :  { %v6052_v7 = vcombine.high %v556_v0, %v560_v1  ;;  %v6051_v20 = vcombine.low %v556_v0, %v560_v1  ;;  %v404_v34 = vld [vmem:[#allocation3 + $0xa08] sm:$0xff]  ;;  %v125_v1 = vld [vmem:[#allocation3 + $0x150] sm:$0xff] }
 0x11d   :  { %3737 = vmatpush1.bf16.msra.mxu0 %v5843_v11  ;;  %3778 = vmatpush1.bf16.msra.mxu1 %v5971_v14  ;;  %v424_v11 = vld [vmem:[#allocation3 + $0xaa8] sm:$0xff] }
 0x11e   :  { %3738 = vmatprep.subr.bf16.mxu0 %v5836_v17  ;;  %3779 = vmatprep.subr.bf16.mxu1 %v5964_v18  ;;  %v548_v14 = vld [vmem:[#allocation3 + $0xe88] sm:$0xff]  ;;  %v5923_v18 = vcombine.low %v428_v62, %v432_v63  ;;  %v5916_v23 = vcombine.high %v420_v9, %v424_v11 }
 0x11f   :  { %v552_v17 = vld [vmem:[#allocation3 + $0xea8] sm:$0xff] }
 0x120   :  { %v6044_v24 = vcombine.high %v548_v14, %v552_v17  ;;  %v6043_v32 = vcombine.low %v548_v14, %v552_v17 }
 0x121   :  { %3739 = vmatpush1.bf16.msra.mxu0 %v5835_v26  ;;  %3780 = vmatpush1.bf16.msra.mxu1 %v5963_v27  ;;  %v416_v26 = vld [vmem:[#allocation3 + $0xa68] sm:$0xff] }
 0x122   :  { %3740 = vmatprep.subr.bf16.mxu0 %v5956_v29  ;;  %3781 = vmatprep.subr.bf16.mxu1 %v6084_v30  ;;  %v540_v27 = vld [vmem:[#allocation3 + $0xe48] sm:$0xff]  ;;  %v5915_v30 = vcombine.low %v420_v9, %v424_v11  ;;  %v5908_v48 = vcombine.high %v412_v25, %v416_v26 }
 0x123   :  { %v544_v29 = vld [vmem:[#allocation3 + $0xe68] sm:$0xff] }
 0x124   :  { %v6036_v33 = vcombine.high %v540_v27, %v544_v29  ;;  %v6035_v39 = vcombine.low %v540_v27, %v544_v29  ;;  %v117_v27 = vld [vmem:[#allocation3 + $0x110] sm:$0xff] }
 0x125   :  { %3741 = vmatpush2.bf16.msra.mxu0 %v5955_v35  ;;  %3782 = vmatpush2.bf16.msra.mxu1 %v6083_v36  ;;  %v408_v35 = vld [vmem:[#allocation3 + $0xa28] sm:$0xff]  ;;  %v121_v29 = vld [vmem:[#allocation3 + $0x130] sm:$0xff] }
 0x126   :  { %3742 = vmatprep.subr.bf16.mxu0 %v5948_v37  ;;  %3783 = vmatprep.subr.bf16.mxu1 %v6076_v38  ;;  %v532_v36 = vld [vmem:[#allocation3 + $0xe08] sm:$0xff]  ;;  %v5907_v38 = vcombine.low %v412_v25, %v416_v26  ;;  %v5900_v40 = vcombine.high %v404_v34, %v408_v35 }
 0x127   :  { %v536_v37 = vld [vmem:[#allocation3 + $0xe28] sm:$0xff] }
 0x128   :  { %v6028_v41 = vcombine.high %v532_v36, %v536_v37  ;;  %v6027_v51 = vcombine.low %v532_v36, %v536_v37  ;;  %v5614_v36 = vcombine.high %v117_v27, %v121_v29 }
 0x129   :  { %3743 = vmatpush2.bf16.msra.mxu0 %v5947_v44  ;;  %3784 = vmatpush2.bf16.msra.mxu1 %v6075_v45  ;;  %v145_v44 = vld [vmem:[#allocation3 + $0x1f0] sm:$0xff] }
 0x12a   :  { %3744 = vmatprep.subr.bf16.mxu0 %v5940_v49  ;;  %3785 = vmatprep.subr.bf16.mxu1 %v6068_v50  ;;  %v269_v45 = vld [vmem:[#allocation3 + $0x5d0] sm:$0xff]  ;;  %v5899_v50 = vcombine.low %v404_v34, %v408_v35  ;;  %v5638_v53 = vcombine.high %v141_v42, %v145_v44 }
 0x12b   :  { %v273_v49 = vld [vmem:[#allocation3 + $0x5f0] sm:$0xff] }
 0x12c   :  { %v5766_v54 = vcombine.high %v269_v45, %v273_v49  ;;  %v5765_v62 = vcombine.low %v269_v45, %v273_v49 }
 0x12d   :  { %3745 = vmatpush2.bf16.msra.mxu0 %v5939_v56  ;;  %3786 = vmatpush2.bf16.msra.mxu1 %v6067_v58  ;;  %v137_v56 = vld [vmem:[#allocation3 + $0x1b0] sm:$0xff] }
 0x12e   :  { %3746 = vmatprep.subr.bf16.mxu0 %v5932_v60  ;;  %3787 = vmatprep.subr.bf16.mxu1 %v6060_v61  ;;  %v261_v58 = vld [vmem:[#allocation3 + $0x590] sm:$0xff]  ;;  %v5637_v61 = vcombine.low %v141_v42, %v145_v44  ;;  %v5630_v63 = vcombine.high %v133_v55, %v137_v56  ;;  %v5629_v14 = vcombine.low %v133_v55, %v137_v56 }
 0x12f   :  { %v265_v60 = vld [vmem:[#allocation3 + $0x5b0] sm:$0xff]  ;;  %v5613_v44 = vcombine.low %v117_v27, %v121_v29 }
 0x130   :  { %v5758_v0 = vcombine.high %v261_v58, %v265_v60  ;;  %v241_v42 = vld [vmem:[#allocation3 + $0x4f0] sm:$0xff] }
 0x131   :  { %3747 = vmatpush2.bf16.msra.mxu0 %v5931_v3  ;;  %3788 = vmatpush2.bf16.msra.mxu1 %v6059_v12  ;;  %v129_v3 = vld [vmem:[#allocation3 + $0x170] sm:$0xff] }
 0x132   :  { %3748 = vmatprep.subr.bf16.mxu0 %v5924_v6  ;;  %3789 = vmatprep.subr.bf16.mxu1 %v6052_v7  ;;  %v253_v6 = vld [vmem:[#allocation3 + $0x550] sm:$0xff]  ;;  %v5621_v34 = vcombine.low %v125_v1, %v129_v3 }
 0x133   :  { %v257_v7 = vld [vmem:[#allocation3 + $0x570] sm:$0xff] }
 0x134   :  { %v5750_v26 = vcombine.high %v253_v6, %v257_v7  ;;  %v233_v55 = vld [vmem:[#allocation3 + $0x4b0] sm:$0xff] }
 0x135   :  { %3749 = vmatpush2.bf16.msra.mxu0 %v5923_v18  ;;  %3790 = vmatpush2.bf16.msra.mxu1 %v6051_v20  ;;  %v5757_v18 = vcombine.low %v261_v58, %v265_v60  ;;  %v5622_v20 = vcombine.high %v125_v1, %v129_v3  ;;  %v225_v1 = vld [vmem:[#allocation3 + $0x470] sm:$0xff] }
 0x136   :  { %3750 = vmatprep.subr.bf16.mxu0 %v5916_v23  ;;  %3791 = vmatprep.subr.bf16.mxu1 %v6044_v24  ;;  %v209_v27 = vld [vmem:[#allocation3 + $0x3f0] sm:$0xff] }
 0x137   :  { %v333_v29 = vld [vmem:[#allocation3 + $0x7d0] sm:$0xff] }
 0x139   :  { %3751 = vmatpush2.bf16.msra.mxu0 %v5915_v30  ;;  %3792 = vmatpush2.bf16.msra.mxu1 %v6043_v32  ;;  %v245_v30 = vld [vmem:[#allocation3 + $0x510] sm:$0xff] }
 0x13a   :  { %3752 = vmatprep.subr.bf16.mxu0 %v5908_v48  ;;  %3793 = vmatprep.subr.bf16.mxu1 %v6036_v33  ;;  %v249_v32 = vld [vmem:[#allocation3 + $0x530] sm:$0xff] }
 0x13b   :  { %v5741_v45 = vcombine.low %v245_v30, %v249_v32 }
 0x13d   :  { %3753 = vmatpush2.bf16.msra.mxu0 %v5907_v38  ;;  %3794 = vmatpush2.bf16.msra.mxu1 %v6035_v39  ;;  %v5742_v38 = vcombine.high %v245_v30, %v249_v32  ;;  %v109_v39 = vld [vmem:[#allocation3 + $0xd0] sm:$0xff] }
 0x13e   :  { %3754 = vmatprep.subr.bf16.mxu0 %v5900_v40  ;;  %3795 = vmatprep.subr.bf16.mxu1 %v6028_v41  ;;  %v113_v40 = vld [vmem:[#allocation3 + $0xf0] sm:$0xff] }
 0x13f   :  { %v237_v41 = vld [vmem:[#allocation3 + $0x4d0] sm:$0xff]  ;;  %v5606_v49 = vcombine.high %v109_v39, %v113_v40  ;;  %v5605_v56 = vcombine.low %v109_v39, %v113_v40 }
 0x140   :  { %v5733_v58 = vcombine.low %v237_v41, %v241_v42 }
 0x141   :  { %3755 = vmatpush2.bf16.msra.mxu0 %v5899_v50  ;;  %3796 = vmatpush2.bf16.msra.mxu1 %v6027_v51  ;;  %v5734_v50 = vcombine.high %v237_v41, %v241_v42  ;;  %v101_v51 = vld [vmem:[#allocation3 + $0x90] sm:$0xff] }
 0x142   :  { %3806 = vmatprep.subr.bf16.mxu0 %v5638_v53  ;;  %3847 = vmatprep.subr.bf16.mxu1 %v5766_v54  ;;  %v105_v53 = vld [vmem:[#allocation3 + $0xb0] sm:$0xff] }
 0x143   :  { %v229_v54 = vld [vmem:[#allocation3 + $0x490] sm:$0xff]  ;;  %v5598_v60 = vcombine.high %v101_v51, %v105_v53  ;;  %v5597_v3 = vcombine.low %v101_v51, %v105_v53 }
 0x144   :  { %v3512_v12 = vpop.f32.mrf.mxu0  ;;  %3757 = vmatmul.mubr.bf16.vlgmr.msra.gmra.mxu0 %v6493_v21  ;;  %v3553_v11 = vpop.f32.mrf.mxu1  ;;  %3798 = vmatmul.mubr.bf16.vlgmr.msra.gmra.mxu1 %v6497_v31  ;;  %v189_v42 = vld [vmem:[#allocation3 + $0x350] sm:$0xff] }
 0x145   :  { %v3513_v9 = vadd.f32 %v3512_v12, %v6503_v43  ;;  %3807 = vmatpush1.bf16.msra.mxu0 %v5637_v61  ;;  %3848 = vmatpush1.bf16.msra.mxu1 %v5765_v62  ;;  %v5726_v61 = vcombine.high %v229_v54, %v233_v55  ;;  %v93_v62 = vld [vmem:[#allocation3 + $0x50] sm:$0xff]  ;;  %v5725_v12 = vcombine.low %v229_v54, %v233_v55 }
 0x146   :  { %v3514_v17 = vpop.f32.mrf.mxu0  ;;  %3808 = vmatprep.subr.bf16.mxu0 %v5630_v63  ;;  %v3555_v25 = vpop.f32.mrf.mxu1  ;;  %3849 = vmatprep.subr.bf16.mxu1 %v5758_v0  ;;  %v97_v63 = vld [vmem:[#allocation3 + $0x70] sm:$0xff] }
 0x147   :  { %v6526_v23 = vadd.f32 %v3553_v11, %v3513_v9  ;;  %v3515_v24 = vadd.f32 %v3514_v17, %v6507_v10  ;;  %3838 = vmatprep.mubr.bf16.mxu0 %v6457_v22  ;;  %3879 = vmatprep.mubr.bf16.mxu1 %v6462_v28  ;;  %v5749_v10 = vcombine.low %v253_v6, %v257_v7  ;;  %v221_v0 = vld [vmem:[#allocation3 + $0x450] sm:$0xff] }
 0x148   :  { %v3516_v43 = vpop.f32.mrf.mxu0  ;;  %v3557_v33 = vpop.f32.mrf.mxu1  ;;  %v5590_v6 = vcombine.high %v93_v62, %v97_v63  ;;  %v5718_v7 = vcombine.high %v221_v0, %v225_v1  ;;  %v85_v9 = vld [vmem:[#allocation3 + $0x10] sm:$0xff] }
 0x149   :  { %v6531_v48 = vadd.f32 %v3555_v25, %v3515_v24  ;;  %3809 = vmatpush1.bf16.msra.mxu0 %v5629_v14  ;;  %3850 = vmatpush1.bf16.msra.mxu1 %v5757_v18  ;;  %v89_v11 = vld [vmem:[#allocation3 + $0x30] sm:$0xff]  ;;  %v5589_v18 = vcombine.low %v93_v62, %v97_v63 }
 0x14a   :  { %v3517_v35 = vpop.f32.mrf.mxu0  ;;  %3810 = vmatprep.subr.bf16.mxu0 %v5622_v20  ;;  %v3558_v37 = vpop.f32.mrf.mxu1  ;;  %3851 = vmatprep.subr.bf16.mxu1 %v5750_v26  ;;  %v213_v14 = vld [vmem:[#allocation3 + $0x410] sm:$0xff]  ;;  %v5717_v20 = vcombine.low %v221_v0, %v225_v1  ;;  %v5582_v24 = vcombine.high %v85_v9, %v89_v11  ;;  %v5581_v30 = vcombine.low %v85_v9, %v89_v11 }
 0x14b   :  { %v217_v17 = vld [vmem:[#allocation3 + $0x430] sm:$0xff] }
 0x14c   :  { %v5710_v25 = vcombine.high %v213_v14, %v217_v17  ;;  %v205_v26 = vld [vmem:[#allocation3 + $0x3d0] sm:$0xff]  ;;  %v5709_v32 = vcombine.low %v213_v14, %v217_v17 }
 0x14d   :  { %3811 = vmatpush1.bf16.msra.mxu0 %v5621_v34  ;;  %3852 = vmatpush1.bf16.msra.mxu1 %v5749_v10  ;;  %v337_v43 = vld [vmem:[#allocation3 + $0x7f0] sm:$0xff]  ;;  %v5702_v33 = vcombine.high %v205_v26, %v209_v27 }
 0x14e   :  { %3812 = vmatprep.subr.bf16.mxu0 %v5614_v36  ;;  %3853 = vmatprep.subr.bf16.mxu1 %v5742_v38  ;;  %v5830_v34 = vcombine.high %v333_v29, %v337_v43  ;;  %v197_v35 = vld [vmem:[#allocation3 + $0x390] sm:$0xff]  ;;  %v5701_v38 = vcombine.low %v205_v26, %v209_v27  ;;  %v5829_v39 = vcombine.low %v333_v29, %v337_v43 }
 0x14f   :  { %v201_v10 = vld [vmem:[#allocation3 + $0x3b0] sm:$0xff] }
 0x150   :  { %v325_v36 = vld [vmem:[#allocation3 + $0x790] sm:$0xff]  ;;  %v5694_v40 = vcombine.high %v197_v35, %v201_v10 }
 0x151   :  { %3813 = vmatpush1.bf16.msra.mxu0 %v5613_v44  ;;  %3854 = vmatpush1.bf16.msra.mxu1 %v5741_v45  ;;  %v329_v37 = vld [vmem:[#allocation3 + $0x7b0] sm:$0xff] }
 0x152   :  { %3814 = vmatprep.subr.bf16.mxu0 %v5606_v49  ;;  %3855 = vmatprep.subr.bf16.mxu1 %v5734_v50  ;;  %v5822_v41 = vcombine.high %v325_v36, %v329_v37  ;;  %v193_v44 = vld [vmem:[#allocation3 + $0x370] sm:$0xff]  ;;  %v5693_v50 = vcombine.low %v197_v35, %v201_v10  ;;  %v5821_v51 = vcombine.low %v325_v36, %v329_v37 }
 0x153   :  { %v317_v45 = vld [vmem:[#allocation3 + $0x750] sm:$0xff]  ;;  %v5686_v53 = vcombine.high %v189_v42, %v193_v44 }
 0x154   :  { %v321_v49 = vld [vmem:[#allocation3 + $0x770] sm:$0xff] }
 0x155   :  { %3815 = vmatpush1.bf16.msra.mxu0 %v5605_v56  ;;  %3856 = vmatpush1.bf16.msra.mxu1 %v5733_v58  ;;  %v5814_v54 = vcombine.high %v317_v45, %v321_v49  ;;  %v181_v55 = vld [vmem:[#allocation3 + $0x310] sm:$0xff]  ;;  %v5813_v62 = vcombine.low %v317_v45, %v321_v49 }
 0x156   :  { %3816 = vmatprep.subr.bf16.mxu0 %v5598_v60  ;;  %3857 = vmatprep.subr.bf16.mxu1 %v5726_v61  ;;  %v185_v56 = vld [vmem:[#allocation3 + $0x330] sm:$0xff]  ;;  %v5685_v61 = vcombine.low %v189_v42, %v193_v44 }
 0x157   :  { %v309_v58 = vld [vmem:[#allocation3 + $0x710] sm:$0xff]  ;;  %v5678_v63 = vcombine.high %v181_v55, %v185_v56 }
 0x158   :  { %v313_v60 = vld [vmem:[#allocation3 + $0x730] sm:$0xff] }
 0x159   :  { %3817 = vmatpush1.bf16.msra.mxu0 %v5597_v3  ;;  %3858 = vmatpush1.bf16.msra.mxu1 %v5725_v12  ;;  %v5806_v0 = vcombine.high %v309_v58, %v313_v60  ;;  %v173_v1 = vld [vmem:[#allocation3 + $0x2d0] sm:$0xff]  ;;  %v5805_v9 = vcombine.low %v309_v58, %v313_v60 }
 0x15a   :  { %3818 = vmatprep.subr.bf16.mxu0 %v5590_v6  ;;  %3859 = vmatprep.subr.bf16.mxu1 %v5718_v7  ;;  %v177_v3 = vld [vmem:[#allocation3 + $0x2f0] sm:$0xff]  ;;  %v5677_v7 = vcombine.low %v181_v55, %v185_v56 }
 0x15b   :  { %v301_v12 = vld [vmem:[#allocation3 + $0x6d0] sm:$0xff]  ;;  %v5670_v11 = vcombine.high %v173_v1, %v177_v3 }
 0x15c   :  { %v305_v6 = vld [vmem:[#allocation3 + $0x6f0] sm:$0xff] }
 0x15d   :  { %3819 = vmatpush1.bf16.msra.mxu0 %v5589_v18  ;;  %3860 = vmatpush1.bf16.msra.mxu1 %v5717_v20  ;;  %v5798_v14 = vcombine.high %v301_v12, %v305_v6  ;;  %v165_v17 = vld [vmem:[#allocation3 + $0x290] sm:$0xff]  ;;  %v5797_v26 = vcombine.low %v301_v12, %v305_v6 }
 0x15e   :  { %3820 = vmatprep.subr.bf16.mxu0 %v5582_v24  ;;  %3861 = vmatprep.subr.bf16.mxu1 %v5710_v25  ;;  %v169_v18 = vld [vmem:[#allocation3 + $0x2b0] sm:$0xff]  ;;  %v5669_v25 = vcombine.low %v173_v1, %v177_v3 }
 0x15f   :  { %v293_v20 = vld [vmem:[#allocation3 + $0x690] sm:$0xff]  ;;  %v5662_v27 = vcombine.high %v165_v17, %v169_v18 }
 0x160   :  { %v297_v24 = vld [vmem:[#allocation3 + $0x6b0] sm:$0xff] }
 0x161   :  { %3821 = vmatpush1.bf16.msra.mxu0 %v5581_v30  ;;  %3862 = vmatpush1.bf16.msra.mxu1 %v5709_v32  ;;  %v5790_v29 = vcombine.high %v293_v20, %v297_v24  ;;  %v157_v43 = vld [vmem:[#allocation3 + $0x250] sm:$0xff]  ;;  %v5789_v35 = vcombine.low %v293_v20, %v297_v24 }
 0x162   :  { %3822 = vmatprep.subr.bf16.mxu0 %v5702_v33  ;;  %3863 = vmatprep.subr.bf16.mxu1 %v5830_v34  ;;  %v161_v30 = vld [vmem:[#allocation3 + $0x270] sm:$0xff]  ;;  %v5661_v34 = vcombine.low %v165_v17, %v169_v18 }
 0x163   :  { %v285_v32 = vld [vmem:[#allocation3 + $0x650] sm:$0xff]  ;;  %v5654_v10 = vcombine.high %v157_v43, %v161_v30 }
 0x164   :  { %v289_v33 = vld [vmem:[#allocation3 + $0x670] sm:$0xff] }
 0x165   :  { %3823 = vmatpush2.bf16.msra.mxu0 %v5701_v38  ;;  %3864 = vmatpush2.bf16.msra.mxu1 %v5829_v39  ;;  %v5782_v36 = vcombine.high %v285_v32, %v289_v33  ;;  %v149_v37 = vld [vmem:[#allocation3 + $0x210] sm:$0xff]  ;;  %v5781_v42 = vcombine.low %v285_v32, %v289_v33 }
 0x166   :  { %3824 = vmatprep.subr.bf16.mxu0 %v5694_v40  ;;  %3865 = vmatprep.subr.bf16.mxu1 %v5822_v41  ;;  %v153_v38 = vld [vmem:[#allocation3 + $0x230] sm:$0xff]  ;;  %v5653_v41 = vcombine.low %v157_v43, %v161_v30 }
 0x167   :  { %v277_v39 = vld [vmem:[#allocation3 + $0x610] sm:$0xff]  ;;  %v5646_v44 = vcombine.high %v149_v37, %v153_v38 }
 0x168   :  { %v281_v40 = vld [vmem:[#allocation3 + $0x630] sm:$0xff] }
 0x169   :  { %3825 = vmatpush2.bf16.msra.mxu0 %v5693_v50  ;;  %3866 = vmatpush2.bf16.msra.mxu1 %v5821_v51  ;;  %v5774_v45 = vcombine.high %v277_v39, %v281_v40  ;;  %v397_v49 = vld [vmem:[#allocation3 + $0x9d0] sm:$0xff]  ;;  %v5773_v55 = vcombine.low %v277_v39, %v281_v40 }
 0x16a   :  { %3826 = vmatprep.subr.bf16.mxu0 %v5686_v53  ;;  %3867 = vmatprep.subr.bf16.mxu1 %v5814_v54  ;;  %v401_v50 = vld [vmem:[#allocation3 + $0x9f0] sm:$0xff]  ;;  %v5645_v54 = vcombine.low %v149_v37, %v153_v38 }
 0x16b   :  { %v525_v51 = vld [vmem:[#allocation3 + $0xdd0] sm:$0xff]  ;;  %v5894_v56 = vcombine.high %v397_v49, %v401_v50 }
 0x16c   :  { %v529_v53 = vld [vmem:[#allocation3 + $0xdf0] sm:$0xff] }
 0x16d   :  { %3827 = vmatpush2.bf16.msra.mxu0 %v5685_v61  ;;  %3868 = vmatpush2.bf16.msra.mxu1 %v5813_v62  ;;  %v6022_v58 = vcombine.high %v525_v51, %v529_v53  ;;  %v389_v60 = vld [vmem:[#allocation3 + $0x990] sm:$0xff]  ;;  %v6021_v1 = vcombine.low %v525_v51, %v529_v53 }
 0x16e   :  { %3828 = vmatprep.subr.bf16.mxu0 %v5678_v63  ;;  %3869 = vmatprep.subr.bf16.mxu1 %v5806_v0  ;;  %v393_v61 = vld [vmem:[#allocation3 + $0x9b0] sm:$0xff]  ;;  %v5893_v0 = vcombine.low %v397_v49, %v401_v50 }
 0x16f   :  { %v517_v62 = vld [vmem:[#allocation3 + $0xd90] sm:$0xff]  ;;  %v5886_v3 = vcombine.high %v389_v60, %v393_v61  ;;  %v5885_v20 = vcombine.low %v389_v60, %v393_v61 }
 0x170   :  { %v521_v63 = vld [vmem:[#allocation3 + $0xdb0] sm:$0xff] }
 0x171   :  { %3829 = vmatpush2.bf16.msra.mxu0 %v5677_v7  ;;  %3870 = vmatpush2.bf16.msra.mxu1 %v5805_v9  ;;  %v6014_v12 = vcombine.high %v517_v62, %v521_v63  ;;  %v381_v6 = vld [vmem:[#allocation3 + $0x950] sm:$0xff] }
 0x172   :  { %3830 = vmatprep.subr.bf16.mxu0 %v5670_v11  ;;  %3871 = vmatprep.subr.bf16.mxu1 %v5798_v14  ;;  %v385_v7 = vld [vmem:[#allocation3 + $0x970] sm:$0xff] }
 0x173   :  { %v509_v11 = vld [vmem:[#allocation3 + $0xd50] sm:$0xff]  ;;  %v5877_v37 = vcombine.low %v381_v6, %v385_v7 }
 0x174   :  { %v513_v14 = vld [vmem:[#allocation3 + $0xd70] sm:$0xff] }
 0x175   :  { %3831 = vmatpush2.bf16.msra.mxu0 %v5669_v25  ;;  %3872 = vmatpush2.bf16.msra.mxu1 %v5797_v26  ;;  %v6013_v25 = vcombine.low %v517_v62, %v521_v63  ;;  %v5878_v26 = vcombine.high %v381_v6, %v385_v7  ;;  %v6006_v30 = vcombine.high %v509_v11, %v513_v14  ;;  %v373_v32 = vld [vmem:[#allocation3 + $0x910] sm:$0xff] }
 0x176   :  { %3832 = vmatprep.subr.bf16.mxu0 %v5662_v27  ;;  %3873 = vmatprep.subr.bf16.mxu1 %v5790_v29  ;;  %v377_v33 = vld [vmem:[#allocation3 + $0x930] sm:$0xff] }
 0x177   :  { %v5870_v39 = vcombine.high %v373_v32, %v377_v33  ;;  %v497_v49 = vld [vmem:[#allocation3 + $0xcf0] sm:$0xff]  ;;  %v5869_v50 = vcombine.low %v373_v32, %v377_v33 }
 0x178   :  { %v489_v60 = vld [vmem:[#allocation3 + $0xcb0] sm:$0xff] }
 0x179   :  { %3833 = vmatpush2.bf16.msra.mxu0 %v5661_v34  ;;  %3874 = vmatpush2.bf16.msra.mxu1 %v5789_v35  ;;  %v501_v34 = vld [vmem:[#allocation3 + $0xd10] sm:$0xff] }
 0x17a   :  { %3834 = vmatprep.subr.bf16.mxu0 %v5654_v10  ;;  %3875 = vmatprep.subr.bf16.mxu1 %v5782_v36  ;;  %v505_v35 = vld [vmem:[#allocation3 + $0xd30] sm:$0xff] }
 0x17b   :  { %v5997_v51 = vcombine.low %v501_v34, %v505_v35  ;;  %v481_v6 = vld [vmem:[#allocation3 + $0xc70] sm:$0xff] }
 0x17c   :  { %v465_v32 = vld [vmem:[#allocation3 + $0xbf0] sm:$0xff] }
 0x17d   :  { %3835 = vmatpush2.bf16.msra.mxu0 %v5653_v41  ;;  %3876 = vmatpush2.bf16.msra.mxu1 %v5781_v42  ;;  %v5998_v41 = vcombine.high %v501_v34, %v505_v35  ;;  %v365_v42 = vld [vmem:[#allocation3 + $0x8d0] sm:$0xff] }
 0x17e   :  { %3836 = vmatprep.subr.bf16.mxu0 %v5646_v44  ;;  %3877 = vmatprep.subr.bf16.mxu1 %v5774_v45  ;;  %v369_v44 = vld [vmem:[#allocation3 + $0x8f0] sm:$0xff] }
 0x17f   :  { %v493_v45 = vld [vmem:[#allocation3 + $0xcd0] sm:$0xff]  ;;  %v5862_v53 = vcombine.high %v365_v42, %v369_v44  ;;  %v5861_v61 = vcombine.low %v365_v42, %v369_v44 }
 0x180   :  { %v5989_v62 = vcombine.low %v493_v45, %v497_v49  ;;  %v589_v33 = vld [vmem:[#allocation3 + $0xfd0] sm:$0xff] }
 0x181   :  { %3837 = vmatpush2.bf16.msra.mxu0 %v5645_v54  ;;  %3878 = vmatpush2.bf16.msra.mxu1 %v5773_v55  ;;  %v5990_v54 = vcombine.high %v493_v45, %v497_v49  ;;  %v357_v55 = vld [vmem:[#allocation3 + $0x890] sm:$0xff] }
 0x182   :  { %3888 = vmatprep.subr.bf16.mxu0 %v5894_v56  ;;  %3929 = vmatprep.subr.bf16.mxu1 %v6022_v58  ;;  %v361_v56 = vld [vmem:[#allocation3 + $0x8b0] sm:$0xff] }
 0x183   :  { %v485_v58 = vld [vmem:[#allocation3 + $0xc90] sm:$0xff]  ;;  %v5854_v63 = vcombine.high %v357_v55, %v361_v56  ;;  %v5853_v7 = vcombine.low %v357_v55, %v361_v56 }
 0x184   :  { %v3594_v9 = vpop.f32.mrf.mxu0  ;;  %3839 = vmatmul.mubr.bf16.vlgmr.msra.gmra.mxu0 %v6474_v59  ;;  %v3635_v18 = vpop.f32.mrf.mxu1  ;;  %3880 = vmatmul.mubr.bf16.vlgmr.msra.gmra.mxu1 %v6481_v5  ;;  %v445_v49 = vld [vmem:[#allocation3 + $0xb50] sm:$0xff] }
 0x185   :  { %v3595_v17 = vadd.f32 %v3594_v9, %v6526_v23  ;;  %3889 = vmatpush1.bf16.msra.mxu0 %v5893_v0  ;;  %3930 = vmatpush1.bf16.msra.mxu1 %v6021_v1  ;;  %v5982_v0 = vcombine.high %v485_v58, %v489_v60  ;;  %v349_v1 = vld [vmem:[#allocation3 + $0x850] sm:$0xff]  ;;  %v5981_v9 = vcombine.low %v485_v58, %v489_v60 }
 0x186   :  { %v3596_v24 = vpop.f32.mrf.mxu0  ;;  %3890 = vmatprep.subr.bf16.mxu0 %v5886_v3  ;;  %v3637_v43 = vpop.f32.mrf.mxu1  ;;  %3931 = vmatprep.subr.bf16.mxu1 %v6014_v12  ;;  %v353_v3 = vld [vmem:[#allocation3 + $0x870] sm:$0xff] }
 0x187   :  { %v6536_v27 = vadd.f32 %v3635_v18, %v3595_v17  ;;  %v3597_v29 = vadd.f32 %v3596_v24, %v6531_v48  ;;  %3920 = vmatprep.mubr.bf16.mxu0 %v6477_v4  ;;  %3961 = vmatprep.mubr.bf16.mxu1 %v6486_v15  ;;  %v6005_v48 = vcombine.low %v509_v11, %v513_v14  ;;  %v477_v12 = vld [vmem:[#allocation3 + $0xc50] sm:$0xff] }
 0x188   :  { %v3598_v23 = vpop.f32.mrf.mxu0  ;;  %v3639_v36 = vpop.f32.mrf.mxu1  ;;  %v5846_v11 = vcombine.high %v349_v1, %v353_v3  ;;  %v5974_v14 = vcombine.high %v477_v12, %v481_v6  ;;  %v341_v17 = vld [vmem:[#allocation3 + $0x810] sm:$0xff] }
 0x189   :  { %v6541_v10 = vadd.f32 %v3637_v43, %v3597_v29  ;;  %3891 = vmatpush1.bf16.msra.mxu0 %v5885_v20  ;;  %3932 = vmatpush1.bf16.msra.mxu1 %v6013_v25  ;;  %v345_v18 = vld [vmem:[#allocation3 + $0x830] sm:$0xff]  ;;  %v5845_v25 = vcombine.low %v349_v1, %v353_v3 }
 0x18a   :  { %v3599_v38 = vpop.f32.mrf.mxu0  ;;  %3892 = vmatprep.subr.bf16.mxu0 %v5878_v26  ;;  %v3640_v40 = vpop.f32.mrf.mxu1  ;;  %3933 = vmatprep.subr.bf16.mxu1 %v6006_v30  ;;  %v469_v20 = vld [vmem:[#allocation3 + $0xc10] sm:$0xff]  ;;  %v5973_v26 = vcombine.low %v477_v12, %v481_v6  ;;  %v5838_v29 = vcombine.high %v341_v17, %v345_v18  ;;  %v5837_v34 = vcombine.low %v341_v17, %v345_v18 }
 0x18b   :  { %v473_v24 = vld [vmem:[#allocation3 + $0xc30] sm:$0xff] }
 0x18c   :  { %v5966_v43 = vcombine.high %v469_v20, %v473_v24  ;;  %v461_v30 = vld [vmem:[#allocation3 + $0xbd0] sm:$0xff]  ;;  %v5965_v35 = vcombine.low %v469_v20, %v473_v24 }
 0x18d   :  { %3893 = vmatpush1.bf16.msra.mxu0 %v5877_v37  ;;  %3934 = vmatpush1.bf16.msra.mxu1 %v6005_v48  ;;  %v593_v23 = vld [vmem:[#allocation3 + $0xff0] sm:$0xff]  ;;  %v5958_v36 = vcombine.high %v461_v30, %v465_v32 }
 0x18e   :  { %3894 = vmatprep.subr.bf16.mxu0 %v5870_v39  ;;  %3935 = vmatprep.subr.bf16.mxu1 %v5998_v41  ;;  %v6086_v37 = vcombine.high %v589_v33, %v593_v23  ;;  %v453_v38 = vld [vmem:[#allocation3 + $0xb90] sm:$0xff]  ;;  %v5957_v41 = vcombine.low %v461_v30, %v465_v32  ;;  %v6085_v42 = vcombine.low %v589_v33, %v593_v23 }
 0x18f   :  { %v457_v48 = vld [vmem:[#allocation3 + $0xbb0] sm:$0xff] }
 0x190   :  { %v581_v39 = vld [vmem:[#allocation3 + $0xf90] sm:$0xff]  ;;  %v5950_v44 = vcombine.high %v453_v38, %v457_v48 }
 0x191   :  { %3895 = vmatpush1.bf16.msra.mxu0 %v5869_v50  ;;  %3936 = vmatpush1.bf16.msra.mxu1 %v5997_v51  ;;  %v585_v40 = vld [vmem:[#allocation3 + $0xfb0] sm:$0xff] }
 0x192   :  { %3896 = vmatprep.subr.bf16.mxu0 %v5862_v53  ;;  %3937 = vmatprep.subr.bf16.mxu1 %v5990_v54  ;;  %v6078_v45 = vcombine.high %v581_v39, %v585_v40  ;;  %v449_v50 = vld [vmem:[#allocation3 + $0xb70] sm:$0xff]  ;;  %v5949_v54 = vcombine.low %v453_v38, %v457_v48  ;;  %v6077_v55 = vcombine.low %v581_v39, %v585_v40 }
 0x193   :  { %v573_v51 = vld [vmem:[#allocation3 + $0xf50] sm:$0xff]  ;;  %v5942_v56 = vcombine.high %v445_v49, %v449_v50 }
 0x194   :  { %v577_v53 = vld [vmem:[#allocation3 + $0xf70] sm:$0xff] }
 0x195   :  { %3897 = vmatpush1.bf16.msra.mxu0 %v5861_v61  ;;  %3938 = vmatpush1.bf16.msra.mxu1 %v5989_v62  ;;  %v6070_v58 = vcombine.high %v573_v51, %v577_v53  ;;  %v437_v60 = vld [vmem:[#allocation3 + $0xb10] sm:$0xff]  ;;  %v6069_v1 = vcombine.low %v573_v51, %v577_v53  ;;  %v142_v53 = vld [vmem:[#allocation3 + $0x1d8] sm:$0xff] }
 0x196   :  { %3898 = vmatprep.subr.bf16.mxu0 %v5854_v63  ;;  %3939 = vmatprep.subr.bf16.mxu1 %v5982_v0  ;;  %v441_v61 = vld [vmem:[#allocation3 + $0xb30] sm:$0xff]  ;;  %v5941_v0 = vcombine.low %v445_v49, %v449_v50 }
 0x197   :  { %v565_v62 = vld [vmem:[#allocation3 + $0xf10] sm:$0xff]  ;;  %v5934_v3 = vcombine.high %v437_v60, %v441_v61 }
 0x198   :  { %v569_v63 = vld [vmem:[#allocation3 + $0xf30] sm:$0xff] }
 0x199   :  { %3899 = vmatpush1.bf16.msra.mxu0 %v5853_v7  ;;  %3940 = vmatpush1.bf16.msra.mxu1 %v5981_v9  ;;  %v6062_v12 = vcombine.high %v565_v62, %v569_v63  ;;  %v429_v6 = vld [vmem:[#allocation3 + $0xad0] sm:$0xff]  ;;  %v6061_v17 = vcombine.low %v565_v62, %v569_v63  ;;  %v134_v63 = vld [vmem:[#allocation3 + $0x198] sm:$0xff] }
 0x19a   :  { %3900 = vmatprep.subr.bf16.mxu0 %v5846_v11  ;;  %3941 = vmatprep.subr.bf16.mxu1 %v5974_v14  ;;  %v433_v7 = vld [vmem:[#allocation3 + $0xaf0] sm:$0xff]  ;;  %v5933_v14 = vcombine.low %v437_v60, %v441_v61 }
 0x19b   :  { %v557_v9 = vld [vmem:[#allocation3 + $0xed0] sm:$0xff]  ;;  %v5926_v18 = vcombine.high %v429_v6, %v433_v7 }
 0x19c   :  { %v561_v11 = vld [vmem:[#allocation3 + $0xef0] sm:$0xff] }
 0x19d   :  { %3901 = vmatpush1.bf16.msra.mxu0 %v5845_v25  ;;  %3942 = vmatpush1.bf16.msra.mxu1 %v5973_v26  ;;  %v6054_v20 = vcombine.high %v557_v9, %v561_v11  ;;  %v421_v24 = vld [vmem:[#allocation3 + $0xa90] sm:$0xff]  ;;  %v6053_v30 = vcombine.low %v557_v9, %v561_v11  ;;  %v126_v11 = vld [vmem:[#allocation3 + $0x158] sm:$0xff] }
 0x19e   :  { %3902 = vmatprep.subr.bf16.mxu0 %v5838_v29  ;;  %3943 = vmatprep.subr.bf16.mxu1 %v5966_v43  ;;  %v425_v25 = vld [vmem:[#allocation3 + $0xab0] sm:$0xff]  ;;  %v5925_v43 = vcombine.low %v429_v6, %v433_v7 }
 0x19f   :  { %v549_v26 = vld [vmem:[#allocation3 + $0xe90] sm:$0xff]  ;;  %v5918_v32 = vcombine.high %v421_v24, %v425_v25 }
 0x1a0   :  { %v553_v29 = vld [vmem:[#allocation3 + $0xeb0] sm:$0xff] }
 0x1a1   :  { %3903 = vmatpush1.bf16.msra.mxu0 %v5837_v34  ;;  %3944 = vmatpush1.bf16.msra.mxu1 %v5965_v35  ;;  %v6046_v33 = vcombine.high %v549_v26, %v553_v29  ;;  %v413_v23 = vld [vmem:[#allocation3 + $0xa50] sm:$0xff]  ;;  %v6045_v38 = vcombine.low %v549_v26, %v553_v29 }
 0x1a2   :  { %3904 = vmatprep.subr.bf16.mxu0 %v5958_v36  ;;  %3945 = vmatprep.subr.bf16.mxu1 %v6086_v37  ;;  %v417_v34 = vld [vmem:[#allocation3 + $0xa70] sm:$0xff]  ;;  %v5917_v37 = vcombine.low %v421_v24, %v425_v25 }
 0x1a3   :  { %v541_v35 = vld [vmem:[#allocation3 + $0xe50] sm:$0xff]  ;;  %v5910_v48 = vcombine.high %v413_v23, %v417_v34 }
 0x1a4   :  { %v545_v36 = vld [vmem:[#allocation3 + $0xe70] sm:$0xff] }
 0x1a5   :  { %3905 = vmatpush2.bf16.msra.mxu0 %v5957_v41  ;;  %3946 = vmatpush2.bf16.msra.mxu1 %v6085_v42  ;;  %v6038_v39 = vcombine.high %v541_v35, %v545_v36  ;;  %v405_v40 = vld [vmem:[#allocation3 + $0xa10] sm:$0xff]  ;;  %v6037_v49 = vcombine.low %v541_v35, %v545_v36  ;;  %v118_v35 = vld [vmem:[#allocation3 + $0x118] sm:$0xff] }
 0x1a6   :  { %3906 = vmatprep.subr.bf16.mxu0 %v5950_v44  ;;  %3947 = vmatprep.subr.bf16.mxu1 %v6078_v45  ;;  %v409_v41 = vld [vmem:[#allocation3 + $0xa30] sm:$0xff]  ;;  %v5909_v45 = vcombine.low %v413_v23, %v417_v34  ;;  %v122_v36 = vld [vmem:[#allocation3 + $0x138] sm:$0xff] }
 0x1a7   :  { %v533_v42 = vld [vmem:[#allocation3 + $0xe10] sm:$0xff]  ;;  %v5902_v50 = vcombine.high %v405_v40, %v409_v41 }
 0x1a8   :  { %v537_v44 = vld [vmem:[#allocation3 + $0xe30] sm:$0xff] }
 0x1a9   :  { %3907 = vmatpush2.bf16.msra.mxu0 %v5949_v54  ;;  %3948 = vmatpush2.bf16.msra.mxu1 %v6077_v55  ;;  %v6030_v51 = vcombine.high %v533_v42, %v537_v44  ;;  %v146_v54 = vld [vmem:[#allocation3 + $0x1f8] sm:$0xff]  ;;  %v6029_v60 = vcombine.low %v533_v42, %v537_v44  ;;  %v5616_v42 = vcombine.high %v118_v35, %v122_v36 }
 0x1aa   :  { %3908 = vmatprep.subr.bf16.mxu0 %v5942_v56  ;;  %3949 = vmatprep.subr.bf16.mxu1 %v6070_v58  ;;  %v270_v55 = vld [vmem:[#allocation3 + $0x5d8] sm:$0xff]  ;;  %v5901_v58 = vcombine.low %v405_v40, %v409_v41  ;;  %v5640_v61 = vcombine.high %v142_v53, %v146_v54 }
 0x1ab   :  { %v274_v56 = vld [vmem:[#allocation3 + $0x5f8] sm:$0xff] }
 0x1ac   :  { %v5768_v62 = vcombine.high %v270_v55, %v274_v56  ;;  %v5767_v6 = vcombine.low %v270_v55, %v274_v56  ;;  %v102_v56 = vld [vmem:[#allocation3 + $0x98] sm:$0xff] }
 0x1ad   :  { %3909 = vmatpush2.bf16.msra.mxu0 %v5941_v0  ;;  %3950 = vmatpush2.bf16.msra.mxu1 %v6069_v1  ;;  %v138_v0 = vld [vmem:[#allocation3 + $0x1b8] sm:$0xff] }
 0x1ae   :  { %3910 = vmatprep.subr.bf16.mxu0 %v5934_v3  ;;  %3951 = vmatprep.subr.bf16.mxu1 %v6062_v12  ;;  %v262_v1 = vld [vmem:[#allocation3 + $0x598] sm:$0xff]  ;;  %v5639_v12 = vcombine.low %v142_v53, %v146_v54  ;;  %v5632_v7 = vcombine.high %v134_v63, %v138_v0  ;;  %v5631_v26 = vcombine.low %v134_v63, %v138_v0 }
 0x1af   :  { %v266_v3 = vld [vmem:[#allocation3 + $0x5b8] sm:$0xff]  ;;  %v5615_v53 = vcombine.low %v118_v35, %v122_v36 }
 0x1b0   :  { %v5760_v9 = vcombine.high %v262_v1, %v266_v3  ;;  %v338_v35 = vld [vmem:[#allocation3 + $0x7f8] sm:$0xff] }
 0x1b1   :  { %3911 = vmatpush2.bf16.msra.mxu0 %v5933_v14  ;;  %3952 = vmatpush2.bf16.msra.mxu1 %v6061_v17  ;;  %v130_v14 = vld [vmem:[#allocation3 + $0x178] sm:$0xff] }
 0x1b2   :  { %3912 = vmatprep.subr.bf16.mxu0 %v5926_v18  ;;  %3953 = vmatprep.subr.bf16.mxu1 %v6054_v20  ;;  %v254_v18 = vld [vmem:[#allocation3 + $0x558] sm:$0xff]  ;;  %v5623_v40 = vcombine.low %v126_v11, %v130_v14 }
 0x1b3   :  { %v258_v20 = vld [vmem:[#allocation3 + $0x578] sm:$0xff] }
 0x1b4   :  { %v5752_v34 = vcombine.high %v254_v18, %v258_v20 }
 0x1b5   :  { %3913 = vmatpush2.bf16.msra.mxu0 %v5925_v43  ;;  %3954 = vmatpush2.bf16.msra.mxu1 %v6053_v30  ;;  %v5759_v43 = vcombine.low %v262_v1, %v266_v3  ;;  %v5624_v30 = vcombine.high %v126_v11, %v130_v14  ;;  %v94_v3 = vld [vmem:[#allocation3 + $0x58] sm:$0xff] }
 0x1b6   :  { %3914 = vmatprep.subr.bf16.mxu0 %v5918_v32  ;;  %3955 = vmatprep.subr.bf16.mxu1 %v6046_v33 }
 0x1b9   :  { %3915 = vmatpush2.bf16.msra.mxu0 %v5917_v37  ;;  %3956 = vmatpush2.bf16.msra.mxu1 %v6045_v38  ;;  %v246_v37 = vld [vmem:[#allocation3 + $0x518] sm:$0xff] }
 0x1ba   :  { %3916 = vmatprep.subr.bf16.mxu0 %v5910_v48  ;;  %3957 = vmatprep.subr.bf16.mxu1 %v6038_v39  ;;  %v250_v38 = vld [vmem:[#allocation3 + $0x538] sm:$0xff] }
 0x1bd   :  { %3917 = vmatpush2.bf16.msra.mxu0 %v5909_v45  ;;  %3958 = vmatpush2.bf16.msra.mxu1 %v6037_v49  ;;  %v5744_v45 = vcombine.high %v246_v37, %v250_v38  ;;  %v110_v49 = vld [vmem:[#allocation3 + $0xd8] sm:$0xff] }
 0x1be   :  { %3918 = vmatprep.subr.bf16.mxu0 %v5902_v50  ;;  %3959 = vmatprep.subr.bf16.mxu1 %v6030_v51  ;;  %v238_v50 = vld [vmem:[#allocation3 + $0x4d8] sm:$0xff] }
 0x1bf   :  { %v242_v51 = vld [vmem:[#allocation3 + $0x4f8] sm:$0xff] }
 0x1c0   :  { %v5736_v55 = vcombine.high %v238_v50, %v242_v51  ;;  %v5735_v63 = vcombine.low %v238_v50, %v242_v51  ;;  %v194_v50 = vld [vmem:[#allocation3 + $0x378] sm:$0xff] }
 0x1c1   :  { %3919 = vmatpush2.bf16.msra.mxu0 %v5901_v58  ;;  %3960 = vmatpush2.bf16.msra.mxu1 %v6029_v60  ;;  %v106_v58 = vld [vmem:[#allocation3 + $0xb8] sm:$0xff] }
 0x1c2   :  { %3970 = vmatprep.subr.bf16.mxu0 %v5640_v61  ;;  %4011 = vmatprep.subr.bf16.mxu1 %v5768_v62  ;;  %v230_v60 = vld [vmem:[#allocation3 + $0x498] sm:$0xff]  ;;  %v5600_v0 = vcombine.high %v102_v56, %v106_v58 }
 0x1c3   :  { %v234_v61 = vld [vmem:[#allocation3 + $0x4b8] sm:$0xff] }
 0x1c4   :  { %v3676_v17 = vpop.f32.mrf.mxu0  ;;  %3921 = vmatmul.mubr.bf16.vlgmr.msra.gmra.mxu0 %v6493_v21  ;;  %v3717_v25 = vpop.f32.mrf.mxu1  ;;  %3962 = vmatmul.mubr.bf16.vlgmr.msra.gmra.mxu1 %v6497_v31  ;;  %v5728_v1 = vcombine.high %v230_v60, %v234_v61  ;;  %v5727_v11 = vcombine.low %v230_v60, %v234_v61  ;;  %v318_v51 = vld [vmem:[#allocation3 + $0x758] sm:$0xff] }
 0x1c5   :  { %v3677_v24 = vadd.f32 %v3676_v17, %v6505_v46  ;;  %3971 = vmatpush1.bf16.msra.mxu0 %v5639_v12  ;;  %4012 = vmatpush1.bf16.msra.mxu1 %v5767_v6  ;;  %v98_v12 = vld [vmem:[#allocation3 + $0x78] sm:$0xff] }
 0x1c6   :  { %v3678_v29 = vpop.f32.mrf.mxu0  ;;  %3972 = vmatprep.subr.bf16.mxu0 %v5632_v7  ;;  %v3719_v23 = vpop.f32.mrf.mxu1  ;;  %4013 = vmatprep.subr.bf16.mxu1 %v5760_v9  ;;  %v222_v6 = vld [vmem:[#allocation3 + $0x458] sm:$0xff]  ;;  %v5599_v9 = vcombine.low %v102_v56, %v106_v58  ;;  %v5592_v14 = vcombine.high %v94_v3, %v98_v12 }
 0x1c7   :  { %v6546_v32 = vadd.f32 %v3717_v25, %v3677_v24  ;;  %v3679_v33 = vadd.f32 %v3678_v29, %v6509_v52  ;;  %4002 = vmatprep.mubr.bf16.mxu0 %v6457_v22  ;;  %4043 = vmatprep.mubr.bf16.mxu1 %v6462_v28  ;;  %v5751_v52 = vcombine.low %v254_v18, %v258_v20  ;;  %v114_v22 = vld [vmem:[#allocation3 + $0xf8] sm:$0xff] }
 0x1c8   :  { %v3680_v46 = vpop.f32.mrf.mxu0  ;;  %v3721_v39 = vpop.f32.mrf.mxu1  ;;  %v5743_v28 = vcombine.low %v246_v37, %v250_v38  ;;  %v5608_v54 = vcombine.high %v110_v49, %v114_v22  ;;  %v5607_v62 = vcombine.low %v110_v49, %v114_v22  ;;  %v226_v7 = vld [vmem:[#allocation3 + $0x478] sm:$0xff] }
 0x1c9   :  { %v6551_v48 = vadd.f32 %v3719_v23, %v3679_v33  ;;  %3973 = vmatpush1.bf16.msra.mxu0 %v5631_v26  ;;  %4014 = vmatpush1.bf16.msra.mxu1 %v5759_v43  ;;  %v5720_v17 = vcombine.high %v222_v6, %v226_v7  ;;  %v86_v18 = vld [vmem:[#allocation3 + $0x18] sm:$0xff]  ;;  %v5591_v26 = vcombine.low %v94_v3, %v98_v12 }
 0x1ca   :  { %v3681_v41 = vpop.f32.mrf.mxu0  ;;  %3974 = vmatprep.subr.bf16.mxu0 %v5624_v30  ;;  %v3722_v44 = vpop.f32.mrf.mxu1  ;;  %4015 = vmatprep.subr.bf16.mxu1 %v5752_v34  ;;  %v90_v20 = vld [vmem:[#allocation3 + $0x38] sm:$0xff]  ;;  %v5719_v29 = vcombine.low %v222_v6, %v226_v7 }
 0x1cb   :  { %v214_v24 = vld [vmem:[#allocation3 + $0x418] sm:$0xff]  ;;  %v5584_v43 = vcombine.high %v86_v18, %v90_v20  ;;  %v5583_v36 = vcombine.low %v86_v18, %v90_v20 }
 0x1cc   :  { %v218_v25 = vld [vmem:[#allocation3 + $0x438] sm:$0xff] }
 0x1cd   :  { %3975 = vmatpush1.bf16.msra.mxu0 %v5623_v40  ;;  %4016 = vmatpush1.bf16.msra.mxu1 %v5751_v52  ;;  %v5712_v30 = vcombine.high %v214_v24, %v218_v25  ;;  %v206_v33 = vld [vmem:[#allocation3 + $0x3d8] sm:$0xff]  ;;  %v5711_v46 = vcombine.low %v214_v24, %v218_v25 }
 0x1ce   :  { %3976 = vmatprep.subr.bf16.mxu0 %v5616_v42  ;;  %4017 = vmatprep.subr.bf16.mxu1 %v5744_v45  ;;  %v210_v23 = vld [vmem:[#allocation3 + $0x3f8] sm:$0xff] }
 0x1cf   :  { %v334_v34 = vld [vmem:[#allocation3 + $0x7d8] sm:$0xff]  ;;  %v5704_v37 = vcombine.high %v206_v33, %v210_v23  ;;  %v5703_v42 = vcombine.low %v206_v33, %v210_v23 }
 0x1d0   :  { %v5832_v38 = vcombine.high %v334_v34, %v338_v35  ;;  %v198_v39 = vld [vmem:[#allocation3 + $0x398] sm:$0xff]  ;;  %v5831_v44 = vcombine.low %v334_v34, %v338_v35 }
 0x1d1   :  { %3977 = vmatpush1.bf16.msra.mxu0 %v5615_v53  ;;  %4018 = vmatpush1.bf16.msra.mxu1 %v5743_v28  ;;  %v202_v40 = vld [vmem:[#allocation3 + $0x3b8] sm:$0xff] }
 0x1d2   :  { %3978 = vmatprep.subr.bf16.mxu0 %v5608_v54  ;;  %4019 = vmatprep.subr.bf16.mxu1 %v5736_v55  ;;  %v326_v41 = vld [vmem:[#allocation3 + $0x798] sm:$0xff]  ;;  %v5696_v45 = vcombine.high %v198_v39, %v202_v40  ;;  %v5695_v28 = vcombine.low %v198_v39, %v202_v40 }
 0x1d3   :  { %v330_v52 = vld [vmem:[#allocation3 + $0x7b8] sm:$0xff] }
 0x1d4   :  { %v5824_v49 = vcombine.high %v326_v41, %v330_v52  ;;  %v190_v22 = vld [vmem:[#allocation3 + $0x358] sm:$0xff]  ;;  %v5823_v54 = vcombine.low %v326_v41, %v330_v52 }
 0x1d5   :  { %3979 = vmatpush1.bf16.msra.mxu0 %v5607_v62  ;;  %4020 = vmatpush1.bf16.msra.mxu1 %v5735_v63  ;;  %v322_v53 = vld [vmem:[#allocation3 + $0x778] sm:$0xff]  ;;  %v5688_v55 = vcombine.high %v190_v22, %v194_v50  ;;  %v5687_v63 = vcombine.low %v190_v22, %v194_v50 }
 0x1d6   :  { %3980 = vmatprep.subr.bf16.mxu0 %v5600_v0  ;;  %4021 = vmatprep.subr.bf16.mxu1 %v5728_v1  ;;  %v5816_v56 = vcombine.high %v318_v51, %v322_v53  ;;  %v182_v58 = vld [vmem:[#allocation3 + $0x318] sm:$0xff]  ;;  %v5815_v0 = vcombine.low %v318_v51, %v322_v53 }
 0x1d7   :  { %v186_v60 = vld [vmem:[#allocation3 + $0x338] sm:$0xff] }
 0x1d8   :  { %v310_v61 = vld [vmem:[#allocation3 + $0x718] sm:$0xff]  ;;  %v5680_v1 = vcombine.high %v182_v58, %v186_v60 }
 0x1d9   :  { %3981 = vmatpush1.bf16.msra.mxu0 %v5599_v9  ;;  %4022 = vmatpush1.bf16.msra.mxu1 %v5727_v11  ;;  %v314_v62 = vld [vmem:[#allocation3 + $0x738] sm:$0xff]  ;;  %v5679_v11 = vcombine.low %v182_v58, %v186_v60 }
 0x1da   :  { %3982 = vmatprep.subr.bf16.mxu0 %v5592_v14  ;;  %4023 = vmatprep.subr.bf16.mxu1 %v5720_v17  ;;  %v5808_v3 = vcombine.high %v310_v61, %v314_v62  ;;  %v174_v12 = vld [vmem:[#allocation3 + $0x2d8] sm:$0xff]  ;;  %v5807_v14 = vcombine.low %v310_v61, %v314_v62 }
 0x1db   :  { %v178_v6 = vld [vmem:[#allocation3 + $0x2f8] sm:$0xff] }
 0x1dc   :  { %v302_v7 = vld [vmem:[#allocation3 + $0x6d8] sm:$0xff]  ;;  %v5672_v17 = vcombine.high %v174_v12, %v178_v6 }
 0x1dd   :  { %3983 = vmatpush1.bf16.msra.mxu0 %v5591_v26  ;;  %4024 = vmatpush1.bf16.msra.mxu1 %v5719_v29  ;;  %v306_v9 = vld [vmem:[#allocation3 + $0x6f8] sm:$0xff]  ;;  %v5671_v29 = vcombine.low %v174_v12, %v178_v6 }
 0x1de   :  { %3984 = vmatprep.subr.bf16.mxu0 %v5584_v43  ;;  %4025 = vmatprep.subr.bf16.mxu1 %v5712_v30  ;;  %v5800_v18 = vcombine.high %v302_v7, %v306_v9  ;;  %v166_v20 = vld [vmem:[#allocation3 + $0x298] sm:$0xff]  ;;  %v5799_v43 = vcombine.low %v302_v7, %v306_v9 }
 0x1df   :  { %v170_v24 = vld [vmem:[#allocation3 + $0x2b8] sm:$0xff] }
 0x1e0   :  { %v294_v25 = vld [vmem:[#allocation3 + $0x698] sm:$0xff]  ;;  %v5664_v30 = vcombine.high %v166_v20, %v170_v24 }
 0x1e1   :  { %3985 = vmatpush1.bf16.msra.mxu0 %v5583_v36  ;;  %4026 = vmatpush1.bf16.msra.mxu1 %v5711_v46  ;;  %v298_v26 = vld [vmem:[#allocation3 + $0x6b8] sm:$0xff]  ;;  %v5663_v46 = vcombine.low %v166_v20, %v170_v24 }
 0x1e2   :  { %3986 = vmatprep.subr.bf16.mxu0 %v5704_v37  ;;  %4027 = vmatprep.subr.bf16.mxu1 %v5832_v38  ;;  %v5792_v33 = vcombine.high %v294_v25, %v298_v26  ;;  %v158_v23 = vld [vmem:[#allocation3 + $0x258] sm:$0xff]  ;;  %v5791_v37 = vcombine.low %v294_v25, %v298_v26 }
 0x1e3   :  { %v162_v34 = vld [vmem:[#allocation3 + $0x278] sm:$0xff] }
 0x1e4   :  { %v286_v35 = vld [vmem:[#allocation3 + $0x658] sm:$0xff]  ;;  %v5656_v38 = vcombine.high %v158_v23, %v162_v34 }
 0x1e5   :  { %3987 = vmatpush2.bf16.msra.mxu0 %v5703_v42  ;;  %4028 = vmatpush2.bf16.msra.mxu1 %v5831_v44  ;;  %v290_v36 = vld [vmem:[#allocation3 + $0x678] sm:$0xff]  ;;  %v5655_v44 = vcombine.low %v158_v23, %v162_v34 }
 0x1e6   :  { %3988 = vmatprep.subr.bf16.mxu0 %v5696_v45  ;;  %4029 = vmatprep.subr.bf16.mxu1 %v5824_v49  ;;  %v5784_v39 = vcombine.high %v286_v35, %v290_v36  ;;  %v150_v40 = vld [vmem:[#allocation3 + $0x218] sm:$0xff]  ;;  %v5783_v45 = vcombine.low %v286_v35, %v290_v36 }
 0x1e7   :  { %v154_v41 = vld [vmem:[#allocation3 + $0x238] sm:$0xff] }
 0x1e8   :  { %v278_v52 = vld [vmem:[#allocation3 + $0x618] sm:$0xff]  ;;  %v5648_v49 = vcombine.high %v150_v40, %v154_v41 }
 0x1e9   :  { %3989 = vmatpush2.bf16.msra.mxu0 %v5695_v28  ;;  %4030 = vmatpush2.bf16.msra.mxu1 %v5823_v54  ;;  %v282_v42 = vld [vmem:[#allocation3 + $0x638] sm:$0xff]  ;;  %v5647_v54 = vcombine.low %v150_v40, %v154_v41 }
 0x1ea   :  { %3990 = vmatprep.subr.bf16.mxu0 %v5688_v55  ;;  %4031 = vmatprep.subr.bf16.mxu1 %v5816_v56  ;;  %v5776_v22 = vcombine.high %v278_v52, %v282_v42  ;;  %v398_v50 = vld [vmem:[#allocation3 + $0x9d8] sm:$0xff]  ;;  %v5775_v55 = vcombine.low %v278_v52, %v282_v42 }
 0x1eb   :  { %v402_v51 = vld [vmem:[#allocation3 + $0x9f8] sm:$0xff] }
 0x1ec   :  { %v526_v53 = vld [vmem:[#allocation3 + $0xdd8] sm:$0xff]  ;;  %v5896_v56 = vcombine.high %v398_v50, %v402_v51 }
 0x1ed   :  { %3991 = vmatpush2.bf16.msra.mxu0 %v5687_v63  ;;  %4032 = vmatpush2.bf16.msra.mxu1 %v5815_v0  ;;  %v530_v28 = vld [vmem:[#allocation3 + $0xdf8] sm:$0xff]  ;;  %v5895_v0 = vcombine.low %v398_v50, %v402_v51 }
 0x1ee   :  { %3992 = vmatprep.subr.bf16.mxu0 %v5680_v1  ;;  %4033 = vmatprep.subr.bf16.mxu1 %v5808_v3  ;;  %v6024_v58 = vcombine.high %v526_v53, %v530_v28  ;;  %v390_v60 = vld [vmem:[#allocation3 + $0x998] sm:$0xff]  ;;  %v6023_v1 = vcombine.low %v526_v53, %v530_v28 }
 0x1ef   :  { %v394_v61 = vld [vmem:[#allocation3 + $0x9b8] sm:$0xff] }
 0x1f0   :  { %v518_v62 = vld [vmem:[#allocation3 + $0xd98] sm:$0xff]  ;;  %v5888_v3 = vcombine.high %v390_v60, %v394_v61 }
 0x1f1   :  { %3993 = vmatpush2.bf16.msra.mxu0 %v5679_v11  ;;  %4034 = vmatpush2.bf16.msra.mxu1 %v5807_v14  ;;  %v522_v63 = vld [vmem:[#allocation3 + $0xdb8] sm:$0xff] }
 0x1f2   :  { %3994 = vmatprep.subr.bf16.mxu0 %v5672_v17  ;;  %4035 = vmatprep.subr.bf16.mxu1 %v5800_v18  ;;  %v6016_v12 = vcombine.high %v518_v62, %v522_v63  ;;  %v382_v6 = vld [vmem:[#allocation3 + $0x958] sm:$0xff]  ;;  %v5887_v18 = vcombine.low %v390_v60, %v394_v61  ;;  %v6015_v24 = vcombine.low %v518_v62, %v522_v63 }
 0x1f3   :  { %v386_v7 = vld [vmem:[#allocation3 + $0x978] sm:$0xff] }
 0x1f4   :  { %v510_v11 = vld [vmem:[#allocation3 + $0xd58] sm:$0xff]  ;;  %v5880_v25 = vcombine.high %v382_v6, %v386_v7  ;;  %v5879_v34 = vcombine.low %v382_v6, %v386_v7 }
 0x1f5   :  { %3995 = vmatpush2.bf16.msra.mxu0 %v5671_v29  ;;  %4036 = vmatpush2.bf16.msra.mxu1 %v5799_v43  ;;  %v514_v14 = vld [vmem:[#allocation3 + $0xd78] sm:$0xff] }
 0x1f6   :  { %3996 = vmatprep.subr.bf16.mxu0 %v5664_v30  ;;  %4037 = vmatprep.subr.bf16.mxu1 %v5792_v33  ;;  %v6008_v29 = vcombine.high %v510_v11, %v514_v14  ;;  %v374_v43 = vld [vmem:[#allocation3 + $0x918] sm:$0xff]  ;;  %v6007_v36 = vcombine.low %v510_v11, %v514_v14 }
 0x1f7   :  { %v502_v33 = vld [vmem:[#allocation3 + $0xd18] sm:$0xff] }
 0x1f8   :  { %v506_v23 = vld [vmem:[#allocation3 + $0xd38] sm:$0xff] }
 0x1f9   :  { %3997 = vmatpush2.bf16.msra.mxu0 %v5663_v46  ;;  %4038 = vmatpush2.bf16.msra.mxu1 %v5791_v37  ;;  %v370_v40 = vld [vmem:[#allocation3 + $0x8f8] sm:$0xff] }
 0x1fa   :  { %3998 = vmatprep.subr.bf16.mxu0 %v5656_v38  ;;  %4039 = vmatprep.subr.bf16.mxu1 %v5784_v39  ;;  %v6000_v38 = vcombine.high %v502_v33, %v506_v23  ;;  %v366_v39 = vld [vmem:[#allocation3 + $0x8d8] sm:$0xff] }
 0x1fb   :  { %v494_v41 = vld [vmem:[#allocation3 + $0xcd8] sm:$0xff]  ;;  %v5864_v42 = vcombine.high %v366_v39, %v370_v40  ;;  %v5863_v51 = vcombine.low %v366_v39, %v370_v40 }
 0x1fc   :  { %v490_v50 = vld [vmem:[#allocation3 + $0xcb8] sm:$0xff] }
 0x1fd   :  { %3999 = vmatpush2.bf16.msra.mxu0 %v5655_v44  ;;  %4040 = vmatpush2.bf16.msra.mxu1 %v5783_v45  ;;  %v358_v45 = vld [vmem:[#allocation3 + $0x898] sm:$0xff] }
 0x1fe   :  { %4000 = vmatprep.subr.bf16.mxu0 %v5648_v49  ;;  %4041 = vmatprep.subr.bf16.mxu1 %v5776_v22  ;;  %v362_v49 = vld [vmem:[#allocation3 + $0x8b8] sm:$0xff] }
 0x1ff   :  { %v486_v22 = vld [vmem:[#allocation3 + $0xc98] sm:$0xff]  ;;  %v5856_v28 = vcombine.high %v358_v45, %v362_v49  ;;  %v5855_v61 = vcombine.low %v358_v45, %v362_v49 }
 0x200   :  { %v482_v60 = vld [vmem:[#allocation3 + $0xc78] sm:$0xff]  ;;  %v5983_v62 = vcombine.low %v486_v22, %v490_v50 }
 0x201   :  { %4001 = vmatpush2.bf16.msra.mxu0 %v5647_v54  ;;  %4042 = vmatpush2.bf16.msra.mxu1 %v5775_v55  ;;  %v5984_v54 = vcombine.high %v486_v22, %v490_v50  ;;  %v350_v55 = vld [vmem:[#allocation3 + $0x858] sm:$0xff] }
 0x202   :  { %4052 = vmatprep.subr.bf16.mxu0 %v5896_v56  ;;  %4093 = vmatprep.subr.bf16.mxu1 %v6024_v58  ;;  %v354_v56 = vld [vmem:[#allocation3 + $0x878] sm:$0xff] }
 0x203   :  { %v478_v58 = vld [vmem:[#allocation3 + $0xc58] sm:$0xff]  ;;  %v5848_v63 = vcombine.high %v350_v55, %v354_v56  ;;  %v5847_v7 = vcombine.low %v350_v55, %v354_v56 }
 0x204   :  { %v6553_v9 = vpop.f32.mrf.mxu0  ;;  %4003 = vmatmul.mubr.bf16.vlgmr.msra.gmra.mxu0 %v6474_v59  ;;  %v6556_v17 = vpop.f32.mrf.mxu1  ;;  %4044 = vmatmul.mubr.bf16.vlgmr.msra.gmra.mxu1 %v6481_v5  ;;  %v378_v59 = vld [vmem:[#allocation3 + $0x938] sm:$0xff]  ;;  %v5975_v11 = vcombine.low %v478_v58, %v482_v60 }
 0x205   :  { %4053 = vmatpush1.bf16.msra.mxu0 %v5895_v0  ;;  %4094 = vmatpush1.bf16.msra.mxu1 %v6023_v1  ;;  %v5872_v46 = vcombine.high %v374_v43, %v378_v59  ;;  %v5871_v52 = vcombine.low %v374_v43, %v378_v59  ;;  %v5976_v0 = vcombine.high %v478_v58, %v482_v60  ;;  %v342_v1 = vld [vmem:[#allocation3 + $0x818] sm:$0xff] }
 0x206   :  { %v6559_v20 = vpop.f32.mrf.mxu0  ;;  %4054 = vmatprep.subr.bf16.mxu0 %v5888_v3  ;;  %v6561_v26 = vpop.f32.mrf.mxu1  ;;  %4095 = vmatprep.subr.bf16.mxu1 %v6016_v12  ;;  %v346_v3 = vld [vmem:[#allocation3 + $0x838] sm:$0xff] }
 0x207   :  { %4084 = vmatprep.mubr.bf16.mxu0 %v6477_v4  ;;  %4125 = vmatprep.mubr.bf16.mxu1 %v6486_v15  ;;  %v498_v4 = vld [vmem:[#allocation3 + $0xcf8] sm:$0xff]  ;;  %v5999_v15 = vcombine.low %v502_v33, %v506_v23  ;;  %v5840_v14 = vcombine.high %v342_v1, %v346_v3  ;;  %v5839_v59 = vcombine.low %v342_v1, %v346_v3 }
 0x208   :  { %v3762_v30 = vpop.f32.mrf.mxu0  ;;  %v3803_v5 = vpop.f32.mrf.mxu1  ;;  %v5992_v44 = vcombine.high %v494_v41, %v498_v4  ;;  %v5991_v53 = vcombine.low %v494_v41, %v498_v4  ;;  %v470_v12 = vld [vmem:[#allocation3 + $0xc18] sm:$0xff] }
 0x209   :  { %4055 = vmatpush1.bf16.msra.mxu0 %v5887_v18  ;;  %4096 = vmatpush1.bf16.msra.mxu1 %v6015_v24  ;;  %v474_v6 = vld [vmem:[#allocation3 + $0xc38] sm:$0xff] }
 0x20a   :  { %v3763_v35 = vpop.f32.mrf.mxu0  ;;  %4056 = vmatprep.subr.bf16.mxu0 %v5880_v25  ;;  %v3804_v37 = vpop.f32.mrf.mxu1  ;;  %4097 = vmatprep.subr.bf16.mxu1 %v6008_v29  ;;  %v5968_v18 = vcombine.high %v470_v12, %v474_v6  ;;  %v462_v24 = vld [vmem:[#allocation3 + $0xbd8] sm:$0xff]  ;;  %v5967_v30 = vcombine.low %v470_v12, %v474_v6 }
 0x20b   :  { %v466_v25 = vld [vmem:[#allocation3 + $0xbf8] sm:$0xff] }
 0x20c   :  { %v590_v29 = vld [vmem:[#allocation3 + $0xfd8] sm:$0xff]  ;;  %v5960_v33 = vcombine.high %v462_v24, %v466_v25 }
 0x20d   :  { %4057 = vmatpush1.bf16.msra.mxu0 %v5879_v34  ;;  %4098 = vmatpush1.bf16.msra.mxu1 %v6007_v36  ;;  %v594_v43 = vld [vmem:[#allocation3 + $0xff8] sm:$0xff] }
 0x20e   :  { %4058 = vmatprep.subr.bf16.mxu0 %v5872_v46  ;;  %4099 = vmatprep.subr.bf16.mxu1 %v6000_v38  ;;  %v6088_v23 = vcombine.high %v590_v29, %v594_v43  ;;  %v454_v5 = vld [vmem:[#allocation3 + $0xb98] sm:$0xff]  ;;  %v5959_v46 = vcombine.low %v462_v24, %v466_v25  ;;  %v6087_v37 = vcombine.low %v590_v29, %v594_v43 }
 0x20f   :  { %v458_v34 = vld [vmem:[#allocation3 + $0xbb8] sm:$0xff] }
 0x210   :  { %v582_v35 = vld [vmem:[#allocation3 + $0xf98] sm:$0xff]  ;;  %v5952_v38 = vcombine.high %v454_v5, %v458_v34 }
 0x211   :  { %4059 = vmatpush1.bf16.msra.mxu0 %v5871_v52  ;;  %4100 = vmatpush1.bf16.msra.mxu1 %v5999_v15  ;;  %v586_v36 = vld [vmem:[#allocation3 + $0xfb8] sm:$0xff]  ;;  %v5951_v15 = vcombine.low %v454_v5, %v458_v34 }
 0x212   :  { %4060 = vmatprep.subr.bf16.mxu0 %v5864_v42  ;;  %4101 = vmatprep.subr.bf16.mxu1 %v5992_v44  ;;  %v6080_v39 = vcombine.high %v582_v35, %v586_v36  ;;  %v446_v40 = vld [vmem:[#allocation3 + $0xb58] sm:$0xff]  ;;  %v6079_v42 = vcombine.low %v582_v35, %v586_v36 }
 0x213   :  { %v450_v41 = vld [vmem:[#allocation3 + $0xb78] sm:$0xff] }
 0x214   :  { %v574_v4 = vld [vmem:[#allocation3 + $0xf58] sm:$0xff]  ;;  %v5944_v44 = vcombine.high %v446_v40, %v450_v41 }
 0x215   :  { %4061 = vmatpush1.bf16.msra.mxu0 %v5863_v51  ;;  %4102 = vmatpush1.bf16.msra.mxu1 %v5991_v53  ;;  %v578_v52 = vld [vmem:[#allocation3 + $0xf78] sm:$0xff]  ;;  %v5943_v53 = vcombine.low %v446_v40, %v450_v41  ;;  %v3761_v41 = vadd.f32 %v6559_v20, %v6551_v48 }
 0x216   :  { %4062 = vmatprep.subr.bf16.mxu0 %v5856_v28  ;;  %4103 = vmatprep.subr.bf16.mxu1 %v5984_v54  ;;  %v6072_v45 = vcombine.high %v574_v4, %v578_v52  ;;  %v438_v49 = vld [vmem:[#allocation3 + $0xb18] sm:$0xff]  ;;  %v6071_v28 = vcombine.low %v574_v4, %v578_v52 }
 0x217   :  { %v442_v22 = vld [vmem:[#allocation3 + $0xb38] sm:$0xff] }
 0x218   :  { %v566_v50 = vld [vmem:[#allocation3 + $0xf18] sm:$0xff]  ;;  %v5936_v54 = vcombine.high %v438_v49, %v442_v22 }
 0x219   :  { %4063 = vmatpush1.bf16.msra.mxu0 %v5855_v61  ;;  %4104 = vmatpush1.bf16.msra.mxu1 %v5983_v62  ;;  %v570_v51 = vld [vmem:[#allocation3 + $0xf38] sm:$0xff]  ;;  %v5935_v62 = vcombine.low %v438_v49, %v442_v22  ;;  %v6373_v22 = vmov 1.0  }
 0x21a   :  { %4064 = vmatprep.subr.bf16.mxu0 %v5848_v63  ;;  %4105 = vmatprep.subr.bf16.mxu1 %v5976_v0  ;;  %v6064_v55 = vcombine.high %v566_v50, %v570_v51  ;;  %v430_v56 = vld [vmem:[#allocation3 + $0xad8] sm:$0xff]  ;;  %v6063_v63 = vcombine.low %v566_v50, %v570_v51 }
 0x21b   :  { %v434_v58 = vld [vmem:[#allocation3 + $0xaf8] sm:$0xff] }
 0x21c   :  { %v558_v60 = vld [vmem:[#allocation3 + $0xed8] sm:$0xff]  ;;  %v5928_v0 = vcombine.high %v430_v56, %v434_v58 }
 0x21d   :  { %4065 = vmatpush1.bf16.msra.mxu0 %v5847_v7  ;;  %4106 = vmatpush1.bf16.msra.mxu1 %v5975_v11  ;;  %v562_v61 = vld [vmem:[#allocation3 + $0xef8] sm:$0xff]  ;;  %v5927_v11 = vcombine.low %v430_v56, %v434_v58 }
 0x21e   :  { %4066 = vmatprep.subr.bf16.mxu0 %v5840_v14  ;;  %4107 = vmatprep.subr.bf16.mxu1 %v5968_v18  ;;  %v6056_v1 = vcombine.high %v558_v60, %v562_v61  ;;  %v422_v3 = vld [vmem:[#allocation3 + $0xa98] sm:$0xff]  ;;  %v6055_v14 = vcombine.low %v558_v60, %v562_v61 }
 0x21f   :  { %v426_v12 = vld [vmem:[#allocation3 + $0xab8] sm:$0xff] }
 0x220   :  { %v550_v6 = vld [vmem:[#allocation3 + $0xe98] sm:$0xff]  ;;  %v5920_v18 = vcombine.high %v422_v3, %v426_v12 }
 0x221   :  { %4067 = vmatpush1.bf16.msra.mxu0 %v5839_v59  ;;  %4108 = vmatpush1.bf16.msra.mxu1 %v5967_v30  ;;  %v554_v7 = vld [vmem:[#allocation3 + $0xeb8] sm:$0xff]  ;;  %v5919_v30 = vcombine.low %v422_v3, %v426_v12 }
 0x222   :  { %4068 = vmatprep.subr.bf16.mxu0 %v5960_v33  ;;  %4109 = vmatprep.subr.bf16.mxu1 %v6088_v23  ;;  %v6048_v24 = vcombine.high %v550_v6, %v554_v7  ;;  %v414_v25 = vld [vmem:[#allocation3 + $0xa58] sm:$0xff]  ;;  %v6047_v33 = vcombine.low %v550_v6, %v554_v7 }
 0x223   :  { %v418_v29 = vld [vmem:[#allocation3 + $0xa78] sm:$0xff] }
 0x224   :  { %v542_v43 = vld [vmem:[#allocation3 + $0xe58] sm:$0xff]  ;;  %v5912_v23 = vcombine.high %v414_v25, %v418_v29 }
 0x225   :  { %4069 = vmatpush2.bf16.msra.mxu0 %v5959_v46  ;;  %4110 = vmatpush2.bf16.msra.mxu1 %v6087_v37  ;;  %v546_v59 = vld [vmem:[#allocation3 + $0xe78] sm:$0xff]  ;;  %v5911_v37 = vcombine.low %v414_v25, %v418_v29 }
 0x226   :  { %4070 = vmatprep.subr.bf16.mxu0 %v5952_v38  ;;  %4111 = vmatprep.subr.bf16.mxu1 %v6080_v39  ;;  %v6040_v5 = vcombine.high %v542_v43, %v546_v59  ;;  %v406_v34 = vld [vmem:[#allocation3 + $0xa18] sm:$0xff]  ;;  %v6039_v38 = vcombine.low %v542_v43, %v546_v59 }
 0x227   :  { %v410_v35 = vld [vmem:[#allocation3 + $0xa38] sm:$0xff] }
 0x228   :  { %v534_v36 = vld [vmem:[#allocation3 + $0xe18] sm:$0xff]  ;;  %v5904_v39 = vcombine.high %v406_v34, %v410_v35  ;;  %v5903_v4 = vcombine.low %v406_v34, %v410_v35 }
 0x229   :  { %4071 = vmatpush2.bf16.msra.mxu0 %v5951_v15  ;;  %4112 = vmatpush2.bf16.msra.mxu1 %v6079_v42  ;;  %v538_v46 = vld [vmem:[#allocation3 + $0xe38] sm:$0xff]  ;;  %v3759_v15 = vadd.f32 %v6553_v9, %v6546_v32  ;;  %v6570_v42 = vadd.f32 %v6561_v26, %v3761_v41  ;;  %v6372_v9 = vmov 0.0  }
 0x22a   :  { %4072 = vmatprep.subr.bf16.mxu0 %v5944_v44  ;;  %4113 = vmatprep.subr.bf16.mxu1 %v6072_v45  ;;  %v6032_v40 = vcombine.high %v534_v36, %v538_v46  ;;  %v6031_v52 = vcombine.low %v534_v36, %v538_v46 }
 0x22b   :  { %v6577_v48 = vadd.f32 %v6556_v17, %v3759_v15 }
 0x22d   :  { %4073 = vmatpush2.bf16.msra.mxu0 %v5943_v53  ;;  %4114 = vmatpush2.bf16.msra.mxu1 %v6071_v28 }
 0x22e   :  { %4074 = vmatprep.subr.bf16.mxu0 %v5936_v54  ;;  %4115 = vmatprep.subr.bf16.mxu1 %v6064_v55 }
 0x231   :  { %4075 = vmatpush2.bf16.msra.mxu0 %v5935_v62  ;;  %4116 = vmatpush2.bf16.msra.mxu1 %v6063_v63 }
 0x232   :  { %4076 = vmatprep.subr.bf16.mxu0 %v5928_v0  ;;  %4117 = vmatprep.subr.bf16.mxu1 %v6056_v1 }
 0x235   :  { %4077 = vmatpush2.bf16.msra.mxu0 %v5927_v11  ;;  %4118 = vmatpush2.bf16.msra.mxu1 %v6055_v14 }
 0x236   :  { %4078 = vmatprep.subr.bf16.mxu0 %v5920_v18  ;;  %4119 = vmatprep.subr.bf16.mxu1 %v6048_v24 }
 0x239   :  { %4079 = vmatpush2.bf16.msra.mxu0 %v5919_v30  ;;  %4120 = vmatpush2.bf16.msra.mxu1 %v6047_v33 }
 0x23a   :  { %4080 = vmatprep.subr.bf16.mxu0 %v5912_v23  ;;  %4121 = vmatprep.subr.bf16.mxu1 %v6040_v5 }
 0x23d   :  { %4081 = vmatpush2.bf16.msra.mxu0 %v5911_v37  ;;  %4122 = vmatpush2.bf16.msra.mxu1 %v6039_v38 }
 0x23e   :  { %4082 = vmatprep.subr.bf16.mxu0 %v5904_v39  ;;  %4123 = vmatprep.subr.bf16.mxu1 %v6032_v40 }
 0x241   :  { %4083 = vmatpush2.bf16.msra.mxu0 %v5903_v4  ;;  %4124 = vmatpush2.bf16.msra.mxu1 %v6031_v52 }
 0x242   :  { %6089 = vmatprep.subr.msk.mxu0 %vm4138_vm1, %v6541_v10  ;;  %6092 = vmatprep.subr.msk.mxu1 %vm4138_vm1, %v6570_v42 }
 0x244   :  { %v3840_v20 = vpop.f32.mrf.mxu0  ;;  %4085 = vmatmul.mubr.bf16.vlgmr.msra.gmra.mxu0 %v6493_v21  ;;  %v3881_v44 = vpop.f32.mrf.mxu1  ;;  %4126 = vmatmul.mubr.bf16.vlgmr.msra.gmra.mxu1 %v6497_v31 }
 0x245   :  { %6090 = vmatpush1.msk.msra.mxu0 %vm4138_vm1, %v6536_v27  ;;  %6093 = vmatpush1.msk.msra.mxu1 %vm4138_vm1, %v6577_v48  ;;  %v3841_v31 = vadd.f32 %v3840_v20, %v6511_v8 }
 0x246   :  { %v3842_v32 = vpop.f32.mrf.mxu0  ;;  %4227 = vmatprep.mubr.f32.mxu0 %v6372_v9  ;;  %v3883_v26 = vpop.f32.mrf.mxu1  ;;  %4298 = vmatprep.mubr.f32.mxu1 %v6372_v9 }
 0x247   :  { %v3843_v50 = vadd.f32 %v3842_v32, %v6517_v16  ;;  %v3882_v51 = vadd.f32 %v3881_v44, %v3841_v31 }
 0x248   :  { %v3844_v17 = vpop.f32.mrf.mxu0  ;;  %v3885_v45 = vpop.f32.mrf.mxu1 }
 0x249   :  { %v3884_v28 = vadd.f32 %v3883_v26, %v3843_v50  ;;  %v6628_v45 = vand.u32 127, %v865_v47 }
 0x24a   :  { %v3845_v21 = vpop.f32.mrf.mxu0  ;;  %v3886_v49 = vpop.f32.mrf.mxu1 }
 0x24b   :  { %vm4465_vm3 = vcmp.lt.s32.totalorder %v6628_v45, 64 }
 0x24c   :  { %6091 = vmatmul.mubr.msk.f32.vlgmr.msra.gmra.mxu0 %vm4134_vm2, %v6373_v22  ;;  %6094 = vmatmul.mubr.msk.f32.vlgmr.msra.gmra.mxu1 %vm4134_vm2, %v6373_v22 }
 0x24d   :  { %4369 = vmatprep.mubr.f32.mxu0 %v6372_v9  ;;  %4440 = vmatprep.mubr.f32.mxu1 %v6372_v9 }
 0x284   :  { %v3922_v53 = vpop.f32.mrf.mxu0  ;;  %v3963_v54 = vpop.f32.mrf.mxu1 }
 0x285   :  { %v3923_v55 = vadd.f32 %v3922_v53, %v3882_v51 }
 0x286   :  { %v3924_v56 = vpop.f32.mrf.mxu0  ;;  %v3965_v60 = vpop.f32.mrf.mxu1 }
 0x287   :  { %v3925_v58 = vadd.f32 %v3924_v56, %v3884_v28  ;;  %v6597_v0 = vadd.f32 %v3963_v54, %v3923_v55 }
 0x288   :  { %v3926_v61 = vpop.f32.mrf.mxu0  ;;  %v3967_v63 = vpop.f32.mrf.mxu1 }
 0x289   :  { %v6595_v62 = vadd.f32 %v3965_v60, %v3925_v58 }
 0x28a   :  { %v3927_v1 = vpop.f32.mrf.mxu0  ;;  %v3968_v3 = vpop.f32.mrf.mxu1 }
 0x28b   :  { %6095 = vmatprep.subr.msk.mxu0 %vm4138_vm1, %v6595_v62 }
 0x28c   :  { %6096 = vmatpush1.msk.msra.mxu0 %vm4138_vm1, %v6597_v0 }
 0x28d   :  { %6097 = vmatmul.mubr.msk.f32.vlgmr.msra.gmra.mxu0 %vm4134_vm2, %v6373_v22 }
 0x28e   :  { %4626 = vmatprep.mubr.f32.mxu0 %v6372_v9 }
 0x2c4   :  { %v4004_v8 = vpop.f32.mrf.mxu0  ;;  %v4045_v16 = vpop.f32.mrf.mxu1 }
 0x2c5   :  { %v4005_v24 = vadd.f32 %v4004_v8, %v6514_v13 }
 0x2c6   :  { %v4006_v12 = vpop.f32.mrf.mxu0  ;;  %v4047_v6 = vpop.f32.mrf.mxu1 }
 0x2c7   :  { %v4007_v25 = vadd.f32 %v4006_v12, %v6519_v19  ;;  %v4046_v29 = vadd.f32 %v4045_v16, %v4005_v24 }
 0x2c8   :  { %v4008_v7 = vpop.f32.mrf.mxu0  ;;  %v4049_v11 = vpop.f32.mrf.mxu1 }
 0x2c9   :  { %v4048_v59 = vadd.f32 %v4047_v6, %v4007_v25 }
 0x2ca   :  { %v4009_v14 = vpop.f32.mrf.mxu0  ;;  %v4050_v18 = vpop.f32.mrf.mxu1 }
 0x304   :  { %v4086_v43 = vpop.f32.mrf.mxu0  ;;  %v4127_v30 = vpop.f32.mrf.mxu1 }
 0x305   :  { %v4087_v33 = vadd.f32 %v4086_v43, %v4046_v29 }
 0x306   :  { %v4088_v23 = vpop.f32.mrf.mxu0  ;;  %v4129_v34 = vpop.f32.mrf.mxu1 }
 0x307   :  { %v4089_v5 = vadd.f32 %v4088_v23, %v4048_v59  ;;  %v6610_v37 = vadd.f32 %v4127_v30, %v4087_v33 }
 0x308   :  { %v4090_v35 = vpop.f32.mrf.mxu0  ;;  %v4131_v46 = vpop.f32.mrf.mxu1 }
 0x309   :  { %v6608_v36 = vadd.f32 %v4129_v34, %v4089_v5  ;;  %v6648_v46 = vsub.s32 0, %v6440_v57 }
 0x30a   :  { %v4091_v38 = vpop.f32.mrf.mxu0  ;;  %v4132_v39 = vpop.f32.mrf.mxu1 }
 0x30b   :  { %6098 = vmatprep.subr.msk.mxu1 %vm4138_vm1, %v6608_v36 }
 0x30c   :  { %6099 = vmatpush1.msk.msra.mxu1 %vm4138_vm1, %v6610_v37  ;;  %v4229_v13 = vpop.f32.mrf.mxu0  ;;  %v4300_v19 = vpop.f32.mrf.mxu1 }
 0x30d   :  { %6100 = vmatmul.mubr.msk.f32.vlgmr.msra.gmra.mxu1 %vm4134_vm2, %v6373_v22  ;;  %4447 = vrot.lane.b32.xlu0 %v4229_v13, %s6374_s0 }
 0x30e   :  { %4451 = vrot.lane.b32.xlu1 %v4300_v19, %s6374_s0  ;;  %v4231_v40 = vpop.f32.mrf.mxu0  ;;  %4697 = vmatprep.mubr.f32.mxu1 %v6372_v9  ;;  %v4302_v41 = vpop.f32.mrf.mxu1 }
 0x311   :  { %4449 = vrot.lane.b32.xlu0 %v4231_v40, %s6374_s0 }
 0x312   :  { %4453 = vrot.lane.b32.xlu1 %v4302_v41, %s6374_s0 }
 0x34d   :  { %v4371_v4 = vpop.f32.mrf.mxu0 }
 0x34e   :  { %4455 = vrot.lane.b32.xlu0 %v4371_v4, %s6374_s0 }
 0x34f   :  { %v4373_v52 = vpop.f32.mrf.mxu0 }
 0x350   :  { %4457 = vrot.lane.b32.xlu1 %v4373_v52, %s6374_s0 }
 0x37f   :  { %v4448_v32 = vpop.permute.xlu0 %4447 }
 0x380   :  { %v4452_v44 = vpop.permute.xlu1 %4451 }
 0x383   :  { %v4450_v17 = vpop.permute.xlu0 %4449 }
 0x384   :  { %v4454_v26 = vpop.permute.xlu1 %4453  ;;  %v4471_v50 = vsel %vm4465_vm3, %v4450_v17, %v4452_v44  ;;  %v4472_v51 = vsel %vm4465_vm3, %v4448_v32, %v4450_v17 }
 0x385   :  { %v4470_v31 = vsel %vm4465_vm3, %v4452_v44, %v4454_v26  ;;  %v4475_v54 = vadd.f32 %v4472_v51, %v4231_v40  ;;  %v4476_v55 = vadd.f32 %v4471_v50, %v4300_v19 }
 0x386   :  { %v4477_v28 = vadd.f32 %v4470_v31, %v4302_v41 }
 0x387   :  { %v4484_v63 = vadd.f32 %v4476_v55, %v4475_v54 }
 0x388   :  { %v4485_v1 = vadd.f32 %v4477_v28, %v4476_v55 }
 0x3c0   :  { %v4456_v21 = vpop.permute.xlu0 %4455 }
 0x3c1   :  { %v4469_v53 = vsel %vm4465_vm3, %v4454_v26, %v4456_v21 }
 0x3c2   :  { %v4458_v49 = vpop.permute.xlu1 %4457  ;;  %v4478_v56 = vadd.f32 %v4469_v53, %v4371_v4 }
 0x3c3   :  { %v4468_v47 = vsel %vm4465_vm3, %v4456_v21, %v4458_v49 }
 0x3c4   :  { %v4479_v58 = vadd.f32 %v4468_v47, %v4373_v52  ;;  %v4486_v16 = vadd.f32 %v4478_v56, %v4477_v28 }
 0x3c6   :  { %v4487_v12 = vadd.f32 %v4479_v58, %v4478_v56  ;;  %v4494_v43 = vadd.f32 %v4486_v16, %v4484_v63 }
 0x3c8   :  { %v4495_v59 = vadd.f32 %v4487_v12, %v4485_v1 }
 0x3cd   :  { %v4442_v15 = vpop.f32.mrf.mxu1 }
 0x3ce   :  { %4459 = vrot.lane.b32.xlu0 %v4442_v15, %s6374_s0 }
 0x3cf   :  { %v4444_v20 = vpop.f32.mrf.mxu1 }
 0x3d0   :  { %4461 = vrot.lane.b32.xlu1 %v4444_v20, %s6374_s0 }
 0x440   :  { %v4460_v60 = vpop.permute.xlu0 %4459 }
 0x441   :  { %v4467_v61 = vsel %vm4465_vm3, %v4458_v49, %v4460_v60 }
 0x442   :  { %v4480_v3 = vadd.f32 %v4467_v61, %v4442_v15  ;;  %v4462_v8 = vpop.permute.xlu1 %4461 }
 0x443   :  { %v4466_v6 = vsel %vm4465_vm3, %v4460_v60, %v4462_v8  ;;  %v4473_v7 = vsel %vm4465_vm3, %v4462_v8, %v4448_v32 }
 0x444   :  { %v4488_v11 = vadd.f32 %v4480_v3, %v4479_v58  ;;  %v4474_v14 = vadd.f32 %v4473_v7, %v4229_v13  ;;  %v4481_v18 = vadd.f32 %v4466_v6, %v4444_v20  ;;  %v5163_v6 = vld [vmem:[%s7204_s6 + $0xf8] sm:$0xff] }
 0x445   :  { %v5195_v7 = vld [vmem:[%s7204_s6 + $0x1f8] sm:$0xff] }
 0x446   :  { %v4482_v24 = vadd.f32 %v4481_v18, %v4474_v14  ;;  %v4483_v25 = vadd.f32 %v4475_v54, %v4474_v14  ;;  %v4489_v29 = vadd.f32 %v4481_v18, %v4480_v3  ;;  %v4496_v30 = vadd.f32 %v4488_v11, %v4486_v16  ;;  %v5179_v14 = vld [vmem:[%s7204_s6 + $0x178] sm:$0xff]  ;;  %v5162_v18 = vld [vmem:[%s7204_s6 + $0xf0] sm:$0xff] }
 0x448   :  { %v4490_v33 = vadd.f32 %v4488_v11, %v4482_v24  ;;  %v4491_v23 = vadd.f32 %v4489_v29, %v4483_v25  ;;  %v4492_v5 = vadd.f32 %v4484_v63, %v4482_v24  ;;  %v4493_v34 = vadd.f32 %v4485_v1, %v4483_v25  ;;  %v5147_v11 = vld [vmem:[%s7204_s6 + $0x78] sm:$0xff]  ;;  %v5194_v24 = vld [vmem:[%s7204_s6 + $0x1f0] sm:$0xff] }
 0x449   :  { %v4497_v35 = vadd.f32 %v4489_v29, %v4487_v12  ;;  %v5146_v25 = vld [vmem:[%s7204_s6 + $0x70] sm:$0xff] }
 0x44a   :  { %v4498_v38 = vadd.f32 %v4494_v43, %v4490_v33  ;;  %v4499_v39 = vadd.f32 %v4495_v59, %v4491_v23  ;;  %v4500_v19 = vadd.f32 %v4496_v30, %v4492_v5  ;;  %v5178_v29 = vld [vmem:[%s7204_s6 + $0x170] sm:$0xff]  ;;  %v5161_v43 = vld [vmem:[%s7204_s6 + $0xe8] sm:$0xff]  ;;  %v5160_v23 = vld [vmem:[%s7204_s6 + $0xe0] sm:$0xff] }
 0x44b   :  { %v4501_v40 = vadd.f32 %v4497_v35, %v4493_v34  ;;  %v5193_v59 = vld [vmem:[%s7204_s6 + $0x1e8] sm:$0xff]  ;;  %v5192_v5 = vld [vmem:[%s7204_s6 + $0x1e0] sm:$0xff] }
 0x44c   :  { %v6650_v13 = vmul.f32 0.03125, %v4498_v38  ;;  %v6652_v41 = vmul.f32 0.03125, %v4499_v39  ;;  %v6654_v4 = vmul.f32 0.03125, %v4500_v19  ;;  %v5145_v30 = vld [vmem:[%s7204_s6 + $0x68] sm:$0xff]  ;;  %v5144_v34 = vld [vmem:[%s7204_s6 + $0x60] sm:$0xff]  ;;  %v5159_v38 = vld [vmem:[%s7204_s6 + $0xd8] sm:$0xff] }
 0x44d   :  { %v6656_v52 = vmul.f32 0.03125, %v4501_v40  ;;  %v5177_v33 = vld [vmem:[%s7204_s6 + $0x168] sm:$0xff]  ;;  %v5176_v35 = vld [vmem:[%s7204_s6 + $0x160] sm:$0xff]  ;;  %v5191_v39 = vld [vmem:[%s7204_s6 + $0x1d8] sm:$0xff] }
 0x44e   :  { %v4509_v15 = vrot.slane %v6650_v13, %v6648_v46  ;;  %v4517_v20 = vrot.slane %v6654_v4, %v6648_v46  ;;  %v4513_v44 = vrot.slane %v6652_v41, %v6648_v46  ;;  %v5143_v19 = vld [vmem:[%s7204_s6 + $0x58] sm:$0xff] }
 0x44f   :  { %v4521_v32 = vrot.slane %v6656_v52, %v6648_v46  ;;  %v5175_v40 = vld [vmem:[%s7204_s6 + $0x158] sm:$0xff] }
 0x450   :  { %v4523_v26 = vsub.f32 %v6541_v10, %v4513_v44  ;;  %v4522_v17 = vsub.f32 %v6536_v27, %v4509_v15  ;;  %v4524_v21 = vsub.f32 %v6577_v48, %v4517_v20  ;;  %v4527_v31 = vsub.f32 %v6595_v62, %v4513_v44  ;;  %v5142_v44 = vld [vmem:[%s7204_s6 + $0x50] sm:$0xff] }
 0x451   :  { %v4525_v49 = vsub.f32 %v6570_v42, %v4521_v32  ;;  %v4529_v50 = vsub.f32 %v6608_v36, %v4521_v32  ;;  %v4526_v28 = vsub.f32 %v6597_v0, %v4509_v15  ;;  %v4528_v55 = vsub.f32 %v6610_v37, %v4517_v20  ;;  %v5158_v15 = vld [vmem:[%s7204_s6 + $0xd0] sm:$0xff] }
 0x452   :  { %v4531_v51 = vmul.f32 %v4523_v26, %v4523_v26  ;;  %v4530_v53 = vmul.f32 %v4522_v17, %v4522_v17  ;;  %v4532_v47 = vmul.f32 %v4524_v21, %v4524_v21  ;;  %v4535_v56 = vmul.f32 %v4527_v31, %v4527_v31  ;;  %v5190_v20 = vld [vmem:[%s7204_s6 + $0x1d0] sm:$0xff]  ;;  %v5157_v26 = vld [vmem:[%s7204_s6 + $0xc8] sm:$0xff]  ;;  %v5156_v31 = vld [vmem:[%s7204_s6 + $0xc0] sm:$0xff] }
 0x453   :  { %v4533_v54 = vmul.f32 %v4525_v49, %v4525_v49  ;;  %v4537_v58 = vmul.f32 %v4529_v50, %v4529_v50  ;;  %v4534_v60 = vmul.f32 %v4526_v28, %v4526_v28  ;;  %v4536_v61 = vmul.f32 %v4528_v55, %v4528_v55  ;;  %v5174_v32 = vld [vmem:[%s7204_s6 + $0x150] sm:$0xff]  ;;  %v5189_v17 = vld [vmem:[%s7204_s6 + $0x1c8] sm:$0xff]  ;;  %v5188_v50 = vld [vmem:[%s7204_s6 + $0x1c0] sm:$0xff] }
 0x454   :  { %6101 = vmatprep.subr.msk.mxu0 %vm4138_vm1, %v4531_v51  ;;  %v5141_v21 = vld [vmem:[%s7204_s6 + $0x48] sm:$0xff]  ;;  %v5140_v51 = vld [vmem:[%s7204_s6 + $0x40] sm:$0xff]  ;;  %v5187_v28 = vld [vmem:[%s7204_s6 + $0x1b8] sm:$0xff] }
 0x455   :  { %6104 = vmatprep.subr.msk.mxu1 %vm4138_vm1, %v4533_v54  ;;  %6102 = vmatpush1.msk.msra.mxu0 %vm4138_vm1, %v4530_v53  ;;  %v5173_v49 = vld [vmem:[%s7204_s6 + $0x148] sm:$0xff]  ;;  %v5172_v53 = vld [vmem:[%s7204_s6 + $0x140] sm:$0xff]  ;;  %v5139_v54 = vld [vmem:[%s7204_s6 + $0x38] sm:$0xff] }
 0x456   :  { %6105 = vmatpush1.msk.msra.mxu1 %vm4138_vm1, %v4532_v47  ;;  %6103 = vmatmul.mubr.msk.f32.vlgmr.msra.gmra.mxu0 %vm4134_vm2, %v6373_v22  ;;  %v5155_v47 = vld [vmem:[%s7204_s6 + $0xb8] sm:$0xff] }
 0x457   :  { %6107 = vmatprep.subr.msk.mxu0 %vm4138_vm1, %v4535_v56  ;;  %6110 = vmatprep.subr.msk.mxu1 %vm4138_vm1, %v4537_v58  ;;  %v5171_v55 = vld [vmem:[%s7204_s6 + $0x138] sm:$0xff]  ;;  %v5154_v56 = vld [vmem:[%s7204_s6 + $0xb0] sm:$0xff] }
 0x458   :  { %6106 = vmatmul.mubr.msk.f32.vlgmr.msra.gmra.mxu1 %vm4134_vm2, %v6373_v22  ;;  %6108 = vmatpush1.msk.msra.mxu0 %vm4138_vm1, %v4534_v60  ;;  %v5186_v58 = vld [vmem:[%s7204_s6 + $0x1b0] sm:$0xff] }
 0x459   :  { %6111 = vmatpush1.msk.msra.mxu1 %vm4138_vm1, %v4536_v61  ;;  %4768 = vmatprep.mubr.f32.mxu0 %v6372_v9  ;;  %v5138_v60 = vld [vmem:[%s7204_s6 + $0x30] sm:$0xff] }
 0x45a   :  { %6109 = vmatmul.mubr.msk.f32.vlgmr.msra.gmra.mxu0 %vm4134_vm2, %v6373_v22  ;;  %4839 = vmatprep.mubr.f32.mxu1 %v6372_v9  ;;  %v5170_v61 = vld [vmem:[%s7204_s6 + $0x130] sm:$0xff] }
 0x45b   :  { %6114 = vmatprep.subr.mxu0 %v5163_v6  ;;  %6149 = vmatprep.subr.mxu1 %v5195_v7  ;;  %v5153_v6 = vld [vmem:[%s7204_s6 + $0xa8] sm:$0xff] }
 0x45c   :  { %6112 = vmatmul.mubr.msk.f32.vlgmr.msra.gmra.mxu1 %vm4134_vm2, %v6373_v22  ;;  %6115 = vmatpush3.msra.mxu0 %v5147_v11  ;;  %v5185_v7 = vld [vmem:[%s7204_s6 + $0x1a8] sm:$0xff] }
 0x45d   :  { %6150 = vmatpush3.msra.mxu1 %v5179_v14  ;;  %6116 = vmatprep.subr.mxu0 %v5162_v18  ;;  %v5137_v11 = vld [vmem:[%s7204_s6 + $0x28] sm:$0xff]  ;;  %v5152_v18 = vld [vmem:[%s7204_s6 + $0xa0] sm:$0xff] }
 0x45e   :  { %6151 = vmatprep.subr.mxu1 %v5194_v24  ;;  %6117 = vmatpush3.msra.mxu0 %v5146_v25  ;;  %v5169_v14 = vld [vmem:[%s7204_s6 + $0x128] sm:$0xff]  ;;  %v5184_v24 = vld [vmem:[%s7204_s6 + $0x1a0] sm:$0xff] }
 0x45f   :  { %6152 = vmatpush3.msra.mxu1 %v5178_v29  ;;  %6118 = vmatprep.subr.mxu0 %v5161_v43  ;;  %v5136_v25 = vld [vmem:[%s7204_s6 + $0x20] sm:$0xff]  ;;  %v5151_v43 = vld [vmem:[%s7204_s6 + $0x98] sm:$0xff] }
 0x460   :  { %6153 = vmatprep.subr.mxu1 %v5193_v59  ;;  %6119 = vmatpush3.msra.mxu0 %v5145_v30  ;;  %v5168_v29 = vld [vmem:[%s7204_s6 + $0x120] sm:$0xff]  ;;  %v5183_v59 = vld [vmem:[%s7204_s6 + $0x198] sm:$0xff] }
 0x461   :  { %6154 = vmatpush3.msra.mxu1 %v5177_v33  ;;  %6120 = vmatprep.subr.mxu0 %v5160_v23  ;;  %v5135_v30 = vld [vmem:[%s7204_s6 + $0x18] sm:$0xff]  ;;  %v5150_v23 = vld [vmem:[%s7204_s6 + $0x90] sm:$0xff] }
 0x462   :  { %6155 = vmatprep.subr.mxu1 %v5192_v5  ;;  %6121 = vmatpush3.msra.mxu0 %v5144_v34  ;;  %v5167_v33 = vld [vmem:[%s7204_s6 + $0x118] sm:$0xff]  ;;  %v5182_v5 = vld [vmem:[%s7204_s6 + $0x190] sm:$0xff] }
 0x463   :  { %6156 = vmatpush3.msra.mxu1 %v5176_v35  ;;  %6122 = vmatprep.subr.mxu0 %v5159_v38  ;;  %v5134_v34 = vld [vmem:[%s7204_s6 + $0x10] sm:$0xff]  ;;  %v5149_v38 = vld [vmem:[%s7204_s6 + $0x88] sm:$0xff] }
 0x464   :  { %6157 = vmatprep.subr.mxu1 %v5191_v39  ;;  %6123 = vmatpush3.msra.mxu0 %v5143_v19  ;;  %v5166_v35 = vld [vmem:[%s7204_s6 + $0x110] sm:$0xff]  ;;  %v5181_v39 = vld [vmem:[%s7204_s6 + $0x188] sm:$0xff] }
 0x465   :  { %6158 = vmatpush3.msra.mxu1 %v5175_v40  ;;  %6124 = vmatprep.subr.mxu0 %v5158_v15  ;;  %v5133_v19 = vld [vmem:[%s7204_s6 + $0x8] sm:$0xff]  ;;  %v5148_v15 = vld [vmem:[%s7204_s6 + $0x80] sm:$0xff] }
 0x466   :  { %6159 = vmatprep.subr.mxu1 %v5190_v20  ;;  %6125 = vmatpush3.msra.mxu0 %v5142_v44  ;;  %v5165_v40 = vld [vmem:[%s7204_s6 + $0x108] sm:$0xff]  ;;  %v5180_v20 = vld [vmem:[%s7204_s6 + $0x180] sm:$0xff] }
 0x467   :  { %6160 = vmatpush3.msra.mxu1 %v5174_v32  ;;  %6126 = vmatprep.subr.mxu0 %v5157_v26  ;;  %v5132_v44 = vld [vmem:[%s7204_s6] sm:$0xff]  ;;  %v5227_v26 = vld [vmem:[%s7204_s6 + $0x2f8] sm:$0xff] }
 0x468   :  { %6161 = vmatprep.subr.mxu1 %v5189_v17  ;;  %6127 = vmatpush3.msra.mxu0 %v5141_v21  ;;  %v5164_v32 = vld [vmem:[%s7204_s6 + $0x100] sm:$0xff]  ;;  %v5259_v17 = vld [vmem:[%s7204_s6 + $0x3f8] sm:$0xff] }
 0x469   :  { %6162 = vmatpush3.msra.mxu1 %v5173_v49  ;;  %6128 = vmatprep.subr.mxu0 %v5156_v31 }
 0x46a   :  { %6163 = vmatprep.subr.mxu1 %v5188_v50  ;;  %6129 = vmatpush3.msra.mxu0 %v5140_v51 }
 0x46b   :  { %6164 = vmatpush3.msra.mxu1 %v5172_v53  ;;  %6130 = vmatprep.subr.mxu0 %v5155_v47 }
 0x46c   :  { %6165 = vmatprep.subr.mxu1 %v5187_v28  ;;  %6131 = vmatpush3.msra.mxu0 %v5139_v54 }
 0x46d   :  { %6166 = vmatpush3.msra.mxu1 %v5171_v55  ;;  %6132 = vmatprep.subr.mxu0 %v5154_v56 }
 0x46e   :  { %6167 = vmatprep.subr.mxu1 %v5186_v58  ;;  %6133 = vmatpush3.msra.mxu0 %v5138_v60 }
 0x46f   :  { %6168 = vmatpush3.msra.mxu1 %v5170_v61  ;;  %6134 = vmatprep.subr.mxu0 %v5153_v6 }
 0x470   :  { %6169 = vmatprep.subr.mxu1 %v5185_v7  ;;  %6135 = vmatpush3.msra.mxu0 %v5137_v11 }
 0x471   :  { %6170 = vmatpush3.msra.mxu1 %v5169_v14  ;;  %6136 = vmatprep.subr.mxu0 %v5152_v18 }
 0x472   :  { %6171 = vmatprep.subr.mxu1 %v5184_v24  ;;  %6137 = vmatpush3.msra.mxu0 %v5136_v25 }
 0x473   :  { %6172 = vmatpush3.msra.mxu1 %v5168_v29  ;;  %6138 = vmatprep.subr.mxu0 %v5151_v43 }
 0x474   :  { %6173 = vmatprep.subr.mxu1 %v5183_v59  ;;  %6139 = vmatpush3.msra.mxu0 %v5135_v30 }
 0x475   :  { %6174 = vmatpush3.msra.mxu1 %v5167_v33  ;;  %6140 = vmatprep.subr.mxu0 %v5150_v23 }
 0x476   :  { %6175 = vmatprep.subr.mxu1 %v5182_v5  ;;  %6141 = vmatpush3.msra.mxu0 %v5134_v34 }
 0x477   :  { %6176 = vmatpush3.msra.mxu1 %v5166_v35  ;;  %6142 = vmatprep.subr.mxu0 %v5149_v38 }
 0x478   :  { %6177 = vmatprep.subr.mxu1 %v5181_v39  ;;  %6143 = vmatpush3.msra.mxu0 %v5133_v19 }
 0x479   :  { %6178 = vmatpush3.msra.mxu1 %v5165_v40  ;;  %6144 = vmatprep.subr.mxu0 %v5148_v15 }
 0x47a   :  { %6179 = vmatprep.subr.mxu1 %v5180_v20  ;;  %6145 = vmatpush3.msra.mxu0 %v5132_v44 }
 0x47b   :  { %6180 = vmatpush3.msra.mxu1 %v5164_v32  ;;  %6184 = vmatprep.subr.mxu0 %v5227_v26 }
 0x47c   :  { %6219 = vmatprep.subr.mxu1 %v5259_v17 }
 0x516   :  { %v6692_v63 = vpop.f32.mrf.mxu0 }
 0x517   :  { %4846 = vrot.lane.b32.xlu0 %v6692_v63, %s6374_s0 }
 0x518   :  { %v6696_v1 = vpop.f32.mrf.mxu0  ;;  %v6698_v3 = vpop.f32.mrf.mxu1 }
 0x519   :  { %4848 = vrot.lane.b32.xlu1 %v6696_v1, %s6374_s0 }
 0x51a   :  { %v6704_v8 = vpop.f32.mrf.mxu1  ;;  %v6706_v9 = vpop.f32.mrf.mxu0 }
 0x51b   :  { %4850 = vrot.lane.b32.xlu0 %v6698_v3, %s6374_s0 }
 0x51c   :  { %v6712_v22 = vpop.f32.mrf.mxu0  ;;  %v6714_v16 = vpop.f32.mrf.mxu1 }
 0x51d   :  { %4852 = vrot.lane.b32.xlu1 %v6704_v8, %s6374_s0 }
 0x51e   :  { %v6720_v12 = vpop.f32.mrf.mxu1 }
 0x51f   :  { %4854 = vrot.lane.b32.xlu0 %v6706_v9, %s6374_s0 }
 0x521   :  { %4856 = vrot.lane.b32.xlu1 %v6712_v22, %s6374_s0 }
 0x523   :  { %4858 = vrot.lane.b32.xlu0 %v6714_v16, %s6374_s0 }
 0x525   :  { %4860 = vrot.lane.b32.xlu1 %v6720_v12, %s6374_s0 }
 0x589   :  { %v4847_v21 = vpop.permute.xlu0 %4846 }
 0x58b   :  { %v4849_v49 = vpop.permute.xlu1 %4848 }
 0x58c   :  { %v4868_v55 = vsel %vm4465_vm3, %v4847_v21, %v4849_v49 }
 0x58d   :  { %v4851_v31 = vpop.permute.xlu0 %4850  ;;  %v4871_v14 = vadd.f32 %v4868_v55, %v6696_v1 }
 0x58e   :  { %v4867_v47 = vsel %vm4465_vm3, %v4849_v49, %v4851_v31 }
 0x58f   :  { %v4853_v50 = vpop.permute.xlu1 %4852  ;;  %v4872_v6 = vadd.f32 %v4867_v47, %v6698_v3 }
 0x590   :  { %v4866_v28 = vsel %vm4465_vm3, %v4851_v31, %v4853_v50 }
 0x591   :  { %v4855_v51 = vpop.permute.xlu0 %4854  ;;  %v4873_v7 = vadd.f32 %v4866_v28, %v6704_v8  ;;  %v4880_v59 = vadd.f32 %v4872_v6, %v4871_v14 }
 0x592   :  { %v4865_v53 = vsel %vm4465_vm3, %v4853_v50, %v4855_v51 }
 0x593   :  { %v4857_v54 = vpop.permute.xlu1 %4856  ;;  %v4874_v56 = vadd.f32 %v4865_v53, %v6706_v9  ;;  %v4881_v30 = vadd.f32 %v4873_v7, %v4872_v6 }
 0x594   :  { %v4864_v58 = vsel %vm4465_vm3, %v4855_v51, %v4857_v54 }
 0x595   :  { %v4875_v60 = vadd.f32 %v4864_v58, %v6712_v22  ;;  %v4859_v61 = vpop.permute.xlu0 %4858  ;;  %v4882_v25 = vadd.f32 %v4874_v56, %v4873_v7  ;;  %v4950_v7 = vsub.s32 1, %v6440_v57 }
 0x596   :  { %v4863_v11 = vsel %vm4465_vm3, %v4857_v54, %v4859_v61 }
 0x597   :  { %v4876_v18 = vadd.f32 %v4863_v11, %v6714_v16  ;;  %v4861_v24 = vpop.permute.xlu1 %4860  ;;  %v4883_v9 = vadd.f32 %v4875_v60, %v4874_v56  ;;  %v4890_v16 = vadd.f32 %v4882_v25, %v4880_v59  ;;  %v4954_v11 = vsub.s32 2, %v6440_v57 }
 0x598   :  { %v4862_v29 = vsel %vm4465_vm3, %v4859_v61, %v4861_v24  ;;  %v4869_v22 = vsel %vm4465_vm3, %v4861_v24, %v4847_v21  ;;  %v4902_v61 = vld [vmem:[#allocation7] sm:$0xff]  ;;  %v4966_v24 = vsub.s32 5, %v6440_v57 }
 0x599   :  { %v4884_v43 = vadd.f32 %v4876_v18, %v4875_v60  ;;  %v4870_v3 = vadd.f32 %v4869_v22, %v6692_v63  ;;  %v4877_v8 = vadd.f32 %v4862_v29, %v6720_v12  ;;  %v4891_v5 = vadd.f32 %v4883_v9, %v4881_v30 }
 0x59b   :  { %v4878_v33 = vadd.f32 %v4877_v8, %v4870_v3  ;;  %v4879_v1 = vadd.f32 %v4871_v14, %v4870_v3  ;;  %v4885_v23 = vadd.f32 %v4877_v8, %v4876_v18  ;;  %v4892_v34 = vadd.f32 %v4884_v43, %v4882_v25 }
 0x59c   :  { %v4958_v14 = vsub.s32 3, %v6440_v57  ;;  %v4962_v18 = vsub.s32 4, %v6440_v57  ;;  %v4970_v25 = vsub.s32 6, %v6440_v57 }
 0x59d   :  { %v4886_v35 = vadd.f32 %v4884_v43, %v4878_v33  ;;  %v4887_v38 = vadd.f32 %v4885_v23, %v4879_v1  ;;  %v4888_v39 = vadd.f32 %v4880_v59, %v4878_v33  ;;  %v4889_v19 = vadd.f32 %v4881_v30, %v4879_v1 }
 0x59e   :  { %v4893_v40 = vadd.f32 %v4885_v23, %v4883_v9  ;;  %v4974_v9 = vsub.s32 7, %v6440_v57  ;;  %v5247_v57 = vld [vmem:[%s7204_s6 + $0x398] sm:$0xff] }
 0x59f   :  { %v4894_v45 = vadd.f32 %v4890_v16, %v4886_v35  ;;  %v4895_v15 = vadd.f32 %v4891_v5, %v4887_v38  ;;  %v4896_v20 = vadd.f32 %v4892_v34, %v4888_v39 }
 0x5a0   :  { %v4897_v44 = vadd.f32 %v4893_v40, %v4889_v19 }
 0x5a1   :  { %v4898_v63 = vmul.f32 0.03125, %v4894_v45  ;;  %v4899_v32 = vmul.f32 0.03125, %v4895_v15  ;;  %v4900_v12 = vmul.f32 0.03125, %v4896_v20 }
 0x5a2   :  { %v4901_v26 = vmul.f32 0.03125, %v4897_v44 }
 0x5a3   :  { %v4903_v17 = vadd.f32 1e-05, %v4898_v63  ;;  %v4904_v21 = vadd.f32 1e-05, %v4899_v32  ;;  %v4905_v49 = vadd.f32 1e-05, %v4900_v12 }
 0x5a4   :  { %v4906_v31 = vadd.f32 1e-05, %v4901_v26 }
 0x5a5   :  { %6266 = vrsqrt.f32 %v4903_v17  ;;  %v4942_v17 = vld [vmem:[#allocation8] sm:$0xff] }
 0x5a6   :  { %6268 = vrsqrt.f32 %v4904_v21 }
 0x5a7   :  { %6270 = vrsqrt.f32 %v4905_v49 }
 0x5a8   :  { %6272 = vrsqrt.f32 %v4906_v31 }
 0x5b2   :  { %v6267_v50 = vpop.eup %6266 }
 0x5b3   :  { %v6269_v51 = vpop.eup %6268 }
 0x5b4   :  { %v6271_v53 = vpop.eup %6270  ;;  %v4915_v47 = vcombine.low %v6267_v50, %v6269_v51 }
 0x5b5   :  { %v6273_v28 = vpop.eup %6272 }
 0x5b6   :  { %v4916_v54 = vcombine.low %v6271_v53, %v6273_v28  ;;  %v4923_v55 = vrot.slane %v4915_v47, %v6443_v2 }
 0x5b8   :  { %v4930_v56 = vrot.slane %v4916_v54, %v6443_v2 }
 0x5ba   :  { %v4931_v58 = vcombine.low %v4923_v55, %v4930_v56 }
 0x5bc   :  { %v4938_v60 = vrot.slane %v4931_v58, %v6443_v2 }
 0x5be   :  { %v4939_v6 = vcombine.low %v4938_v60, %v4938_v60 }
 0x5c0   :  { %v4941_v29 = vmul.f32 %v4939_v6, %v4902_v61 }
 0x5c2   :  { %v4947_v22 = vrot.slane %v4941_v29, %v6648_v46  ;;  %v4951_v43 = vrot.slane %v4941_v29, %v4950_v7  ;;  %v4955_v3 = vrot.slane %v4941_v29, %v4954_v11  ;;  %v4959_v8 = vrot.slane %v4941_v29, %v4958_v14 }
 0x5c3   :  { %v6959_v59 = vrot.slane %v4941_v29, %v4962_v18  ;;  %v4967_v30 = vrot.slane %v4941_v29, %v4966_v24  ;;  %v6963_v33 = vrot.slane %v4941_v29, %v4970_v25  ;;  %v4975_v1 = vrot.slane %v4941_v29, %v4974_v9 }
 0x5c4   :  { %v4984_v23 = vmul.f32 %v4947_v22, %v6650_v13  ;;  %v4985_v16 = vmul.f32 %v4951_v43, %v6652_v41  ;;  %v4986_v5 = vmul.f32 %v4955_v3, %v6654_v4  ;;  %v4987_v34 = vmul.f32 %v4959_v8, %v6656_v52 }
 0x5c5   :  { %v4988_v35 = vmul.f32 %v6959_v59, %v6650_v13  ;;  %v4989_v38 = vmul.f32 %v4967_v30, %v6652_v41  ;;  %v4990_v39 = vmul.f32 %v6963_v33, %v6654_v4  ;;  %v4991_v19 = vmul.f32 %v4975_v1, %v6656_v52 }
 0x5c6   :  { %v5000_v40 = vcombine.low %v4984_v23, %v4985_v16  ;;  %v5001_v45 = vcombine.low %v4986_v5, %v4987_v34  ;;  %v5052_v49 = vmul.f32 %v4951_v43, %v6541_v10  ;;  %v5054_v31 = vmul.f32 %v4959_v8, %v6570_v42  ;;  %v5226_v43 = vld [vmem:[%s7204_s6 + $0x2f0] sm:$0xff]  ;;  %v5225_v5 = vld [vmem:[%s7204_s6 + $0x2e8] sm:$0xff] }
 0x5c7   :  { %v5002_v15 = vcombine.low %v4988_v35, %v4989_v38  ;;  %v5003_v20 = vcombine.low %v4990_v39, %v4991_v19  ;;  %v5051_v50 = vmul.f32 %v4947_v22, %v6536_v27  ;;  %v5053_v51 = vmul.f32 %v4955_v3, %v6577_v48  ;;  %v5258_v8 = vld [vmem:[%s7204_s6 + $0x3f0] sm:$0xff]  ;;  %v5257_v34 = vld [vmem:[%s7204_s6 + $0x3e8] sm:$0xff]  ;;  %v5224_v39 = vld [vmem:[%s7204_s6 + $0x2e0] sm:$0xff] }
 0x5c8   :  { %v5010_v44 = vrot.slane %v5000_v40, %v6443_v2  ;;  %v5017_v63 = vrot.slane %v5001_v45, %v6443_v2  ;;  %v5056_v54 = vmul.f32 %v4967_v30, %v6595_v62  ;;  %v5058_v10 = vmul.f32 %v4975_v1, %v6608_v36  ;;  %v5211_v36 = vld [vmem:[%s7204_s6 + $0x278] sm:$0xff]  ;;  %v5210_v1 = vld [vmem:[%s7204_s6 + $0x270] sm:$0xff]  ;;  %v5209_v35 = vld [vmem:[%s7204_s6 + $0x268] sm:$0xff] }
 0x5c9   :  { %v5024_v32 = vrot.slane %v5002_v15, %v6443_v2  ;;  %v5031_v12 = vrot.slane %v5003_v20, %v6443_v2  ;;  %v5242_v23 = vld [vmem:[%s7204_s6 + $0x370] sm:$0xff]  ;;  %v5241_v38 = vld [vmem:[%s7204_s6 + $0x368] sm:$0xff]  ;;  %v5256_v19 = vld [vmem:[%s7204_s6 + $0x3e0] sm:$0xff] }
 0x5ca   :  { %v5032_v13 = vcombine.low %v5010_v44, %v5017_v63  ;;  %v5208_v40 = vld [vmem:[%s7204_s6 + $0x260] sm:$0xff]  ;;  %v5223_v15 = vld [vmem:[%s7204_s6 + $0x2d8] sm:$0xff] }
 0x5cb   :  { %v5033_v26 = vcombine.low %v5024_v32, %v5031_v12  ;;  %v5240_v45 = vld [vmem:[%s7204_s6 + $0x360] sm:$0xff]  ;;  %v5255_v20 = vld [vmem:[%s7204_s6 + $0x3d8] sm:$0xff]  ;;  %v5222_v32 = vld [vmem:[%s7204_s6 + $0x2d0] sm:$0xff] }
 0x5cc   :  { %v5040_v41 = vrot.slane %v5032_v13, %v6443_v2  ;;  %v5207_v44 = vld [vmem:[%s7204_s6 + $0x258] sm:$0xff]  ;;  %v5254_v12 = vld [vmem:[%s7204_s6 + $0x3d0] sm:$0xff] }
 0x5cd   :  { %v5047_v4 = vrot.slane %v5033_v26, %v6443_v2  ;;  %v5239_v63 = vld [vmem:[%s7204_s6 + $0x358] sm:$0xff]  ;;  %v5206_v13 = vld [vmem:[%s7204_s6 + $0x250] sm:$0xff] }
 0x5ce   :  { %v5238_v26 = vld [vmem:[%s7204_s6 + $0x350] sm:$0xff] }
 0x5cf   :  { %v5048_v52 = vcombine.low %v5040_v41, %v5047_v4  ;;  %v5221_v41 = vld [vmem:[%s7204_s6 + $0x2c8] sm:$0xff] }
 0x5d0   :  { %v5253_v4 = vld [vmem:[%s7204_s6 + $0x3c8] sm:$0xff] }
 0x5d1   :  { %v6981_v21 = vsub.f32 %v4942_v17, %v5048_v52  ;;  %v5205_v17 = vld [vmem:[%s7204_s6 + $0x248] sm:$0xff] }
 0x5d2   :  { %v5237_v52 = vld [vmem:[%s7204_s6 + $0x348] sm:$0xff] }
 0x5d3   :  { %v5067_v53 = vrot.slane %v6981_v21, %v4950_v7  ;;  %v5075_v47 = vrot.slane %v6981_v21, %v4958_v14  ;;  %v5063_v28 = vrot.slane %v6981_v21, %v6648_v46  ;;  %v5071_v2 = vrot.slane %v6981_v21, %v4954_v11 }
 0x5d4   :  { %v5083_v55 = vrot.slane %v6981_v21, %v4966_v24  ;;  %v5091_v42 = vrot.slane %v6981_v21, %v4974_v9  ;;  %v5243_v24 = vld [vmem:[%s7204_s6 + $0x378] sm:$0xff] }
 0x5d5   :  { %v5101_v27 = vadd.f32 %v5067_v53, %v5052_v49  ;;  %v5103_v56 = vadd.f32 %v5075_v47, %v5054_v31  ;;  %v5100_v48 = vadd.f32 %v5063_v28, %v5051_v50  ;;  %v5102_v58 = vadd.f32 %v5071_v2, %v5053_v51  ;;  %v5220_v49 = vld [vmem:[%s7204_s6 + $0x2c0] sm:$0xff]  ;;  %v5219_v53 = vld [vmem:[%s7204_s6 + $0x2b8] sm:$0xff] }
 0x5d6   :  { %v5105_v60 = vadd.f32 %v5083_v55, %v5056_v54  ;;  %v5107_v61 = vadd.f32 %v5091_v42, %v5058_v10  ;;  %v5252_v31 = vld [vmem:[%s7204_s6 + $0x3c0] sm:$0xff]  ;;  %v5251_v47 = vld [vmem:[%s7204_s6 + $0x3b8] sm:$0xff]  ;;  %v5218_v54 = vld [vmem:[%s7204_s6 + $0x2b0] sm:$0xff] }
 0x5d7   :  { %vm5109_vm4 = vcmp.ge.f32.partialorder %v5101_v27, 0.0  ;;  %v5117_v6 = vmul.f32 0.2, %v5101_v27  ;;  %vm5111_vm5 = vcmp.ge.f32.partialorder %v5103_v56, 0.0  ;;  %v5119_v46 = vmul.f32 0.2, %v5103_v56 }
 0x5d8   :  { %vm5108_vm6 = vcmp.ge.f32.partialorder %v5100_v48, 0.0  ;;  %v5116_v7 = vmul.f32 0.2, %v5100_v48  ;;  %vm5110_vm7 = vcmp.ge.f32.partialorder %v5102_v58, 0.0  ;;  %v5118_v62 = vmul.f32 0.2, %v5102_v58 }
 0x5d9   :  { %v5125_v11 = vsel %vm5109_vm4, %v5101_v27, %v5117_v6  ;;  %v5127_v14 = vsel %vm5111_vm5, %v5103_v56, %v5119_v46  ;;  %vm5113_vm8 = vcmp.ge.f32.partialorder %v5105_v60, 0.0  ;;  %v5121_v9 = vmul.f32 0.2, %v5105_v60  ;;  %v5204_v50 = vld [vmem:[%s7204_s6 + $0x240] sm:$0xff]  ;;  %v5203_v28 = vld [vmem:[%s7204_s6 + $0x238] sm:$0xff]  ;;  %v5250_v55 = vld [vmem:[%s7204_s6 + $0x3b0] sm:$0xff] }
 0x5da   :  { %5326 = vmatprep.mubr.f32.mxu0 %v5125_v11  ;;  %5396 = vmatprep.mubr.f32.mxu1 %v5127_v14  ;;  %v5124_v29 = vsel %vm5108_vm6, %v5100_v48, %v5116_v7  ;;  %v5126_v22 = vsel %vm5110_vm7, %v5102_v58, %v5118_v62  ;;  %vm5115_vm9 = vcmp.ge.f32.partialorder %v5107_v61, 0.0  ;;  %v5123_v3 = vmul.f32 0.2, %v5107_v61  ;;  %v5236_v51 = vld [vmem:[%s7204_s6 + $0x340] sm:$0xff]  ;;  %v5235_v2 = vld [vmem:[%s7204_s6 + $0x338] sm:$0xff]  ;;  %v5202_v10 = vld [vmem:[%s7204_s6 + $0x230] sm:$0xff] }
 0x5db   :  { %5327 = vmatmul.mubr.f32.vlgmr.msra.gmra.mxu0 %v5124_v29  ;;  %5397 = vmatmul.mubr.f32.vlgmr.msra.gmra.mxu1 %v5126_v22  ;;  %v5129_v30 = vsel %vm5113_vm8, %v5105_v60, %v5121_v9  ;;  %v5234_v42 = vld [vmem:[%s7204_s6 + $0x330] sm:$0xff]  ;;  %v5217_v27 = vld [vmem:[%s7204_s6 + $0x2a8] sm:$0xff]  ;;  %v5216_v60 = vld [vmem:[%s7204_s6 + $0x2a0] sm:$0xff]  ;;  %v5079_v6 = vrot.slane %v6981_v21, %v4962_v18  ;;  %v5087_v46 = vrot.slane %v6981_v21, %v4970_v25 }
 0x5dc   :  { %6185 = vmatpush3.msra.mxu0 %v5211_v36  ;;  %6220 = vmatpush3.msra.mxu1 %v5243_v24  ;;  %v5131_v16 = vsel %vm5115_vm9, %v5107_v61, %v5123_v3  ;;  %v5249_v56 = vld [vmem:[%s7204_s6 + $0x3a8] sm:$0xff]  ;;  %v5248_v61 = vld [vmem:[%s7204_s6 + $0x3a0] sm:$0xff]  ;;  %v5215_v18 = vld [vmem:[%s7204_s6 + $0x298] sm:$0xff]  ;;  %v5055_v25 = vmul.f32 %v6959_v59, %v6597_v0  ;;  %v5057_v21 = vmul.f32 %v6963_v33, %v6610_v37 }
 0x5dd   :  { %6186 = vmatprep.subr.mxu0 %v5226_v43  ;;  %5466 = vmatprep.mubr.f32.mxu0 %v5129_v30  ;;  %v5201_v48 = vld [vmem:[%s7204_s6 + $0x228] sm:$0xff]  ;;  %v5200_v7 = vld [vmem:[%s7204_s6 + $0x220] sm:$0xff]  ;;  %v5199_v11 = vld [vmem:[%s7204_s6 + $0x218] sm:$0xff] }
 0x5de   :  { %6221 = vmatprep.subr.mxu1 %v5258_v8  ;;  %5536 = vmatprep.mubr.f32.mxu1 %v5131_v16  ;;  %v5233_v58 = vld [vmem:[%s7204_s6 + $0x328] sm:$0xff]  ;;  %v5232_v62 = vld [vmem:[%s7204_s6 + $0x320] sm:$0xff]  ;;  %v5231_v14 = vld [vmem:[%s7204_s6 + $0x318] sm:$0xff]  ;;  %v5104_v37 = vadd.f32 %v5079_v6, %v5055_v25  ;;  %v5106_v59 = vadd.f32 %v5087_v46, %v5057_v21 }
 0x5df   :  { %6187 = vmatpush3.msra.mxu0 %v5210_v1  ;;  %6222 = vmatpush3.msra.mxu1 %v5242_v23  ;;  %v5214_v36 = vld [vmem:[%s7204_s6 + $0x290] sm:$0xff]  ;;  %v5213_v9 = vld [vmem:[%s7204_s6 + $0x288] sm:$0xff]  ;;  %v5212_v3 = vld [vmem:[%s7204_s6 + $0x280] sm:$0xff] }
 0x5e0   :  { %6188 = vmatprep.subr.mxu0 %v5225_v5  ;;  %6223 = vmatprep.subr.mxu1 %v5257_v34  ;;  %v5246_v0 = vld [vmem:[%s7204_s6 + $0x390] sm:$0xff]  ;;  %v5245_v29 = vld [vmem:[%s7204_s6 + $0x388] sm:$0xff]  ;;  %v5244_v8 = vld [vmem:[%s7204_s6 + $0x380] sm:$0xff]  ;;  %v5120_v30 = vmul.f32 0.2, %v5104_v37  ;;  %vm5112_vm10 = vcmp.ge.f32.partialorder %v5104_v37, 0.0 }
 0x5e1   :  { %6189 = vmatpush3.msra.mxu0 %v5209_v35  ;;  %6224 = vmatpush3.msra.mxu1 %v5241_v38  ;;  %v5198_v33 = vld [vmem:[%s7204_s6 + $0x210] sm:$0xff]  ;;  %v5197_v22 = vld [vmem:[%s7204_s6 + $0x208] sm:$0xff]  ;;  %v5122_v1 = vmul.f32 0.2, %v5106_v59  ;;  %v5196_v23 = vld [vmem:[%s7204_s6 + $0x200] sm:$0xff]  ;;  %vm5114_vm11 = vcmp.ge.f32.partialorder %v5106_v59, 0.0 }
 0x5e2   :  { %6190 = vmatprep.subr.mxu0 %v5224_v39  ;;  %6225 = vmatprep.subr.mxu1 %v5256_v19  ;;  %v5230_v24 = vld [vmem:[%s7204_s6 + $0x310] sm:$0xff]  ;;  %v5229_v43 = vld [vmem:[%s7204_s6 + $0x308] sm:$0xff]  ;;  %v5228_v16 = vld [vmem:[%s7204_s6 + $0x300] sm:$0xff]  ;;  %v5128_v5 = vsel %vm5112_vm10, %v5104_v37, %v5120_v30 }
 0x5e3   :  { %6191 = vmatpush3.msra.mxu0 %v5208_v40  ;;  %6226 = vmatpush3.msra.mxu1 %v5240_v45  ;;  %v5130_v34 = vsel %vm5114_vm11, %v5106_v59, %v5122_v1  ;;  %v5261_v40 = vstv %s7205_s7 }
 0x5e4   :  { %6192 = vmatprep.subr.mxu0 %v5223_v15  ;;  %6227 = vmatprep.subr.mxu1 %v5255_v20 }
 0x5e5   :  { %6193 = vmatpush3.msra.mxu0 %v5207_v44  ;;  %6228 = vmatpush3.msra.mxu1 %v5239_v63 }
 0x5e6   :  { %6194 = vmatprep.subr.mxu0 %v5222_v32  ;;  %6229 = vmatprep.subr.mxu1 %v5254_v12 }
 0x5e7   :  { %6195 = vmatpush3.msra.mxu0 %v5206_v13  ;;  %6230 = vmatpush3.msra.mxu1 %v5238_v26 }
 0x5e8   :  { %6196 = vmatprep.subr.mxu0 %v5221_v41  ;;  %6231 = vmatprep.subr.mxu1 %v5253_v4 }
 0x5e9   :  { %6197 = vmatpush3.msra.mxu0 %v5205_v17  ;;  %6232 = vmatpush3.msra.mxu1 %v5237_v52 }
 0x5ea   :  { %6198 = vmatprep.subr.mxu0 %v5220_v49  ;;  %6233 = vmatprep.subr.mxu1 %v5252_v31 }
 0x5eb   :  { %6199 = vmatpush3.msra.mxu0 %v5204_v50  ;;  %6234 = vmatpush3.msra.mxu1 %v5236_v51 }
 0x5ec   :  { %6200 = vmatprep.subr.mxu0 %v5219_v53  ;;  %6235 = vmatprep.subr.mxu1 %v5251_v47 }
 0x5ed   :  { %6201 = vmatpush3.msra.mxu0 %v5203_v28  ;;  %6236 = vmatpush3.msra.mxu1 %v5235_v2 }
 0x5ee   :  { %6202 = vmatprep.subr.mxu0 %v5218_v54  ;;  %6237 = vmatprep.subr.mxu1 %v5250_v55 }
 0x5ef   :  { %6203 = vmatpush3.msra.mxu0 %v5202_v10  ;;  %6238 = vmatpush3.msra.mxu1 %v5234_v42 }
 0x5f0   :  { %6204 = vmatprep.subr.mxu0 %v5217_v27  ;;  %6239 = vmatprep.subr.mxu1 %v5249_v56 }
 0x5f1   :  { %6205 = vmatpush3.msra.mxu0 %v5201_v48  ;;  %6240 = vmatpush3.msra.mxu1 %v5233_v58 }
 0x5f2   :  { %6206 = vmatprep.subr.mxu0 %v5216_v60  ;;  %6241 = vmatprep.subr.mxu1 %v5248_v61 }
 0x5f3   :  { %6207 = vmatpush3.msra.mxu0 %v5200_v7  ;;  %6242 = vmatpush3.msra.mxu1 %v5232_v62 }
 0x5f4   :  { %6208 = vmatprep.subr.mxu0 %v5215_v18  ;;  %6243 = vmatprep.subr.mxu1 %v5247_v57 }
 0x5f5   :  { %6209 = vmatpush3.msra.mxu0 %v5199_v11  ;;  %6244 = vmatpush3.msra.mxu1 %v5231_v14 }
 0x5f6   :  { %6210 = vmatprep.subr.mxu0 %v5214_v36  ;;  %6245 = vmatprep.subr.mxu1 %v5246_v0 }
 0x5f7   :  { %6211 = vmatpush3.msra.mxu0 %v5198_v33  ;;  %6246 = vmatpush3.msra.mxu1 %v5230_v24 }
 0x5f8   :  { %6212 = vmatprep.subr.mxu0 %v5213_v9  ;;  %6247 = vmatprep.subr.mxu1 %v5245_v29 }
 0x5f9   :  { %6213 = vmatpush3.msra.mxu0 %v5197_v22  ;;  %6248 = vmatpush3.msra.mxu1 %v5229_v43 }
 0x5fa   :  { %6214 = vmatprep.subr.mxu0 %v5212_v3  ;;  %6249 = vmatprep.subr.mxu1 %v5244_v8 }
 0x5fb   :  { %6215 = vmatpush3.msra.mxu0 %v5196_v23  ;;  %6250 = vmatpush3.msra.mxu1 %v5228_v16 }
 0x5fc   :  { %5467 = vmatmul.mubr.f32.vlgmr.msra.gmra.mxu0 %v5128_v5  ;;  %5537 = vmatmul.mubr.f32.vlgmr.msra.gmra.mxu1 %v5130_v34 }
 0x69b   :  { %v6146_v35 = vpop.f32.mrf.mxu0  ;;  %v6181_v39 = vpop.f32.mrf.mxu1 }
 0x69d   :  { %v6147_v38 = vpop.f32.mrf.mxu0  ;;  %v6182_v45 = vpop.f32.mrf.mxu1 }
 0x69e   :  { %v6148_v19 = vadd.f32 %v6147_v38, %v6146_v35  ;;  %v6183_v63 = vadd.f32 %v6182_v45, %v6181_v39 }
 0x6a0   :  { %v5329_v15 = vadd.f32 %v6148_v19, %v5261_v40 }
 0x6a2   :  { %v5399_v13 = vadd.f32 %v6183_v63, %v5329_v15 }
 0x6bc   :  { %v6216_v20 = vpop.f32.mrf.mxu0  ;;  %v6251_v44 = vpop.f32.mrf.mxu1 }
 0x6be   :  { %v6217_v32 = vpop.f32.mrf.mxu0  ;;  %v6252_v12 = vpop.f32.mrf.mxu1 }
 0x6bf   :  { %v6218_v26 = vadd.f32 %v6217_v32, %v6216_v20  ;;  %v6253_v4 = vadd.f32 %v6252_v12, %v6251_v44 }
 0x6c1   :  { %v5469_v41 = vadd.f32 %v6218_v26, %v5399_v13 }
 0x6c3   :  { %v5539_v17 = vadd.f32 %v6253_v4, %v5469_v41 }
 0x6c5   :  { %v6113_v52 = vmul.f32 -1.442695, %v5539_v17 }
 0x6c7   :  { %6274 = vpow2.f32 %v6113_v52 }
 0x6d4   :  { %v6275_v49 = vpop.eup %6274 }
 0x6d5   :  { %v5545_v31 = vadd.f32 1.0, %v6275_v49 }
 0x6d7   :  { %6276 = vrcp.f32 %v5545_v31 }
 0x6e4   :  { %v6277_v50 = vpop.eup %6276 }
 0x6e5   :  { %5549 = vst.msk [vmem:[%s7206_s8] sm:$0x3] %vm5548_vm12, %v6277_v50 }
 0x6e6   :  { %5554 = vsyncpa [#allocation4], 1 }
 0x6e7   :  { %5555 = vsyncpa [#allocation6], 1 }
 0x6e8   :  { %5556 = vsyncpa [#allocation9], 1 }

</bundles_post_ra>
